<compile_context>
chip_gen: v7x
topology: tpu7x:2x2x1
jax: 0.10.0
libtpu: 0.0.40
codegen_flags: <defaults>
</compile_context>

<pallas_src>
import functools
import math

import jax
import jax.numpy as jnp
from jax import lax
from jax.experimental import pallas as pl
from jax.experimental.pallas import tpu as pltpu


# ------------------------------ Pallas kernel --------------------------------

def _galayer_fused_kernel(L_ref, feat_ref, diag_ref, w1_ref, wqkv_ref, bqkv_ref,
                          w2_ref, bout_ref, out_ref, *, num_heads, tile_m, compute_dtype):
    i = pl.program_id(0)
    row0 = pl.multiple_of(i * tile_m, tile_m)

    feats = feat_ref[...]                                 # (N, D)       compute dtype
    x = feat_ref[pl.ds(row0, tile_m), :]                  # (TILE_M, D)  this tile's rows
    d_model = feats.shape[-1]
    dh = d_model // num_heads

    # ---------- graph branch: ((L + diag(selfLoop)) @ X) @ W1  (bias folded into bout) ----
    h = jnp.dot(L_ref[...], feats, preferred_element_type=jnp.float32)     # (TILE_M, D) f32
    h = h + diag_ref[...] * x.astype(jnp.float32)         # self-loop without an (N,N) add
    acc = jnp.dot(h.astype(compute_dtype), w1_ref[...],
                  preferred_element_type=jnp.float32)     # (TILE_M, OUT_PAD) f32
    acc = acc + bout_ref[...]                             # combined b1 + bo@W2 + b2 (f32)

    # ---------- attention branch (full self-attention, queries = this tile) --------------
    # packed in-proj [Wq*scale | Wk | Wv]: Q for this tile's rows, K/V (fused) for all rows.
    q = (jnp.dot(x, wqkv_ref[:, :d_model], preferred_element_type=jnp.float32)
         + bqkv_ref[:, :d_model])                         # (TILE_M, D) f32, pre-scaled
    kv = (jnp.dot(feats, wqkv_ref[:, d_model:], preferred_element_type=jnp.float32)
          + bqkv_ref[:, d_model:])                        # (N, 2D) f32
    q = q.astype(compute_dtype)
    k = kv[:, :d_model].astype(compute_dtype)
    v = kv[:, d_model:].astype(compute_dtype)

    # TODO(synk): for large N, tile the key/value axis with an online-softmax (flash-style)
    # accumulator so the (TILE_M, N) per-head score matrix never has to be materialized.
    for hd in range(num_heads):                           # static unroll; heads is tiny
        qs = q[:, hd * dh:(hd + 1) * dh]                  # (TILE_M, dh)
        ks = k[:, hd * dh:(hd + 1) * dh]                  # (N, dh)
        vs = v[:, hd * dh:(hd + 1) * dh]                  # (N, dh)
        # contract on the last dim of both operands -> no explicit ks.T materialization
        s = lax.dot_general(qs, ks, (((1,), (1,)), ((), ())),
                            preferred_element_type=jnp.float32)            # (TILE_M, N) f32
        s = s - jnp.max(s, axis=-1, keepdims=True)
        p = jnp.exp(s)
        p = p / jnp.sum(p, axis=-1, keepdims=True)
        o_h = jnp.dot(p.astype(compute_dtype), vs,
                      preferred_element_type=jnp.float32)                  # (TILE_M, dh)
        # out-proj + affine2 folded offline into W2' = Wo @ W2 (lane-padded); push each
        # head's output straight through its rows of W2' -> no concat of head outputs.
        acc = acc + jnp.dot(o_h.astype(compute_dtype),
                            w2_ref[hd * dh:(hd + 1) * dh, :],
                            preferred_element_type=jnp.float32)
    out_ref[...] = acc


# -------------------------------- wrapper -------------------------------------

def _pad_lanes(x, target):
    pad = target - x.shape[-1]
    return x if pad == 0 else jnp.pad(x, ((0, 0), (0, pad)))


def galayer_forward(params, user_feats, item_feats, laplacian, self_loop, *,
                    heads, compute_dtype=jnp.bfloat16, tile_m=128):
    features = jnp.concatenate([user_feats, item_feats], axis=0)          # (N, D)
    N, D = features.shape
    out_dim = params["w1"].shape[1]
    assert D % heads == 0, "input_dim must be divisible by heads"

    tile_m = min(tile_m, N)
    assert N % tile_m == 0, "num_users + num_items must be divisible by the row tile"
    out_pad = ((out_dim + 127) // 128) * 128                              # lane-dense output

    hi = lax.Precision.HIGHEST                                            # exact f32 folds
    scale = 1.0 / math.sqrt(D // heads)

    # ---- offline linear folds (would be done once at init in a real deployment) ----
    wqkv = jnp.concatenate([params["wq"] * scale, params["wk"], params["wv"]], axis=1)
    bqkv = jnp.concatenate([params["bq"] * scale, params["bk"], params["bv"]], axis=1)
    w2f = jnp.dot(params["wo"], params["w2"], precision=hi)               # Wo @ W2
    bout = params["b1"] + jnp.dot(params["bo"], params["w2"], precision=hi) + params["b2"]

    w1p = _pad_lanes(params["w1"], out_pad)
    w2p = _pad_lanes(w2f, out_pad)
    boutp = _pad_lanes(bout, out_pad).astype(jnp.float32)

    # self-loop is diagonal (identity in GACF): apply it analytically inside the kernel.
    diag = jnp.diagonal(self_loop).reshape(N, 1).astype(jnp.float32)

    # bf16 (or f32) operands at the wrapper boundary: halves HBM/VMEM traffic for L & weights.
    L_c = laplacian.astype(compute_dtype)
    feats_c = features.astype(compute_dtype)
    w1_c = w1p.astype(compute_dtype)
    wqkv_c = wqkv.astype(compute_dtype)
    w2_c = w2p.astype(compute_dtype)
    bqkv_f = bqkv.astype(jnp.float32)

    kernel = functools.partial(_galayer_fused_kernel, num_heads=heads,
                               tile_m=tile_m, compute_dtype=compute_dtype)

    out = pl.pallas_call(
        kernel,
        grid=(N // tile_m,),
        in_specs=[
            pl.BlockSpec((tile_m, N), lambda i: (i, 0)),       # L row tile
            pl.BlockSpec((N, D), lambda i: (0, 0)),            # full features (fetched once)
            pl.BlockSpec((tile_m, 1), lambda i: (i, 0)),       # self-loop diagonal tile
            pl.BlockSpec((D, out_pad), lambda i: (0, 0)),      # W1 (lane-padded)
            pl.BlockSpec((D, 3 * D), lambda i: (0, 0)),        # packed [Wq*s | Wk | Wv]
            pl.BlockSpec((1, 3 * D), lambda i: (0, 0)),        # packed qkv bias (f32)
            pl.BlockSpec((D, out_pad), lambda i: (0, 0)),      # W2' = Wo @ W2 (lane-padded)
            pl.BlockSpec((1, out_pad), lambda i: (0, 0)),      # combined output bias (f32)
        ],
        out_specs=pl.BlockSpec((tile_m, out_pad), lambda i: (i, 0)),
        out_shape=jax.ShapeDtypeStruct((N, out_pad), jnp.float32),
        compiler_params=pltpu.CompilerParams(
            dimension_semantics=("parallel",),                 # shards across v7x's 2 TCs
            vmem_limit_bytes=32 * 1024 * 1024,
        ),
    )(L_c, feats_c, diag, w1_c, wqkv_c, bqkv_f, w2_c, boutp)

    return out[:, :out_dim]


# --------------------------- params / reference -------------------------------

def _xavier_uniform(key, out_features, in_features):
    bound = math.sqrt(6.0 / (in_features + out_features))
    # torch Linear weight layout is (out, in); store the transpose (in, out) so the
    # kernel computes x @ W directly.
    w = jax.random.uniform(key, (out_features, in_features), jnp.float32, -bound, bound)
    return w.T


def init_params(key, input_dim, out_dim):
    ks = jax.random.split(key, 6)
    return {
        # affine1 / affine2 (xavier weight, zero bias — matches _init_weight_)
        "w1": _xavier_uniform(ks[0], out_dim, input_dim),
        "b1": jnp.zeros((1, out_dim), jnp.float32),
        "w2": _xavier_uniform(ks[1], out_dim, input_dim),
        "b2": jnp.zeros((1, out_dim), jnp.float32),
        # MultiheadAttention: in_proj (xavier, zero bias), out_proj (zero bias)
        "wq": _xavier_uniform(ks[2], input_dim, input_dim),
        "wk": _xavier_uniform(ks[3], input_dim, input_dim),
        "wv": _xavier_uniform(ks[4], input_dim, input_dim),
        "bq": jnp.zeros((1, input_dim), jnp.float32),
        "bk": jnp.zeros((1, input_dim), jnp.float32),
        "bv": jnp.zeros((1, input_dim), jnp.float32),
        "wo": _xavier_uniform(ks[5], input_dim, input_dim),
        "bo": jnp.zeros((1, input_dim), jnp.float32),
    }


def reference_forward(params, user_feats, item_feats, laplacian, self_loop, *, heads):
    feats = jnp.concatenate([user_feats, item_feats], axis=0)
    L1 = laplacian + self_loop
    f1 = (L1 @ feats) @ params["w1"] + params["b1"]

    x = feats
    N, D = x.shape
    dh = D // heads
    q = (x @ params["wq"] + params["bq"]).reshape(N, heads, dh)
    k = (x @ params["wk"] + params["bk"]).reshape(N, heads, dh)
    v = (x @ params["wv"] + params["bv"]).reshape(N, heads, dh)
    s = jnp.einsum("qhd,khd->hqk", q, k) / math.sqrt(dh)
    p = jax.nn.softmax(s, axis=-1)
    attn = jnp.einsum("hqk,khd->qhd", p, v).reshape(N, D)
    att_feat = attn @ params["wo"] + params["bo"]
    f2 = att_feat @ params["w2"] + params["b2"]
    return f1 + f2


# ----------------------------------- main --------------------------------------

if __name__ == "__main__":
    key = jax.random.PRNGKey(0)
    n_users, n_items = 128, 128            # N = 256 -> grid of 2 parallel row tiles of 128
    input_dim, out_dim, heads, dropout = 32, 32, 4, 0.1   # dropout unused (inference)
    N = n_users + n_items

    k_user, k_item, k_lap, k_par = jax.random.split(key, 4)
    user_feats = jax.random.normal(k_user, (n_users, input_dim), jnp.float32)
    item_feats = jax.random.normal(k_item, (n_items, input_dim), jnp.float32)
    # dense stand-in for the (sparse) normalized Laplacian; identity self-loop
    laplacian = jax.random.uniform(k_lap, (N, N), jnp.float32) / N
    self_loop = jnp.eye(N, dtype=jnp.float32)

    params = init_params(k_par, input_dim, out_dim)

    ref = reference_forward(params, user_feats, item_feats, laplacian, self_loop, heads=heads)

    # f32 path: must match the pure f32 reference tightly.
    out_f32 = galayer_forward(params, user_feats, item_feats, laplacian, self_loop,
                              heads=heads, compute_dtype=jnp.float32)
    out_f32 = jax.block_until_ready(out_f32)
    assert out_f32.shape == (N, out_dim)
    assert jnp.allclose(out_f32, ref, rtol=5e-4, atol=5e-4), "f32 kernel mismatch vs reference"

    # bf16 MXU path (native on v5e/v6e/v7x): compare against the reference evaluated on
    # bf16-rounded inputs/weights so only in-kernel operand casts differ (f32 accumulation).
    rt = lambda t: t.astype(jnp.bfloat16).astype(jnp.float32)
    params_rt = {name: rt(val) for name, val in params.items()}
    ref_bf16 = reference_forward(params_rt, rt(user_feats), rt(item_feats), rt(laplacian),
                                 self_loop, heads=heads)
    out_bf16 = galayer_forward(params, user_feats, item_feats, laplacian, self_loop,
                               heads=heads, compute_dtype=jnp.bfloat16)
    out_bf16 = jax.block_until_ready(out_bf16)
    assert jnp.allclose(out_bf16, ref_bf16, rtol=5e-2, atol=5e-2), \
        "bf16 kernel mismatch vs bf16-rounded reference"

    print("KERNEL_OK")
</pallas_src>

<mosaic_0001>
module attributes {stable_mosaic.version = 11 : i64} {
  func.func @_galayer_fused_kernel(%arg0: i32, %arg1: memref<128x256xf32, #tpu.memory_space<vmem>>, %arg2: memref<256x32xf32, #tpu.memory_space<vmem>>, %arg3: memref<128x1xf32, #tpu.memory_space<vmem>>, %arg4: memref<32x128xf32, #tpu.memory_space<vmem>>, %arg5: memref<32x96xf32, #tpu.memory_space<vmem>>, %arg6: memref<1x96xf32, #tpu.memory_space<vmem>>, %arg7: memref<32x128xf32, #tpu.memory_space<vmem>>, %arg8: memref<1x128xf32, #tpu.memory_space<vmem>>, %arg9: memref<128x128xf32, #tpu.memory_space<vmem>>) attributes {dimension_semantics = [#tpu.dimension_semantics<parallel>], iteration_bounds = array<i64: 2>, scalar_prefetch = 0 : i64, scratch_operands = 0 : i64, tpu.core_type = #tpu.core_type<tc>, window_params = [{transform_indices = @transform_0, window_bounds = array<i64: 128, 256>}, {pipeline_mode = #tpu.pipeline_mode<synchronous>, transform_indices = @transform_1, window_bounds = array<i64: 256, 32>}, {transform_indices = @transform_2, window_bounds = array<i64: 128, 1>}, {pipeline_mode = #tpu.pipeline_mode<synchronous>, transform_indices = @transform_3, window_bounds = array<i64: 32, 128>}, {pipeline_mode = #tpu.pipeline_mode<synchronous>, transform_indices = @transform_4, window_bounds = array<i64: 32, 96>}, {pipeline_mode = #tpu.pipeline_mode<synchronous>, transform_indices = @transform_5, window_bounds = array<i64: 1, 96>}, {pipeline_mode = #tpu.pipeline_mode<synchronous>, transform_indices = @transform_6, window_bounds = array<i64: 32, 128>}, {pipeline_mode = #tpu.pipeline_mode<synchronous>, transform_indices = @transform_7, window_bounds = array<i64: 1, 128>}, {transform_indices = @transform_8, window_bounds = array<i64: 128, 128>}]} {
    %c128_i32 = arith.constant 128 : i32
    %0 = arith.muli %arg0, %c128_i32 : i32
    %1 = tpu.assume_multiple %0, 128 : i32
    %c0 = arith.constant 0 : index
    %c0_0 = arith.constant 0 : index
    %2 = vector.load %arg2[%c0, %c0_0] : memref<256x32xf32, #tpu.memory_space<vmem>>, vector<256x32xf32>
    %3 = arith.index_cast %1 : i32 to index
    %c0_1 = arith.constant 0 : index
    %4 = vector.load %arg2[%3, %c0_1] : memref<256x32xf32, #tpu.memory_space<vmem>>, vector<128x32xf32>
    %c0_2 = arith.constant 0 : index
    %c0_3 = arith.constant 0 : index
    %5 = vector.load %arg1[%c0_2, %c0_3] : memref<128x256xf32, #tpu.memory_space<vmem>>, vector<128x256xf32>
    %cst = arith.constant dense<0.000000e+00> : vector<128x32xf32>
    %6 = tpu.matmul %5, %2, %cst {dimension_numbers = #tpu.dot_dimension_numbers<[1], [0], [0], [1], [0, 0, 1, 1], [], []>} : vector<128x256xf32>, vector<256x32xf32>, vector<128x32xf32> -> vector<128x32xf32>
    %c0_4 = arith.constant 0 : index
    %c0_5 = arith.constant 0 : index
    %7 = vector.load %arg3[%c0_4, %c0_5] : memref<128x1xf32, #tpu.memory_space<vmem>>, vector<128x1xf32>
    %8 = vector.broadcast %7 : vector<128x1xf32> to vector<128x32xf32>
    %9 = arith.mulf %8, %4 : vector<128x32xf32>
    %10 = arith.addf %6, %9 : vector<128x32xf32>
    %c0_6 = arith.constant 0 : index
    %c0_7 = arith.constant 0 : index
    %11 = vector.load %arg4[%c0_6, %c0_7] : memref<32x128xf32, #tpu.memory_space<vmem>>, vector<32x128xf32>
    %cst_8 = arith.constant dense<0.000000e+00> : vector<128x128xf32>
    %12 = tpu.matmul %10, %11, %cst_8 {dimension_numbers = #tpu.dot_dimension_numbers<[1], [0], [0], [1], [0, 0, 1, 1], [], []>} : vector<128x32xf32>, vector<32x128xf32>, vector<128x128xf32> -> vector<128x128xf32>
    %c0_9 = arith.constant 0 : index
    %c0_10 = arith.constant 0 : index
    %13 = vector.load %arg8[%c0_9, %c0_10] : memref<1x128xf32, #tpu.memory_space<vmem>>, vector<1x128xf32>
    %14 = vector.broadcast %13 : vector<1x128xf32> to vector<128x128xf32>
    %15 = arith.addf %12, %14 : vector<128x128xf32>
    %c0_11 = arith.constant 0 : index
    %c0_12 = arith.constant 0 : index
    %16 = vector.load %arg5[%c0_11, %c0_12] : memref<32x96xf32, #tpu.memory_space<vmem>>, vector<32x32xf32>
    %cst_13 = arith.constant dense<0.000000e+00> : vector<128x32xf32>
    %17 = tpu.matmul %4, %16, %cst_13 {dimension_numbers = #tpu.dot_dimension_numbers<[1], [0], [0], [1], [0, 0, 1, 1], [], []>} : vector<128x32xf32>, vector<32x32xf32>, vector<128x32xf32> -> vector<128x32xf32>
    %c0_14 = arith.constant 0 : index
    %c0_15 = arith.constant 0 : index
    %18 = vector.load %arg6[%c0_14, %c0_15] : memref<1x96xf32, #tpu.memory_space<vmem>>, vector<1x32xf32>
    %19 = vector.broadcast %18 : vector<1x32xf32> to vector<128x32xf32>
    %20 = arith.addf %17, %19 : vector<128x32xf32>
    %c0_16 = arith.constant 0 : index
    %c32 = arith.constant 32 : index
    %21 = vector.load %arg5[%c0_16, %c32] : memref<32x96xf32, #tpu.memory_space<vmem>>, vector<32x64xf32>
    %cst_17 = arith.constant dense<0.000000e+00> : vector<256x64xf32>
    %22 = tpu.matmul %2, %21, %cst_17 {dimension_numbers = #tpu.dot_dimension_numbers<[1], [0], [0], [1], [0, 0, 1, 1], [], []>} : vector<256x32xf32>, vector<32x64xf32>, vector<256x64xf32> -> vector<256x64xf32>
    %c0_18 = arith.constant 0 : index
    %c32_19 = arith.constant 32 : index
    %23 = vector.load %arg6[%c0_18, %c32_19] : memref<1x96xf32, #tpu.memory_space<vmem>>, vector<1x64xf32>
    %24 = vector.broadcast %23 : vector<1x64xf32> to vector<256x64xf32>
    %25 = arith.addf %22, %24 : vector<256x64xf32>
    %26 = vector.extract_strided_slice %25 {offsets = [0, 0], sizes = [256, 32], strides = [1, 1]} : vector<256x64xf32> to vector<256x32xf32>
    %27 = vector.extract_strided_slice %25 {offsets = [0, 32], sizes = [256, 32], strides = [1, 1]} : vector<256x64xf32> to vector<256x32xf32>
    %28 = vector.extract_strided_slice %20 {offsets = [0, 0], sizes = [128, 8], strides = [1, 1]} : vector<128x32xf32> to vector<128x8xf32>
    %29 = vector.extract_strided_slice %26 {offsets = [0, 0], sizes = [256, 8], strides = [1, 1]} : vector<256x32xf32> to vector<256x8xf32>
    %30 = vector.extract_strided_slice %27 {offsets = [0, 0], sizes = [256, 8], strides = [1, 1]} : vector<256x32xf32> to vector<256x8xf32>
    %cst_20 = arith.constant dense<0.000000e+00> : vector<128x256xf32>
    %31 = tpu.matmul %28, %29, %cst_20 {dimension_numbers = #tpu.dot_dimension_numbers<[1], [1], [0], [0], [0, 0, 1, 0], [], []>} : vector<128x8xf32>, vector<256x8xf32>, vector<128x256xf32> -> vector<128x256xf32>
    %cst_21 = arith.constant dense<0xFF800000> : vector<128xf32>
    %32 = vector.multi_reduction <maximumf>, %31, %cst_21 [1] : vector<128x256xf32> to vector<128xf32>
    %33 = vector.shape_cast %32 : vector<128xf32> to vector<128x1xf32>
    %34 = vector.broadcast %33 : vector<128x1xf32> to vector<128x256xf32>
    %35 = arith.subf %31, %34 : vector<128x256xf32>
    %36 = math.exp %35 : vector<128x256xf32>
    %cst_22 = arith.constant dense<0.000000e+00> : vector<128xf32>
    %37 = vector.multi_reduction <add>, %36, %cst_22 [1] : vector<128x256xf32> to vector<128xf32>
    %38 = vector.shape_cast %37 : vector<128xf32> to vector<128x1xf32>
    %39 = vector.broadcast %38 : vector<128x1xf32> to vector<128x256xf32>
    %40 = arith.divf %36, %39 : vector<128x256xf32>
    %cst_23 = arith.constant dense<0.000000e+00> : vector<128x8xf32>
    %41 = tpu.matmul %40, %30, %cst_23 {dimension_numbers = #tpu.dot_dimension_numbers<[1], [0], [0], [1], [0, 0, 1, 1], [], []>} : vector<128x256xf32>, vector<256x8xf32>, vector<128x8xf32> -> vector<128x8xf32>
    %c0_24 = arith.constant 0 : index
    %c0_25 = arith.constant 0 : index
    %42 = vector.load %arg7[%c0_24, %c0_25] : memref<32x128xf32, #tpu.memory_space<vmem>>, vector<8x128xf32>
    %cst_26 = arith.constant dense<0.000000e+00> : vector<128x128xf32>
    %43 = tpu.matmul %41, %42, %cst_26 {dimension_numbers = #tpu.dot_dimension_numbers<[1], [0], [0], [1], [0, 0, 1, 1], [], []>} : vector<128x8xf32>, vector<8x128xf32>, vector<128x128xf32> -> vector<128x128xf32>
    %44 = arith.addf %15, %43 : vector<128x128xf32>
    %45 = vector.extract_strided_slice %20 {offsets = [0, 8], sizes = [128, 8], strides = [1, 1]} : vector<128x32xf32> to vector<128x8xf32>
    %46 = vector.extract_strided_slice %26 {offsets = [0, 8], sizes = [256, 8], strides = [1, 1]} : vector<256x32xf32> to vector<256x8xf32>
    %47 = vector.extract_strided_slice %27 {offsets = [0, 8], sizes = [256, 8], strides = [1, 1]} : vector<256x32xf32> to vector<256x8xf32>
    %cst_27 = arith.constant dense<0.000000e+00> : vector<128x256xf32>
    %48 = tpu.matmul %45, %46, %cst_27 {dimension_numbers = #tpu.dot_dimension_numbers<[1], [1], [0], [0], [0, 0, 1, 0], [], []>} : vector<128x8xf32>, vector<256x8xf32>, vector<128x256xf32> -> vector<128x256xf32>
    %cst_28 = arith.constant dense<0xFF800000> : vector<128xf32>
    %49 = vector.multi_reduction <maximumf>, %48, %cst_28 [1] : vector<128x256xf32> to vector<128xf32>
    %50 = vector.shape_cast %49 : vector<128xf32> to vector<128x1xf32>
    %51 = vector.broadcast %50 : vector<128x1xf32> to vector<128x256xf32>
    %52 = arith.subf %48, %51 : vector<128x256xf32>
    %53 = math.exp %52 : vector<128x256xf32>
    %cst_29 = arith.constant dense<0.000000e+00> : vector<128xf32>
    %54 = vector.multi_reduction <add>, %53, %cst_29 [1] : vector<128x256xf32> to vector<128xf32>
    %55 = vector.shape_cast %54 : vector<128xf32> to vector<128x1xf32>
    %56 = vector.broadcast %55 : vector<128x1xf32> to vector<128x256xf32>
    %57 = arith.divf %53, %56 : vector<128x256xf32>
    %cst_30 = arith.constant dense<0.000000e+00> : vector<128x8xf32>
    %58 = tpu.matmul %57, %47, %cst_30 {dimension_numbers = #tpu.dot_dimension_numbers<[1], [0], [0], [1], [0, 0, 1, 1], [], []>} : vector<128x256xf32>, vector<256x8xf32>, vector<128x8xf32> -> vector<128x8xf32>
    %c8 = arith.constant 8 : index
    %c0_31 = arith.constant 0 : index
    %59 = vector.load %arg7[%c8, %c0_31] : memref<32x128xf32, #tpu.memory_space<vmem>>, vector<8x128xf32>
    %cst_32 = arith.constant dense<0.000000e+00> : vector<128x128xf32>
    %60 = tpu.matmul %58, %59, %cst_32 {dimension_numbers = #tpu.dot_dimension_numbers<[1], [0], [0], [1], [0, 0, 1, 1], [], []>} : vector<128x8xf32>, vector<8x128xf32>, vector<128x128xf32> -> vector<128x128xf32>
    %61 = arith.addf %44, %60 : vector<128x128xf32>
    %62 = vector.extract_strided_slice %20 {offsets = [0, 16], sizes = [128, 8], strides = [1, 1]} : vector<128x32xf32> to vector<128x8xf32>
    %63 = vector.extract_strided_slice %26 {offsets = [0, 16], sizes = [256, 8], strides = [1, 1]} : vector<256x32xf32> to vector<256x8xf32>
    %64 = vector.extract_strided_slice %27 {offsets = [0, 16], sizes = [256, 8], strides = [1, 1]} : vector<256x32xf32> to vector<256x8xf32>
    %cst_33 = arith.constant dense<0.000000e+00> : vector<128x256xf32>
    %65 = tpu.matmul %62, %63, %cst_33 {dimension_numbers = #tpu.dot_dimension_numbers<[1], [1], [0], [0], [0, 0, 1, 0], [], []>} : vector<128x8xf32>, vector<256x8xf32>, vector<128x256xf32> -> vector<128x256xf32>
    %cst_34 = arith.constant dense<0xFF800000> : vector<128xf32>
    %66 = vector.multi_reduction <maximumf>, %65, %cst_34 [1] : vector<128x256xf32> to vector<128xf32>
    %67 = vector.shape_cast %66 : vector<128xf32> to vector<128x1xf32>
    %68 = vector.broadcast %67 : vector<128x1xf32> to vector<128x256xf32>
    %69 = arith.subf %65, %68 : vector<128x256xf32>
    %70 = math.exp %69 : vector<128x256xf32>
    %cst_35 = arith.constant dense<0.000000e+00> : vector<128xf32>
    %71 = vector.multi_reduction <add>, %70, %cst_35 [1] : vector<128x256xf32> to vector<128xf32>
    %72 = vector.shape_cast %71 : vector<128xf32> to vector<128x1xf32>
    %73 = vector.broadcast %72 : vector<128x1xf32> to vector<128x256xf32>
    %74 = arith.divf %70, %73 : vector<128x256xf32>
    %cst_36 = arith.constant dense<0.000000e+00> : vector<128x8xf32>
    %75 = tpu.matmul %74, %64, %cst_36 {dimension_numbers = #tpu.dot_dimension_numbers<[1], [0], [0], [1], [0, 0, 1, 1], [], []>} : vector<128x256xf32>, vector<256x8xf32>, vector<128x8xf32> -> vector<128x8xf32>
    %c16 = arith.constant 16 : index
    %c0_37 = arith.constant 0 : index
    %76 = vector.load %arg7[%c16, %c0_37] : memref<32x128xf32, #tpu.memory_space<vmem>>, vector<8x128xf32>
    %cst_38 = arith.constant dense<0.000000e+00> : vector<128x128xf32>
    %77 = tpu.matmul %75, %76, %cst_38 {dimension_numbers = #tpu.dot_dimension_numbers<[1], [0], [0], [1], [0, 0, 1, 1], [], []>} : vector<128x8xf32>, vector<8x128xf32>, vector<128x128xf32> -> vector<128x128xf32>
    %78 = arith.addf %61, %77 : vector<128x128xf32>
    %79 = vector.extract_strided_slice %20 {offsets = [0, 24], sizes = [128, 8], strides = [1, 1]} : vector<128x32xf32> to vector<128x8xf32>
    %80 = vector.extract_strided_slice %26 {offsets = [0, 24], sizes = [256, 8], strides = [1, 1]} : vector<256x32xf32> to vector<256x8xf32>
    %81 = vector.extract_strided_slice %27 {offsets = [0, 24], sizes = [256, 8], strides = [1, 1]} : vector<256x32xf32> to vector<256x8xf32>
    %cst_39 = arith.constant dense<0.000000e+00> : vector<128x256xf32>
    %82 = tpu.matmul %79, %80, %cst_39 {dimension_numbers = #tpu.dot_dimension_numbers<[1], [1], [0], [0], [0, 0, 1, 0], [], []>} : vector<128x8xf32>, vector<256x8xf32>, vector<128x256xf32> -> vector<128x256xf32>
    %cst_40 = arith.constant dense<0xFF800000> : vector<128xf32>
    %83 = vector.multi_reduction <maximumf>, %82, %cst_40 [1] : vector<128x256xf32> to vector<128xf32>
    %84 = vector.shape_cast %83 : vector<128xf32> to vector<128x1xf32>
    %85 = vector.broadcast %84 : vector<128x1xf32> to vector<128x256xf32>
    %86 = arith.subf %82, %85 : vector<128x256xf32>
    %87 = math.exp %86 : vector<128x256xf32>
    %cst_41 = arith.constant dense<0.000000e+00> : vector<128xf32>
    %88 = vector.multi_reduction <add>, %87, %cst_41 [1] : vector<128x256xf32> to vector<128xf32>
    %89 = vector.shape_cast %88 : vector<128xf32> to vector<128x1xf32>
    %90 = vector.broadcast %89 : vector<128x1xf32> to vector<128x256xf32>
    %91 = arith.divf %87, %90 : vector<128x256xf32>
    %cst_42 = arith.constant dense<0.000000e+00> : vector<128x8xf32>
    %92 = tpu.matmul %91, %81, %cst_42 {dimension_numbers = #tpu.dot_dimension_numbers<[1], [0], [0], [1], [0, 0, 1, 1], [], []>} : vector<128x256xf32>, vector<256x8xf32>, vector<128x8xf32> -> vector<128x8xf32>
    %c24 = arith.constant 24 : index
    %c0_43 = arith.constant 0 : index
    %93 = vector.load %arg7[%c24, %c0_43] : memref<32x128xf32, #tpu.memory_space<vmem>>, vector<8x128xf32>
    %cst_44 = arith.constant dense<0.000000e+00> : vector<128x128xf32>
    %94 = tpu.matmul %92, %93, %cst_44 {dimension_numbers = #tpu.dot_dimension_numbers<[1], [0], [0], [1], [0, 0, 1, 1], [], []>} : vector<128x8xf32>, vector<8x128xf32>, vector<128x128xf32> -> vector<128x128xf32>
    %95 = arith.addf %78, %94 : vector<128x128xf32>
    %c0_45 = arith.constant 0 : index
    %c0_46 = arith.constant 0 : index
    %96 = vector.load %arg9[%c0_45, %c0_46] : memref<128x128xf32, #tpu.memory_space<vmem>>, vector<128x128xf32>
    tpu.vector_store %arg9[%c0_45, %c0_46], %95 {strides = array<i32>} : memref<128x128xf32, #tpu.memory_space<vmem>>, vector<128x128xf32>,
    return
  }
  func.func @transform_0(%arg0: i32) -> (i32, i32) {
    %c0_i32 = arith.constant 0 : i32
    %c0_i32_0 = arith.constant 0 : i32
    return %arg0, %c0_i32 : i32, i32
  }
  func.func @transform_1(%arg0: i32) -> (i32, i32) {
    %c0_i32 = arith.constant 0 : i32
    %c0_i32_0 = arith.constant 0 : i32
    %c0_i32_1 = arith.constant 0 : i32
    return %c0_i32, %c0_i32_0 : i32, i32
  }
  func.func @transform_2(%arg0: i32) -> (i32, i32) {
    %c0_i32 = arith.constant 0 : i32
    %c0_i32_0 = arith.constant 0 : i32
    return %arg0, %c0_i32 : i32, i32
  }
  func.func @transform_3(%arg0: i32) -> (i32, i32) {
    %c0_i32 = arith.constant 0 : i32
    %c0_i32_0 = arith.constant 0 : i32
    %c0_i32_1 = arith.constant 0 : i32
    return %c0_i32, %c0_i32_0 : i32, i32
  }
  func.func @transform_4(%arg0: i32) -> (i32, i32) {
    %c0_i32 = arith.constant 0 : i32
    %c0_i32_0 = arith.constant 0 : i32
    %c0_i32_1 = arith.constant 0 : i32
    return %c0_i32, %c0_i32_0 : i32, i32
  }
  func.func @transform_5(%arg0: i32) -> (i32, i32) {
    %c0_i32 = arith.constant 0 : i32
    %c0_i32_0 = arith.constant 0 : i32
    %c0_i32_1 = arith.constant 0 : i32
    return %c0_i32, %c0_i32_0 : i32, i32
  }
  func.func @transform_6(%arg0: i32) -> (i32, i32) {
    %c0_i32 = arith.constant 0 : i32
    %c0_i32_0 = arith.constant 0 : i32
    %c0_i32_1 = arith.constant 0 : i32
    return %c0_i32, %c0_i32_0 : i32, i32
  }
  func.func @transform_7(%arg0: i32) -> (i32, i32) {
    %c0_i32 = arith.constant 0 : i32
    %c0_i32_0 = arith.constant 0 : i32
    %c0_i32_1 = arith.constant 0 : i32
    return %c0_i32, %c0_i32_0 : i32, i32
  }
  func.func @transform_8(%arg0: i32) -> (i32, i32) {
    %c0_i32 = arith.constant 0 : i32
    %c0_i32_0 = arith.constant 0 : i32
    return %arg0, %c0_i32 : i32, i32
  }
}

</mosaic_0001>

<bundles_post_ra>
// kernel: tpu_custom_call.1
= control target key start
LH: loop header
LB: loop body
LE: loop exit
PB: predicated region body
PF: predicated region fallthrough
CT: control target
= control target key end

     0   :  { %13 = vsyncpa [#allocation3], 0  ;;  %s11875_s0 = inlined_call_operand.vmem [shape: f32[256,256], index: 0, kind: input, shape index: {}]   ;;  %s11876_s1 = inlined_call_operand.vmem [shape: f32[256,32], index: 1, kind: input, shape index: {}]   ;;  %s11877_s2 = inlined_call_operand.vmem [shape: f32[256,1], index: 2, kind: input, shape index: {}]   ;;  %s11878_s3 = inlined_call_operand.vmem [shape: f32[32,128], index: 3, kind: input, shape index: {}]   ;;  %s11879_s4 = inlined_call_operand.vmem [shape: f32[32,96], index: 4, kind: input, shape index: {}]   ;;  %s11880_s5 = inlined_call_operand.vmem [shape: f32[1,96], index: 5, kind: input, shape index: {}]   ;;  %s11881_s6 = inlined_call_operand.hbm [shape: f32[32,128], index: 6, kind: input, shape index: {}]   ;;  %s11882_s7 = inlined_call_operand.vmem [shape: f32[1,128], index: 7, kind: input, shape index: {}]   ;;  %s11883_s8 = inlined_call_operand.hbm [shape: f32[256,128], index: 8, kind: output, shape index: {}]  }
   0x1   :  { %14 = vsyncpa [#allocation4], 0 }
   0x2   :  { %16 = vsyncpa [#allocation4 + $0x1], 0  ;;  %s8693_s27 = smov 0   ;;  %s8695_s28 = smov 0  }
   0x3   :  { %s8697_s29 = smov 0   ;;  %s8699_s30 = smov 0  }
   0x4 LB: > { %s8714_s9 = sadd.s32 4294967295, %s8632_s30   ;;  %s5682_s10 = sadd.s32 4294967294, %s8632_s30   ;;  %s8632_s30 = sphi %s8699_s30, %s12357_s30   ;;  %s8628_s29 = sphi %s8697_s29, %s12356_s29   ;;  %s8624_s28 = sphi %s8695_s28, %s12355_s28   ;;  %s8620_s27 = sphi %s8693_s27, %s12354_s27  }
   0x5   : > { %s8718_s11 = sadd.s32 1, %s8632_s30   ;;  %s207_s12 = sadd.s32 1, %s8628_s29 }
   0x6   : > { %s204_s13 = ssub.s32 %s8632_s30, %s8718_s11  ;;  %p217_p0 = scmp.ne.s32.totalorder %s8628_s29, %s8624_s28 }
   0x7   : > { %p205_p1 = scmp.eq.s32.totalorder %s204_s13, 0  ;;  %p218_p2 = scmp.eq.s32.totalorder %s8714_s9, 1 }
   0x8   : > { %p223_p3 = scmp.ne.s32.totalorder %s8624_s28, %s8620_s27  ;;  %p224_p4 = scmp.eq.s32.totalorder %s5682_s10, 1 }
   0x9   : > { %s8729_s14 = scalar_select %p205_p1, %s8628_s29, %s207_s12  }
   0xa   : > { %p8731_p5 = por %p218_p2, %p217_p0  ;;  %p8735_p6 = por %p224_p4, %p223_p3 }
   0xb   : > { %p5683_p7 = scmp.ge.s32.totalorder %s8632_s30, 1  ;;  %p231_p8 = scmp.lt.s32.totalorder %s8632_s30, 3 }
   0xc   : > { %s12049_s15 = scalar_select %p8731_p5, 1, 0 }
   0xd   : > { %s12050_s16 = scalar_select %p8735_p6, 1, 0 }
   0xe   : > { %p11884_p9 = scmp.eq.s32.totalorder %s8714_s9, 0  ;;  %p8742_p10 = pnand %p5683_p7, %p231_p8 }
   0xf   : > { %s8634_s18 = smov [#allocation2]   ;;  %s8538_s23 = scalar_lea.hbm %s11881_s6, 512 }
  0x10   : > { %s12051_s17 = scalar_select %p8742_p10, 1, 0 }
  0x11   : > { %s255_s19 = sshll.u32 %s8634_s18, 4  ;;  %p7526_p11 = pneg %p8742_p10  ;;  %s256_s19 = int_to_ptr.vmem [resolvable:$true] %s255_s19 }
  0x12   : > { %p8539_p13 = scmp.ne.s32.totalorder %s11881_s6, %s8538_s23  ;;  %p8545_p3 = scmp.lt.u32.totalorder %s8538_s23, %s11881_s6 }
  0x13   : > { %p8750_p12 = pnand %p11884_p9, %p7526_p11 }
  0x15   : > { %p8540_p0 = pneg %p8750_p12 }
  0x17   : > { %p8541_p1 = pnand %p8540_p0, %p8539_p13 }
  0x19   : > { %p8542_p2 = pneg %p8541_p1 }
  0x1b   : > { %p8547_p4 = pnand %p8545_p3, %p8542_p2 }
  0x1d   : > { %8550 = shalt.err (!%p8547_p4)
}
  0x1e   : > { %s8551_s12 = scalar_lea.vmem %s256_s19, 512  ;;  %p8559_p9 = scmp.lt.s32.totalorder %s256_s19, %s256_s19 }
  0x1f   : > { %p8552_p7 = scmp.ne.s32.totalorder %s256_s19, %s8551_s12  ;;  %p8560_p6 = scmp.lt.s32.totalorder %s8551_s12, %s8551_s12 }
  0x21   : > { %p8554_p8 = pnand %p8552_p7, %p8540_p0  ;;  %p8561_p5 = por %p8560_p6, %p8559_p9 }
  0x23   : > { %p8555_p11 = pneg %p8554_p8 }
  0x25   : > { %p8562_p10 = pnand %p8561_p5, %p8555_p11 }
  0x27   : > { %8565 = shalt.err (!%p8562_p10)
}
  0x28   : > { %s8635_s13 = smov 128   ;;  %s8636_s18 = smov 8  }
  0x29   : > { %7529 = dma.hbm_to_vmem [thread:$0]  (!%p8750_p12), %s11881_s6, 512, %s256_s19, [#allocation3], %s8635_s13, %s8635_s13, %s8636_s18  }
  0x2a   : > { %p12053_p13 = scmp.ne.s32.totalorder %s12051_s17, 0 }
  0x2c   : > { %293 = sbr.rel (%p12053_p13) target bundleno = 2876 (0xb3c), region = 52 }
  0x33   : > { %p12054_p1 = scmp.eq.s32.totalorder %s8714_s9, 0 }
  0x35   : > { %8611 = dma.done.wait (%p12054_p1), [#allocation3], 512   ;;  %p12055_p0 = pmov %p12054_p1 }
  0x36   : > { %s5689_s23 = sshll.u32 %s8714_s9, 4  ;;  %v8637_v0 = vmov 0   ;;  %v8780_v1 = vld [vmem:[%s11876_s1 + $0x80] sm:$0xff]  ;;  %v8785_v2 = vld [vmem:[%s11876_s1 + $0x88] sm:$0xff]  ;;  %v8804_v6 = vld [vmem:[%s11876_s1 + $0x90] sm:$0xff]  ;;  %vm697_vm0 = vcmask 261120  }
  0x37   : > { %8613 = vsyncadd (%p12055_p0), [#allocation3], 4294966784  ;;  %7582 = vset.pattern.permute.xlu0 %v8637_v0  ;;  %7583 = vset.pattern.permute.xlu1 %v8637_v0  ;;  %p334_p5 = scmp.lt.s32.totalorder %s5689_s23, 31  ;;  %v8790_v3 = vld [vmem:[%s11876_s1] sm:$0xff]  ;;  %v7048_v4 = vpack.c.bf16 %v8785_v2, %v8780_v1  ;;  %v8799_v5 = vld [vmem:[%s11876_s1 + $0x8] sm:$0xff]  ;;  %vm1435_vm1 = vcmask 64512  }
  0x38   : > { %v8809_v7 = vld [vmem:[%s11876_s1 + $0x98] sm:$0xff]  ;;  %v7050_v8 = vpack.c.bf16 %v8799_v5, %v8790_v3  ;;  %v8818_v10 = vld [vmem:[%s11876_s1 + $0x10] sm:$0xff]  ;;  %v8828_v12 = vld [vmem:[%s11876_s1 + $0xa0] sm:$0xff]  ;;  %s8639_s19 = smov 120   ;;  %s8640_s17 = smov 88  }
  0x39   : > { %s12359_s23 = smov (!%p334_p5, %s5689_s23), 31  ;;  %v7052_v9 = vpack.c.bf16 %v8809_v7, %v8804_v6  ;;  %v8823_v11 = vld [vmem:[%s11876_s1 + $0x18] sm:$0xff]  ;;  %7049 = vmatprep.subr.bf16.mxu0 %v7048_v4  ;;  %v8833_v13 = vld [vmem:[%s11876_s1 + $0xa8] sm:$0xff]  ;;  %v8843_v16 = vld [vmem:[%s11876_s1 + $0x20] sm:$0xff]  ;;  %s8641_s25 = smov 112  }
  0x3a   : > { %7051 = vmatpush3.bf16.msra.mxu0 %v7050_v8  ;;  %v7054_v14 = vpack.c.bf16 %v8823_v11, %v8818_v10  ;;  %s6022_s13 = sshll.u32 %s12359_s23, 4  ;;  %v7056_v15 = vpack.c.bf16 %v8833_v13, %v8828_v12  ;;  %v8848_v17 = vld [vmem:[%s11876_s1 + $0x28] sm:$0xff]  ;;  %v8853_v18 = vld [vmem:[%s11876_s1 + $0xb0] sm:$0xff]  ;;  %v8858_v19 = vld [vmem:[%s11876_s1 + $0xb8] sm:$0xff]  ;;  %s5693_s24 = sshll.u32 %s12359_s23, 3 }
  0x3b   : > { %7053 = vmatprep.subr.bf16.mxu0 %v7052_v9  ;;  %s8863_s12 = scalar_lea.vmem %s11875_s0, %s6022_s13  ;;  %v7058_v20 = vpack.c.bf16 %v8848_v17, %v8843_v16  ;;  %v7060_v21 = vpack.c.bf16 %v8858_v19, %v8853_v18  ;;  %v8872_v22 = vld [vmem:[%s11876_s1 + $0x30] sm:$0xff]  ;;  %v8877_v23 = vld [vmem:[%s11876_s1 + $0x38] sm:$0xff]  ;;  %v8882_v24 = vld [vmem:[%s11876_s1 + $0xc0] sm:$0xff]  ;;  %s8942_s13 = scalar_lea.vmem %s11877_s2, %s5693_s24 }
  0x3c   : > { %v8887_v25 = vld [vmem:[%s11876_s1 + $0xc8] sm:$0xff]  ;;  %v7062_v27 = vpack.c.bf16 %v8877_v23, %v8872_v22  ;;  %v8897_v29 = vld [vmem:[%s11876_s1 + $0x40] sm:$0xff]  ;;  %v8907_v31 = vld [vmem:[%s11876_s1 + $0xd0] sm:$0xff]  ;;  %s8643_s24 = smov 80   ;;  %s8644_s26 = smov 72  }
  0x3d   : > { %v398_v26 = vld [vmem:[%s8863_s12 + $0x8] sm:$0xff]  ;;  %v7064_v28 = vpack.c.bf16 %v8887_v25, %v8882_v24  ;;  %v8912_v32 = vld [vmem:[%s11876_s1 + $0xd8] sm:$0xff]  ;;  %v8922_v35 = vld [vmem:[%s11876_s1 + $0x50] sm:$0xff]  ;;  %s330_s10 = sand.u32 1, %s8624_s28   ;;  %s6023_s22 = sshll.u32 %s8714_s9, 11 }
  0x3e   : > { %7055 = vmatpush3.bf16.msra.mxu0 %v7054_v14  ;;  %605 = vmatprep.mubr.f32.mxu0 %v398_v26  ;;  %v8902_v30 = vld [vmem:[%s11876_s1 + $0x48] sm:$0xff]  ;;  %v7068_v34 = vpack.c.bf16 %v8912_v32, %v8907_v31  ;;  %v8927_v36 = vld [vmem:[%s11876_s1 + $0x58] sm:$0xff]  ;;  %v8932_v37 = vld [vmem:[%s11876_s1 + $0xe0] sm:$0xff]  ;;  %p12352_p9 = scmp.ne.s32.totalorder %s12049_s15, 0 }
  0x3f   : > { %7057 = vmatprep.subr.bf16.mxu0 %v7056_v15  ;;  %v7066_v33 = vpack.c.bf16 %v8902_v30, %v8897_v29  ;;  %v8937_v38 = vld [vmem:[%s11876_s1 + $0xe8] sm:$0xff]  ;;  %v7070_v39 = vpack.c.bf16 %v8927_v36, %v8922_v35  ;;  %v8949_v40 = vld [vmem:[%s11876_s1 + $0x60] sm:$0xff]  ;;  %v431_v44 = vld [vmem:[%s8942_s13 + $0x10] sm:$0xff] }
  0x40   : > { %12056 = vst [vmem:[#allocation8_spill] sm:$0xff] %v8937_v38  ;;  %v7072_v41 = vpack.c.bf16 %v8937_v38, %v8932_v37  ;;  %v8956_v42 = vld [vmem:[%s11876_s1 + $0x68] sm:$0xff]  ;;  %v429_v43 = vld [vmem:[%s8942_s13] sm:$0xff]  ;;  %v8963_v45 = vld [vmem:[%s11876_s1 + $0xf0] sm:$0xff]  ;;  %457 = vperm.xlu1 %7583, %v431_v44  }
  0x41   : > { %12057 = vst [vmem:[#allocation9_spill] sm:$0xff] %v8963_v45  ;;  %v8968_v46 = vld [vmem:[%s11876_s1 + $0xf8] sm:$0xff]  ;;  %447 = vperm.xlu0 %7582, %v429_v43   ;;  %v430_v47 = vld [vmem:[%s8942_s13 + $0x8] sm:$0xff]  ;;  %v7074_v49 = vpack.c.bf16 %v8956_v42, %v8949_v40  ;;  %v8979_v51 = vld [vmem:[%s11876_s1 + $0x70] sm:$0xff] }
  0x42   : > { %7059 = vmatpush3.bf16.msra.mxu0 %v7058_v20  ;;  %12058 = vst [vmem:[#allocation10_spill] sm:$0xff] %v8968_v46  ;;  %v432_v48 = vld [vmem:[%s8942_s13 + $0x18] sm:$0xff]  ;;  %v7076_v50 = vpack.c.bf16 %v8968_v46, %v8963_v45  ;;  %v433_v53 = vld [vmem:[%s8942_s13 + $0x20] sm:$0xff]  ;;  %v434_v54 = vld [vmem:[%s8942_s13 + $0x28] sm:$0xff] }
  0x43   : > { %7061 = vmatprep.subr.bf16.mxu0 %v7060_v21  ;;  %v8984_v52 = vld [vmem:[%s11876_s1 + $0x78] sm:$0xff]  ;;  %v435_v56 = vld [vmem:[%s8942_s13 + $0x30] sm:$0xff]  ;;  %v397_v58 = vld [vmem:[%s8863_s12] sm:$0xff] }
  0x44   : > { %462 = vperm.xlu1 %7583, %v432_v48   ;;  %v7078_v55 = vpack.c.bf16 %v8984_v52, %v8979_v51  ;;  %v436_v57 = vld [vmem:[%s8942_s13 + $0x38] sm:$0xff]  ;;  %v437_v60 = vld [vmem:[%s8942_s13 + $0x40] sm:$0xff]  ;;  %v438_v61 = vld [vmem:[%s8942_s13 + $0x48] sm:$0xff] }
  0x45   : > { %452 = vperm.xlu0 %7582, %v430_v47   ;;  %v400_v59 = vld [vmem:[%s8863_s12 + $0x18] sm:$0xff]  ;;  %v399_v62 = vld [vmem:[%s8863_s12 + $0x10] sm:$0xff]  ;;  %v402_v63 = vld [vmem:[%s8863_s12 + $0x28] sm:$0xff] }
  0x46   : > { %7063 = vmatpush3.bf16.msra.mxu0 %v7062_v27  ;;  %v439_v0 = vld [vmem:[%s8942_s13 + $0x50] sm:$0xff]  ;;  %v440_v4 = vld [vmem:[%s8942_s13 + $0x58] sm:$0xff]  ;;  %v401_v8 = vld [vmem:[%s8863_s12 + $0x20] sm:$0xff] }
  0x47   : > { %7065 = vmatprep.subr.bf16.mxu0 %v7064_v28  ;;  %v404_v9 = vld [vmem:[%s8863_s12 + $0x38] sm:$0xff]  ;;  %v441_v14 = vld [vmem:[%s8942_s13 + $0x60] sm:$0xff]  ;;  %v442_v15 = vld [vmem:[%s8942_s13 + $0x68] sm:$0xff] }
  0x48   : > { %472 = vperm.xlu1 %7583, %v434_v54   ;;  %v403_v20 = vld [vmem:[%s8863_s12 + $0x30] sm:$0xff]  ;;  %v406_v21 = vld [vmem:[%s8863_s12 + $0x48] sm:$0xff]  ;;  %v444_v27 = vld [vmem:[%s8942_s13 + $0x78] sm:$0xff] }
  0x49   : > { %467 = vperm.xlu0 %7582, %v433_v53   ;;  %v443_v26 = vld [vmem:[%s8942_s13 + $0x70] sm:$0xff]  ;;  %v9011_v28 = vld [vmem:[%s11879_s4] sm:$0xff]  ;;  %v408_v43 = vld [vmem:[%s8863_s12 + $0x58] sm:$0xff]  ;;  %s8638_s13 = smov 96  }
  0x4a   : > { %7067 = vmatpush3.bf16.msra.mxu0 %v7066_v33  ;;  %v9016_v33 = vld [vmem:[%s11879_s4 + $0x8] sm:$0xff]  ;;  %v407_v48 = vld [vmem:[%s8863_s12 + $0x50] sm:$0xff]  ;;  %v412_v53 = vld [vmem:[%s8863_s12 + $0x78] sm:$0xff] }
  0x4b   : > { %7069 = vmatprep.subr.bf16.mxu0 %v7068_v34  ;;  %v9021_v34 = vld [vmem:[%s11879_s4 + $0x10] sm:$0xff]  ;;  %v7584_v44 = vpack.i.bf16 %v9016_v33, %v9011_v28  ;;  %vm9415_vm2 = vmpackc.low %vm1435_vm1, %vm1435_vm1 }
  0x4c   : > { %482 = vperm.xlu1 %7583, %v436_v57   ;;  %v411_v54 = vld [vmem:[%s8863_s12 + $0x70] sm:$0xff]  ;;  %v416_v57 = vld [vmem:[%s8863_s12 + $0x98] sm:$0xff] }
  0x4d   : > { %477 = vperm.xlu0 %7582, %v435_v56   ;;  %v413_v56 = vld [vmem:[%s8863_s12 + $0x80] sm:$0xff] }
  0x4e   : > { %7071 = vmatpush3.bf16.msra.mxu0 %v7070_v39  ;;  %v9026_v39 = vld [vmem:[%s11879_s4 + $0x18] sm:$0xff] }
  0x4f   : > { %7073 = vmatprep.subr.bf16.mxu0 %v7072_v41  ;;  %v405_v41 = vld [vmem:[%s8863_s12 + $0x40] sm:$0xff]  ;;  %v7589_v47 = vpack.i.bf16 %v9026_v39, %v9021_v34 }
  0x50   : > { %492 = vperm.xlu1 %7583, %v438_v61   ;;  %v420_v61 = vld [vmem:[%s8863_s12 + $0xb8] sm:$0xff] }
  0x51   : > { %487 = vperm.xlu0 %7582, %v437_v60   ;;  %v417_v60 = vld [vmem:[%s8863_s12 + $0xa0] sm:$0xff] }
  0x52   : > { %7075 = vmatpush3.bf16.msra.mxu0 %v7074_v49  ;;  %v410_v49 = vld [vmem:[%s8863_s12 + $0x68] sm:$0xff] }
  0x53   : > { %7077 = vmatprep.subr.bf16.mxu0 %v7076_v50  ;;  %v409_v50 = vld [vmem:[%s8863_s12 + $0x60] sm:$0xff] }
  0x54   : > { %502 = vperm.xlu1 %7583, %v440_v4   ;;  %v424_v4 = vld [vmem:[%s8863_s12 + $0xd8] sm:$0xff] }
  0x55   : > { %497 = vperm.xlu0 %7582, %v439_v0   ;;  %v421_v0 = vld [vmem:[%s8863_s12 + $0xc0] sm:$0xff] }
  0x56   : > { %7079 = vmatpush3.bf16.msra.mxu0 %v7078_v55  ;;  %v414_v55 = vld [vmem:[%s8863_s12 + $0x88] sm:$0xff] }
  0x58   : > { %512 = vperm.xlu1 %7583, %v442_v15   ;;  %v428_v15 = vld [vmem:[%s8863_s12 + $0xf8] sm:$0xff] }
  0x59   : > { %606 = vmatmul.mubr.f32.vlgmr.msra.gmra.mrb[0].mxu0 %v397_v58  ;;  %507 = vperm.xlu0 %7582, %v441_v14   ;;  %v415_v58 = vld [vmem:[%s8863_s12 + $0x90] sm:$0xff]  ;;  %v425_v14 = vld [vmem:[%s8863_s12 + $0xe0] sm:$0xff] }
  0x5a   : > { %610 = vmatprep.mubr.f32.mxu0 %v400_v59  ;;  %v418_v59 = vld [vmem:[%s8863_s12 + $0xa8] sm:$0xff] }
  0x5c   : > { %522 = vperm.xlu1 %7583, %v444_v27  }
  0x5d   : > { %611 = vmatmul.mubr.f32.gmra.mrb[2].mxu0 %v399_v62  ;;  %517 = vperm.xlu0 %7582, %v443_v26   ;;  %v419_v62 = vld [vmem:[%s8863_s12 + $0xb0] sm:$0xff]  ;;  %v687_v26 = vld [vmem:[%s11878_s3 + $0x8] sm:$0xff] }
  0x5e   : > { %615 = vmatprep.mubr.f32.mxu0 %v402_v63  ;;  %v422_v63 = vld [vmem:[%s8863_s12 + $0xc8] sm:$0xff] }
  0x60   : > { %7590 = vrot.lane.b32.xlu1 %v7589_v47, %s8638_s13  ;;  %v7088_v47 = vpack.c.bf16 %v9016_v33, %v9011_v28 }
  0x61   : > { %616 = vmatmul.mubr.f32.gmra.mrb[4].mxu0 %v401_v8  ;;  %7585 = vrot.lane.b32.xlu0 %v7584_v44, %s8638_s13  ;;  %v423_v8 = vld [vmem:[%s8863_s12 + $0xd0] sm:$0xff] }
  0x62   : > { %620 = vmatprep.mubr.f32.mxu0 %v404_v9  ;;  %v426_v9 = vld [vmem:[%s8863_s12 + $0xe8] sm:$0xff] }
  0x65   : > { %621 = vmatmul.mubr.f32.gmra.mrb[6].mxu0 %v403_v20  ;;  %v427_v20 = vld [vmem:[%s8863_s12 + $0xf0] sm:$0xff]  ;;  %s5694_s12 = sshll.u32 %s8714_s9, 7 }
  0x66   : > { %625 = vmatprep.mubr.f32.mxu0 %v406_v21  ;;  %v686_v21 = vld [vmem:[%s11878_s3] sm:$0xff]  ;;  %s9079_s21 = scalar_lea.vmem %s11876_s1, %s5694_s12  ;;  %s5688_s12 = sshll.u32 %s330_s10, 7 }
  0x67   : > { %v7080_v27 = vpack.c.bf16 %v687_v26, %v686_v21  ;;  %v9084_v28 = vld [vmem:[%s9079_s21] sm:$0xff] }
  0x69   : > { %626 = vmatmul.mubr.f32.gmra.mrb[8].mxu0 %v405_v41  ;;  %7081 = vmatprep.subr.bf16.mxu1 %v7080_v27  ;;  %v688_v41 = vld [vmem:[%s11878_s3 + $0x10] sm:$0xff] }
  0x6a   : > { %630 = vmatprep.mubr.f32.mxu0 %v408_v43  ;;  %7083 = vmatpush3.bf16.msra.mxu1 %v7080_v27  ;;  %v689_v43 = vld [vmem:[%s11878_s3 + $0x18] sm:$0xff]  ;;  %v7092_v27 = vpack.c.bf16 %v9026_v39, %v9021_v34 }
  0x6b   : > { %v7084_v44 = vpack.c.bf16 %v689_v43, %v688_v41 }
  0x6d   : > { %631 = vmatmul.mubr.f32.gmra.mrb[10].mxu0 %v407_v48  ;;  %7085 = vmatprep.subr.bf16.mxu1 %v7084_v44 }
  0x6e   : > { %635 = vmatprep.mubr.f32.mxu0 %v410_v49  ;;  %7087 = vmatpush3.bf16.msra.mxu1 %v7084_v44  ;;  %v9101_v44 = vld [vmem:[%s9079_s21 + $0x18] sm:$0xff] }
  0x6f   : > { %7089 = vmatprep.subr.bf16.mxu1 %v7088_v47 }
  0x71   : > { %636 = vmatmul.mubr.f32.gmra.mrb[12].mxu0 %v409_v50 }
  0x72   : > { %640 = vmatprep.mubr.f32.mxu0 %v412_v53 }
  0x75   : > { %641 = vmatmul.mubr.f32.gmra.mrb[14].mxu0 %v411_v54 }
  0x76   : > { %645 = vmatprep.mubr.f32.mxu0 %v414_v55 }
  0x79   : > { %646 = vmatmul.mubr.f32.gmra.mrb[16].mxu0 %v413_v56 }
  0x7a   : > { %650 = vmatprep.mubr.f32.mxu0 %v416_v57 }
  0x7d   : > { %651 = vmatmul.mubr.f32.gmra.mrb[18].mxu0 %v415_v58 }
  0x7e   : > { %655 = vmatprep.mubr.f32.mxu0 %v418_v59  ;;  %v9088_v59 = vld [vmem:[%s9079_s21 + $0x8] sm:$0xff] }
  0x81   : > { %656 = vmatmul.mubr.f32.gmra.mrb[20].mxu0 %v417_v60 }
  0x82   : > { %660 = vmatprep.mubr.f32.mxu0 %v420_v61 }
  0x85   : > { %661 = vmatmul.mubr.f32.gmra.mrb[22].mxu0 %v419_v62 }
  0x86   : > { %665 = vmatprep.mubr.f32.mxu0 %v422_v63 }
  0x89   : > { %666 = vmatmul.mubr.f32.gmra.mrb[24].mxu0 %v421_v0  ;;  %v9093_v0 = vld [vmem:[%s9079_s21 + $0x10] sm:$0xff] }
  0x8a   : > { %670 = vmatprep.mubr.f32.mxu0 %v424_v4 }
  0x8d   : > { %671 = vmatmul.mubr.f32.gmra.mrb[26].mxu0 %v423_v8 }
  0x8e   : > { %675 = vmatprep.mubr.f32.mxu0 %v426_v9 }
  0x91   : > { %676 = vmatmul.mubr.f32.gmra.mrb[28].mxu0 %v425_v14 }
  0x92   : > { %680 = vmatprep.mubr.f32.mxu0 %v428_v15 }
  0x95   : > { %681 = vmatmul.mubr.f32.gmra.mrb[30].mxu0 %v427_v20 }
  0xbf   : > { %v458_v63 = vpop.permute.xlu1 %457 }
  0xc0   : > { %v448_v48 = vpop.permute.xlu0 %447  ;;  %v527_v20 = vmul.f32 %v458_v63, %v9093_v0  ;;  %v9108_v63 = vld [vmem:[%s9079_s21 + $0x20] sm:$0xff] }
  0xc1   : > { %v525_v57 = vmul.f32 %v448_v48, %v9084_v28 }
  0xc4   : > { %v453_v49 = vpop.permute.xlu0 %452 }
  0xc5   : > { %v526_v4 = vmul.f32 %v453_v49, %v9088_v59 }
  0xc8   : > { %v468_v50 = vpop.permute.xlu0 %467 }
  0xcc   : > { %v478_v53 = vpop.permute.xlu0 %477 }
  0xd0   : > { %v9071_v54 = vpop.permute.xlu0 %487 }
  0xd4   : > { %v9073_v55 = vpop.permute.xlu0 %497 }
  0xd8   : > { %v9081_v56 = vpop.permute.xlu0 %507 }
  0xdc   : > { %v9090_v60 = vpop.permute.xlu0 %517 }
  0xe0   : > { %v7586_v14 = vpop.permute.xlu0 %7585 }
  0xe1   : > { %v7588_v41 = vunpack.i.h.bf16 %v7586_v14  ;;  %v7587_v43 = vunpack.i.l.bf16 %v7586_v14 }
 0x12c   : > { %v6056_v33 = vpop.f32.mrb[0].mxu0 }
 0x12d   : > { %v6057_v58 = vpop.f32.mrb[1].mxu0 }
 0x12e   : > { %v6058_v61 = vadd.f32 %v6057_v58, %v6056_v33  ;;  %v463_v33 = vpop.permute.xlu1 %462 }
 0x130   : > { %v6059_v62 = vpop.f32.mrb[2].mxu0  ;;  %v608_v8 = vadd.f32 %v6058_v61, %v525_v57  ;;  %v528_v57 = vmul.f32 %v463_v33, %v9101_v44 }
 0x131   : > { %v6060_v9 = vpop.f32.mrb[3].mxu0 }
 0x132   : > { %v6061_v15 = vadd.f32 %v6060_v9, %v6059_v62  ;;  %6832 = vmatprep.mubr.msk.f32.mxu1 %vm697_vm0, %v608_v8  ;;  %v9105_v62 = vpack.c.bf16 %v7588_v41, %v7587_v43  ;;  %v9119_v43 = vld [vmem:[%s9079_s21 + $0x30] sm:$0xff] }
 0x134   : > { %v613_v21 = vadd.f32 %v6061_v15, %v526_v4  ;;  %v6062_v26 = vpop.f32.mrb[4].mxu0  ;;  %v529_v4 = vmul.f32 %v468_v50, %v9108_v63 }
 0x135   : > { %v6063_v48 = vpop.f32.mrb[5].mxu0 }
 0x136   : > { %v6064_v49 = vadd.f32 %v6063_v48, %v6062_v26  ;;  %6833 = vmatmul.mubr.msk.f32.vlgmr.msra.gmra.mrb[0].mxu1 %vm697_vm0, %v613_v21  ;;  %v531_v48 = vmul.f32 %v478_v53, %v9119_v43 }
 0x137   : > { %7091 = vmatpush3.bf16.msra.mxu1 %v7088_v47  ;;  %v9114_v47 = vld [vmem:[%s9079_s21 + $0x28] sm:$0xff] }
 0x138   : > { %v618_v58 = vadd.f32 %v6064_v49, %v527_v20  ;;  %v6065_v61 = vpop.f32.mrb[6].mxu0  ;;  %7093 = vmatprep.subr.bf16.mxu1 %v7092_v27  ;;  %v473_v20 = vpop.permute.xlu1 %472 }
 0x139   : > { %v6066_v34 = vpop.f32.mrb[7].mxu0  ;;  %v530_v21 = vmul.f32 %v473_v20, %v9114_v47 }
 0x13a   : > { %v6067_v39 = vadd.f32 %v6066_v34, %v6065_v61  ;;  %6835 = vmatprep.mubr.msk.f32.mxu1 %vm697_vm0, %v618_v58 }
 0x13b   : > { %7095 = vmatpush3.bf16.msra.mxu1 %v7092_v27 }
 0x13c   : > { %v623_v8 = vadd.f32 %v6067_v39, %v528_v57  ;;  %v6068_v9 = vpop.f32.mrb[8].mxu0  ;;  %7097 = vmatprep.subr.bf16.mxu1 %v9105_v62  ;;  %v9124_v57 = vld [vmem:[%s9079_s21 + $0x38] sm:$0xff]  ;;  %v483_v34 = vpop.permute.xlu1 %482 }
 0x13d   : > { %v6069_v14 = vpop.f32.mrb[9].mxu0  ;;  %v532_v39 = vmul.f32 %v483_v34, %v9124_v57  ;;  %v9148_v34 = vld [vmem:[%s9079_s21 + $0x50] sm:$0xff] }
 0x13e   : > { %v6070_v15 = vadd.f32 %v6069_v14, %v6068_v9  ;;  %6836 = vmatmul.mubr.msk.f32.gmra.mrb[2].mxu1 %vm697_vm0, %v623_v8 }
 0x140   : > { %v628_v26 = vadd.f32 %v6070_v15, %v529_v4  ;;  %v6071_v41 = vpop.f32.mrb[10].mxu0  ;;  %v9130_v15 = vld [vmem:[%s9079_s21 + $0x40] sm:$0xff] }
 0x141   : > { %v6072_v27 = vpop.f32.mrb[11].mxu0 }
 0x142   : > { %v6073_v50 = vadd.f32 %v6072_v27, %v6071_v41  ;;  %6838 = vmatprep.mubr.msk.f32.mxu1 %vm697_vm0, %v628_v26  ;;  %v533_v26 = vmul.f32 %v9071_v54, %v9130_v15  ;;  %v9138_v27 = vld [vmem:[%s11880_s5] ss:$0 sm:$0xff] }
 0x143   : > { %12059 = vst [vmem:[#allocation11_spill] sm:$0xff] %v9138_v27  ;;  %1111 = vrot.lane.b32.xlu0 %v9138_v27, %s8638_s13 }
 0x144   : > { %v633_v49 = vadd.f32 %v6073_v50, %v530_v21  ;;  %v6074_v33 = vpop.f32.mrb[12].mxu0  ;;  %v9141_v50 = vld [vmem:[%s9079_s21 + $0x48] sm:$0xff] }
 0x145   : > { %v6075_v58 = vpop.f32.mrb[13].mxu0 }
 0x146   : > { %v6076_v61 = vadd.f32 %v6075_v58, %v6074_v33  ;;  %6839 = vmatmul.mubr.msk.f32.gmra.mrb[4].mxu1 %vm697_vm0, %v633_v49  ;;  %v493_v33 = vpop.permute.xlu1 %492 }
 0x147   : > { %v534_v54 = vmul.f32 %v493_v33, %v9141_v50  ;;  %v393_v33 = vld [vmem:[%s9079_s21 + $0x60] sm:$0xff] }
 0x148   : > { %v638_v4 = vadd.f32 %v6076_v61, %v531_v48  ;;  %v6077_v8 = vpop.f32.mrb[14].mxu0 }
 0x149   : > { %v6078_v9 = vpop.f32.mrb[15].mxu0 }
 0x14a   : > { %v6079_v14 = vadd.f32 %v6078_v9, %v6077_v8  ;;  %6841 = vmatprep.mubr.msk.f32.mxu1 %vm697_vm0, %v638_v4  ;;  %v535_v9 = vmul.f32 %v9073_v55, %v9148_v34  ;;  %v537_v55 = vmul.f32 %v9081_v56, %v393_v33 }
 0x14c   : > { %v643_v53 = vadd.f32 %v6079_v14, %v532_v39  ;;  %v6080_v20 = vpop.f32.mrb[16].mxu0 }
 0x14d   : > { %v6081_v21 = vpop.f32.mrb[17].mxu0 }
 0x14e   : > { %v6082_v41 = vadd.f32 %v6081_v21, %v6080_v20  ;;  %6842 = vmatmul.mubr.msk.f32.gmra.mrb[6].mxu1 %vm697_vm0, %v643_v53  ;;  %v392_v53 = vld [vmem:[%s9079_s21 + $0x58] sm:$0xff] }
 0x150   : > { %v648_v48 = vadd.f32 %v6082_v41, %v533_v26  ;;  %v6083_v49 = vpop.f32.mrb[18].mxu0  ;;  %v503_v26 = vpop.permute.xlu1 %502 }
 0x151   : > { %v6084_v58 = vpop.f32.mrb[19].mxu0 }
 0x152   : > { %v6085_v61 = vadd.f32 %v6084_v58, %v6083_v49  ;;  %6844 = vmatprep.mubr.msk.f32.mxu1 %vm697_vm0, %v648_v48  ;;  %v536_v49 = vmul.f32 %v503_v26, %v392_v53 }
 0x154   : > { %v653_v39 = vadd.f32 %v6085_v61, %v534_v54  ;;  %v6086_v4 = vpop.f32.mrb[20].mxu0 }
 0x155   : > { %v6087_v8 = vpop.f32.mrb[21].mxu0 }
 0x156   : > { %v6088_v14 = vadd.f32 %v6087_v8, %v6086_v4  ;;  %6845 = vmatmul.mubr.msk.f32.gmra.mrb[8].mxu1 %vm697_vm0, %v653_v39  ;;  %v513_v39 = vpop.permute.xlu1 %512  ;;  %v394_v8 = vld [vmem:[%s9079_s21 + $0x68] sm:$0xff] }
 0x157   : > { %v538_v26 = vmul.f32 %v513_v39, %v394_v8 }
 0x158   : > { %v658_v20 = vadd.f32 %v6088_v14, %v535_v9  ;;  %v6089_v21 = vpop.f32.mrb[22].mxu0 }
 0x159   : > { %v6090_v41 = vpop.f32.mrb[23].mxu0 }
 0x15a   : > { %v6091_v48 = vadd.f32 %v6090_v41, %v6089_v21  ;;  %6847 = vmatprep.mubr.msk.f32.mxu1 %vm697_vm0, %v658_v20  ;;  %v395_v20 = vld [vmem:[%s9079_s21 + $0x70] sm:$0xff] }
 0x15b   : > { %v539_v56 = vmul.f32 %v9090_v60, %v395_v20 }
 0x15c   : > { %v663_v58 = vadd.f32 %v6091_v48, %v536_v49  ;;  %v6092_v54 = vpop.f32.mrb[24].mxu0  ;;  %v523_v48 = vpop.permute.xlu1 %522 }
 0x15d   : > { %v6093_v61 = vpop.f32.mrb[25].mxu0 }
 0x15e   : > { %v6094_v4 = vadd.f32 %v6093_v61, %v6092_v54  ;;  %6848 = vmatmul.mubr.msk.f32.gmra.mrb[10].mxu1 %vm697_vm0, %v663_v58  ;;  %v396_v58 = vld [vmem:[%s9079_s21 + $0x78] sm:$0xff]  ;;  %s11805_s21 = scalar_lea.vmem [#allocation5], %s5688_s12 }
 0x15f   : > { %v540_v38 = vmul.f32 %v523_v48, %v396_v58  ;;  %s5594_s20 = sshll.u32 %s11805_s21, 4  ;;  %s11828_s20 = int_to_ptr.vmem [resolvable:$true] %s5594_s20 }
 0x160   : > { %v668_v9 = vadd.f32 %v6094_v4, %v537_v55  ;;  %v6095_v14 = vpop.f32.mrb[26].mxu0  ;;  %v7591_v4 = vpop.permute.xlu1 %7590  ;;  %s8566_s9 = scalar_lea.vmem %s11828_s20, 2048 }
 0x161   : > { %v6096_v27 = vpop.f32.mrb[27].mxu0  ;;  %p8567_p6 = scmp.ne.s32.totalorder %s11828_s20, %s8566_s9 }
 0x162   : > { %v6097_v21 = vadd.f32 %v6096_v27, %v6095_v14  ;;  %6850 = vmatprep.mubr.msk.f32.mxu1 %vm697_vm0, %v668_v9  ;;  %v7593_v9 = vunpack.i.h.bf16 %v7591_v4  ;;  %v7592_v14 = vunpack.i.l.bf16 %v7591_v4 }
 0x163   : > { %p8568_p10 = pnand %p8567_p6, %p12352_p9 }
 0x164   : > { %v673_v41 = vadd.f32 %v6097_v21, %v538_v26  ;;  %v6098_v49 = vpop.f32.mrb[28].mxu0 }
 0x165   : > { %v6099_v46 = vpop.f32.mrb[29].mxu0  ;;  %p8569_p12 = pneg %p8568_p10 }
 0x166   : > { %v6100_v54 = vadd.f32 %v6099_v46, %v6098_v49  ;;  %6851 = vmatmul.mubr.msk.f32.gmra.mrb[12].mxu1 %vm697_vm0, %v673_v41  ;;  %v7100_v46 = vpack.c.bf16 %v7593_v9, %v7592_v14 }
 0x168   : > { %v678_v61 = vadd.f32 %v6100_v54, %v539_v56  ;;  %v6101_v45 = vpop.f32.mrb[30].mxu0 }
 0x169   : > { %v6102_v55 = vpop.f32.mrb[31].mxu0 }
 0x16a   : > { %v6103_v39 = vadd.f32 %v6102_v55, %v6101_v45  ;;  %6853 = vmatprep.mubr.msk.f32.mxu1 %vm697_vm0, %v678_v61 }
 0x16c   : > { %v683_v27 = vadd.f32 %v6103_v39, %v540_v38 }
 0x16e   : > { %6854 = vmatmul.mubr.msk.f32.gmra.mrb[14].mxu1 %vm697_vm0, %v683_v27 }
 0x16f   : > { %6864 = vmatprep.mubr.msk.f32.mxu1 %vm697_vm0, %v9084_v28 }
 0x172   : > { %6865 = vmatmul.mubr.msk.f32.vlgmr.msra.gmra.mrb[16].mxu1 %vm697_vm0, %v9088_v59 }
 0x173   : > { %7099 = vmatpush3.bf16.msra.mxu1 %v9105_v62  ;;  %6867 = vmatprep.mubr.msk.f32.mxu1 %vm697_vm0, %v9093_v0 }
 0x174   : > { %7101 = vmatprep.subr.bf16.mxu1 %v7100_v46 }
 0x176   : > { %6868 = vmatmul.mubr.msk.f32.gmra.mrb[18].mxu1 %vm697_vm0, %v9101_v44 }
 0x177   : > { %6870 = vmatprep.mubr.msk.f32.mxu1 %vm697_vm0, %v9108_v63  ;;  %7103 = vmatpush3.bf16.msra.mxu1 %v7100_v46 }
 0x17a   : > { %6871 = vmatmul.mubr.msk.f32.gmra.mrb[20].mxu1 %vm697_vm0, %v9114_v47 }
 0x17b   : > { %6873 = vmatprep.mubr.msk.f32.mxu1 %vm697_vm0, %v9119_v43 }
 0x17e   : > { %6874 = vmatmul.mubr.msk.f32.gmra.mrb[22].mxu1 %vm697_vm0, %v9124_v57 }
 0x17f   : > { %6876 = vmatprep.mubr.msk.f32.mxu1 %vm697_vm0, %v9130_v15 }
 0x182   : > { %6877 = vmatmul.mubr.msk.f32.gmra.mrb[24].mxu1 %vm697_vm0, %v9141_v50 }
 0x183   : > { %6879 = vmatprep.mubr.msk.f32.mxu1 %vm697_vm0, %v9148_v34 }
 0x186   : > { %6880 = vmatmul.mubr.msk.f32.gmra.mrb[26].mxu1 %vm697_vm0, %v392_v53 }
 0x187   : > { %6882 = vmatprep.mubr.msk.f32.mxu1 %vm697_vm0, %v393_v33 }
 0x18a   : > { %6883 = vmatmul.mubr.msk.f32.gmra.mrb[28].mxu1 %vm697_vm0, %v394_v8 }
 0x18b   : > { %6885 = vmatprep.mubr.msk.f32.mxu1 %vm697_vm0, %v395_v20 }
 0x18e   : > { %6886 = vmatmul.mubr.msk.f32.gmra.mrb[30].mxu1 %vm697_vm0, %v396_v58 }
 0x18f   : > { %6896 = vmatprep.mubr.msk.f32.mxu1 %vm697_vm0, %v8790_v3  ;;  %v12062_v3 = vld [vmem:[#allocation10_spill] sm:$0xff] }
 0x192   : > { %6897 = vmatmul.mubr.msk.f32.vlgmr.msra.gmra.mrb[32].mxu1 %vm697_vm0, %v8799_v5 }
 0x193   : > { %6899 = vmatprep.mubr.msk.f32.mxu1 %vm697_vm0, %v8818_v10 }
 0x196   : > { %6900 = vmatmul.mubr.msk.f32.gmra.mrb[34].mxu1 %vm697_vm0, %v8823_v11 }
 0x197   : > { %6902 = vmatprep.mubr.msk.f32.mxu1 %vm697_vm0, %v8843_v16 }
 0x19a   : > { %6903 = vmatmul.mubr.msk.f32.gmra.mrb[36].mxu1 %vm697_vm0, %v8848_v17 }
 0x19b   : > { %6905 = vmatprep.mubr.msk.f32.mxu1 %vm697_vm0, %v8872_v22 }
 0x19e   : > { %6906 = vmatmul.mubr.msk.f32.gmra.mrb[38].mxu1 %vm697_vm0, %v8877_v23 }
 0x19f   : > { %6908 = vmatprep.mubr.msk.f32.mxu1 %vm697_vm0, %v8897_v29 }
 0x1a2   : > { %6909 = vmatmul.mubr.msk.f32.gmra.mrb[40].mxu1 %vm697_vm0, %v8902_v30 }
 0x1a3   : > { %6911 = vmatprep.mubr.msk.f32.mxu1 %vm697_vm0, %v8922_v35 }
 0x1a6   : > { %6912 = vmatmul.mubr.msk.f32.gmra.mrb[42].mxu1 %vm697_vm0, %v8927_v36 }
 0x1a7   : > { %6914 = vmatprep.mubr.msk.f32.mxu1 %vm697_vm0, %v8949_v40 }
 0x1aa   : > { %6915 = vmatmul.mubr.msk.f32.gmra.mrb[44].mxu1 %vm697_vm0, %v8956_v42 }
 0x1ab   : > { %6917 = vmatprep.mubr.msk.f32.mxu1 %vm697_vm0, %v8979_v51 }
 0x1ae   : > { %6918 = vmatmul.mubr.msk.f32.gmra.mrb[46].mxu1 %vm697_vm0, %v8984_v52 }
 0x1af   : > { %6920 = vmatprep.mubr.msk.f32.mxu1 %vm697_vm0, %v8780_v1  ;;  %v12060_v1 = vld [vmem:[#allocation8_spill] sm:$0xff] }
 0x1b2   : > { %6921 = vmatmul.mubr.msk.f32.gmra.mrb[48].mxu1 %vm697_vm0, %v8785_v2  ;;  %v12061_v2 = vld [vmem:[#allocation9_spill] sm:$0xff] }
 0x1b3   : > { %6923 = vmatprep.mubr.msk.f32.mxu1 %vm697_vm0, %v8804_v6 }
 0x1b6   : > { %6924 = vmatmul.mubr.msk.f32.gmra.mrb[50].mxu1 %vm697_vm0, %v8809_v7  ;;  %v12063_v7 = vld [vmem:[#allocation11_spill] sm:$0xff] }
 0x1b7   : > { %6926 = vmatprep.mubr.msk.f32.mxu1 %vm697_vm0, %v8828_v12 }
 0x1ba   : > { %6927 = vmatmul.mubr.msk.f32.gmra.mrb[52].mxu1 %vm697_vm0, %v8833_v13 }
 0x1bb   : > { %6929 = vmatprep.mubr.msk.f32.mxu1 %vm697_vm0, %v8853_v18 }
 0x1be   : > { %6930 = vmatmul.mubr.msk.f32.gmra.mrb[54].mxu1 %vm697_vm0, %v8858_v19 }
 0x1bf   : > { %6932 = vmatprep.mubr.msk.f32.mxu1 %vm697_vm0, %v8882_v24 }
 0x1c2   : > { %6933 = vmatmul.mubr.msk.f32.gmra.mrb[56].mxu1 %vm697_vm0, %v8887_v25 }
 0x1c3   : > { %6935 = vmatprep.mubr.msk.f32.mxu1 %vm697_vm0, %v8907_v31 }
 0x1c6   : > { %6936 = vmatmul.mubr.msk.f32.gmra.mrb[58].mxu1 %vm697_vm0, %v8912_v32  ;;  %v9293_v32 = vpop.permute.xlu0 %1111 }
 0x1c7   : > { %6938 = vmatprep.mubr.msk.f32.mxu1 %vm697_vm0, %v8932_v37 }
 0x1ca   : > { %6939 = vmatmul.mubr.msk.f32.gmra.mrb[60].mxu1 %vm697_vm0, %v12060_v1 }
 0x1cb   : > { %6941 = vmatprep.mubr.msk.f32.mxu1 %vm697_vm0, %v12061_v2 }
 0x1ce   : > { %6942 = vmatmul.mubr.msk.f32.gmra.mrb[62].mxu1 %vm697_vm0, %v12062_v3 }
 0x245   : > { %v9258_v5 = vpop.f32.mrb[16].mxu1 }
 0x246   : > { %v1016_v6 = vpop.f32.mrb[17].mxu1 }
 0x247   : > { %v9261_v10 = vadd.f32 %v12063_v7, %v1016_v6 }
 0x249   : > { %12064 = vst [vmem:[#allocation8_spill] sm:$0xff] %v9261_v10  ;;  %v9263_v11 = vpop.f32.mrb[18].mxu1  ;;  %6212 = vmatprep.mubr.msk.f32.mxu0 %vm1435_vm1, %v9261_v10 }
 0x24a   : > { %v9267_v12 = vpop.f32.mrb[19].mxu1 }
 0x24d   : > { %v9269_v13 = vpop.f32.mrb[20].mxu1 }
 0x24e   : > { %v9271_v16 = vpop.f32.mrb[21].mxu1 }
 0x251   : > { %v9273_v17 = vpop.f32.mrb[22].mxu1 }
 0x252   : > { %v9275_v18 = vpop.f32.mrb[23].mxu1 }
 0x255   : > { %v9277_v19 = vpop.f32.mrb[24].mxu1 }
 0x256   : > { %v9279_v22 = vpop.f32.mrb[25].mxu1 }
 0x259   : > { %v9281_v23 = vpop.f32.mrb[26].mxu1 }
 0x25a   : > { %v9283_v24 = vpop.f32.mrb[27].mxu1 }
 0x25d   : > { %v9285_v25 = vpop.f32.mrb[28].mxu1 }
 0x25e   : > { %v9287_v29 = vpop.f32.mrb[29].mxu1 }
 0x261   : > { %v9289_v30 = vpop.f32.mrb[30].mxu1 }
 0x262   : > { %v9291_v31 = vpop.f32.mrb[31].mxu1 }
 0x265   : > { %v6898_v35 = vpop.f32.mrb[32].mxu1 }
 0x266   : > { %v9296_v36 = vadd.f32 %v6898_v35, %v9293_v32  ;;  %v1276_v37 = vpop.f32.mrb[33].mxu1 }
 0x267   : > { %v9299_v38 = vadd.f32 %v1276_v37, %v9293_v32 }
 0x269   : > { %v6901_v40 = vpop.f32.mrb[34].mxu1  ;;  %v9303_v42 = vpack.i.bf16 %v9296_v36, %v9299_v38  ;;  %v7107_v45 = vpack.c.bf16 %v9296_v36, %v9299_v38 }
 0x26a   : > { %v9308_v51 = vadd.f32 %v6901_v40, %v9293_v32  ;;  %v1286_v52 = vpop.f32.mrb[35].mxu1 }
 0x26b   : > { %12065 = vst [vmem:[#allocation9_spill] sm:$0xff] %v9303_v42  ;;  %v9311_v28 = vadd.f32 %v1286_v52, %v9293_v32  ;;  %7595 = vrot.lane.b32.xlu0 %v9303_v42, %s8639_s19 }
 0x26d   : > { %v6904_v59 = vpop.f32.mrb[36].mxu1  ;;  %v9317_v60 = vpack.i.bf16 %v9308_v51, %v9311_v28  ;;  %v7113_v0 = vpack.c.bf16 %v9308_v51, %v9311_v28  ;;  %v9483_v51 = vadd.f32 %v9277_v19, %v12063_v7  ;;  %v9499_v19 = vadd.f32 %v9281_v23, %v12063_v7 }
 0x26e   : > { %v9322_v44 = vadd.f32 %v6904_v59, %v9293_v32  ;;  %v1296_v62 = vpop.f32.mrb[37].mxu1 }
 0x26f   : > { %12066 = vst [vmem:[#allocation10_spill] sm:$0xff] %v9317_v60  ;;  %v9325_v63 = vadd.f32 %v1296_v62, %v9293_v32  ;;  %7600 = vrot.lane.b32.xlu0 %v9317_v60, %s8639_s19  ;;  %12084 = vst [vmem:[#allocation26_spill] sm:$0xff] %v9483_v51 }
 0x270   : > { %12087 = vst [vmem:[#allocation29_spill] sm:$0xff] %v9499_v19 }
 0x271   : > { %v6907_v47 = vpop.f32.mrb[38].mxu1  ;;  %v9331_v43 = vpack.i.bf16 %v9322_v44, %v9325_v63  ;;  %v7119_v57 = vpack.c.bf16 %v9322_v44, %v9325_v63  ;;  %v9518_v44 = vadd.f32 %v9285_v25, %v12063_v7  ;;  %v9534_v25 = vadd.f32 %v9289_v30, %v12063_v7 }
 0x272   : > { %v9336_v15 = vadd.f32 %v6907_v47, %v9293_v32  ;;  %v1306_v50 = vpop.f32.mrb[39].mxu1  ;;  %v9411_v47 = vadd.f32 %v9258_v5, %v12063_v7  ;;  %v9429_v5 = vadd.f32 %v9263_v11, %v12063_v7  ;;  %v9448_v11 = vadd.f32 %v9269_v13, %v12063_v7 }
 0x273   : > { %12067 = vst [vmem:[#allocation11_spill] sm:$0xff] %v9331_v43  ;;  %v9339_v34 = vadd.f32 %v1306_v50, %v9293_v32  ;;  %7605 = vrot.lane.b32.xlu0 %v9331_v43, %s8639_s19  ;;  %v9464_v13 = vadd.f32 %v9273_v17, %v12063_v7  ;;  %12089 = vst [vmem:[#allocation31_spill] sm:$0xff] %v9518_v44 }
 0x274   : > { %12073 = vst [vmem:[#allocation17_spill] sm:$0xff] %v9411_v47  ;;  %12077 = vst [vmem:[#allocation19_spill] sm:$0xff] %v9429_v5 }
 0x275   : > { %v6910_v53 = vpop.f32.mrb[40].mxu1  ;;  %v9345_v33 = vpack.i.bf16 %v9336_v15, %v9339_v34  ;;  %v7125_v8 = vpack.c.bf16 %v9336_v15, %v9339_v34  ;;  %12079 = vst [vmem:[#allocation21_spill] sm:$0xff] %v9448_v11  ;;  %12082 = vst [vmem:[#allocation24_spill] sm:$0xff] %v9464_v13 }
 0x276   : > { %v9350_v26 = vadd.f32 %v6910_v53, %v9293_v32  ;;  %v1316_v21 = vpop.f32.mrb[41].mxu1 }
 0x277   : > { %12068 = vst [vmem:[#allocation12_spill] sm:$0xff] %v9345_v33  ;;  %v9353_v20 = vadd.f32 %v1316_v21, %v9293_v32  ;;  %7610 = vrot.lane.b32.xlu0 %v9345_v33, %s8639_s19 }
 0x279   : > { %v6913_v41 = vpop.f32.mrb[42].mxu1  ;;  %v9359_v49 = vpack.i.bf16 %v9350_v26, %v9353_v20  ;;  %v7131_v48 = vpack.c.bf16 %v9350_v26, %v9353_v20 }
 0x27a   : > { %v9364_v56 = vadd.f32 %v6913_v41, %v9293_v32  ;;  %v1326_v54 = vpop.f32.mrb[43].mxu1 }
 0x27b   : > { %12069 = vst [vmem:[#allocation13_spill] sm:$0xff] %v9359_v49  ;;  %v9367_v58 = vadd.f32 %v1326_v54, %v9293_v32  ;;  %7615 = vrot.lane.b32.xlu0 %v9359_v49, %s8639_s19 }
 0x27d   : > { %v6916_v61 = vpop.f32.mrb[44].mxu1  ;;  %v9373_v55 = vpack.i.bf16 %v9364_v56, %v9367_v58  ;;  %v7137_v4 = vpack.c.bf16 %v9364_v56, %v9367_v58 }
 0x27e   : > { %v9378_v39 = vadd.f32 %v6916_v61, %v9293_v32  ;;  %v1336_v27 = vpop.f32.mrb[45].mxu1 }
 0x27f   : > { %12070 = vst [vmem:[#allocation14_spill] sm:$0xff] %v9373_v55  ;;  %v9381_v9 = vadd.f32 %v1336_v27, %v9293_v32  ;;  %7620 = vrot.lane.b32.xlu0 %v9373_v55, %s8639_s19 }
 0x281   : > { %v6919_v14 = vpop.f32.mrb[46].mxu1  ;;  %v9387_v46 = vpack.i.bf16 %v9378_v39, %v9381_v9  ;;  %v7143_v1 = vpack.c.bf16 %v9378_v39, %v9381_v9 }
 0x282   : > { %v9392_v2 = vadd.f32 %v6919_v14, %v9293_v32  ;;  %v1346_v3 = vpop.f32.mrb[47].mxu1 }
 0x283   : > { %12071 = vst [vmem:[#allocation15_spill] sm:$0xff] %v9387_v46  ;;  %v9395_v6 = vadd.f32 %v1346_v3, %v9293_v32  ;;  %7625 = vrot.lane.b32.xlu0 %v9387_v46, %s8639_s19 }
 0x285   : > { %v6922_v35 = vpop.f32.mrb[48].mxu1  ;;  %v9401_v37 = vpack.i.bf16 %v9392_v2, %v9395_v6  ;;  %v7149_v40 = vpack.c.bf16 %v9392_v2, %v9395_v6 }
 0x286   : > { %v1362_v52 = vadd.f32 %v6922_v35, %v9293_v32  ;;  %v1356_v59 = vpop.f32.mrb[49].mxu1 }
 0x287   : > { %12072 = vst [vmem:[#allocation16_spill] sm:$0xff] %v9401_v37  ;;  %v1357_v62 = vadd.f32 %v1356_v59, %v9293_v32  ;;  %7630 = vrot.lane.b32.xlu0 %v9401_v37, %s8639_s19 }
 0x289   : > { %v6925_v53 = vpop.f32.mrb[50].mxu1  ;;  %v9419_v21 = vpack.i.bf16 %v1362_v52, %v1357_v62  ;;  %v7104_v41 = vpack.c.bf16 %v1362_v52, %v1357_v62 }
 0x28a   : > { %v1372_v54 = vadd.f32 %v6925_v53, %v9293_v32  ;;  %v1366_v61 = vpop.f32.mrb[51].mxu1 }
 0x28b   : > { %12076 = vst [vmem:[#allocation18_spill] sm:$0xff] %v9419_v21  ;;  %v1367_v27 = vadd.f32 %v1366_v61, %v9293_v32  ;;  %7635 = vrot.lane.b32.xlu1 %v9419_v21, %s8639_s19  ;;  %7106 = vmatprep.subr.msk.bf16.mxu0 %vm9415_vm2, %v7104_v41  ;;  %v9460_v61 = vadd.f32 %v12063_v7, %v9267_v12 }
 0x28c   : > { %2434 = vrot.lane.b32.xlu0 %v9411_v47, %s8639_s19  ;;  %7109 = vmatpush3.bf16.xpose.msk.msra.mxu0 %vm9415_vm2, %v7107_v45 }
 0x28d   : > { %v6928_v14 = vpop.f32.mrb[52].mxu1  ;;  %v7110_v3 = vpack.c.bf16 %v1372_v54, %v1367_v27  ;;  %v9438_v35 = vpack.i.bf16 %v1372_v54, %v1367_v27  ;;  %12081 = vst [vmem:[#allocation23_spill] sm:$0xff] %v9460_v61 }
 0x28e   : > { %v1382_v52 = vadd.f32 %v6928_v14, %v9293_v32  ;;  %v1376_v59 = vpop.f32.mrb[53].mxu1 }
 0x28f   : > { %12078 = vst [vmem:[#allocation20_spill] sm:$0xff] %v9438_v35  ;;  %v1377_v62 = vadd.f32 %v1376_v59, %v9293_v32  ;;  %7112 = vmatprep.subr.msk.bf16.mxu0 %vm9415_vm2, %v7110_v3  ;;  %2432 = vrot.lane.b32.xlu1 %v9261_v10, %s8639_s19 }
 0x290   : > { %2438 = vrot.lane.b32.xlu0 %v9429_v5, %s8639_s19 }
 0x291   : > { %v6931_v36 = vpop.f32.mrb[54].mxu1  ;;  %v7116_v38 = vpack.c.bf16 %v1382_v52, %v1377_v62  ;;  %v9452_v45 = vpack.i.bf16 %v1382_v52, %v1377_v62 }
 0x292   : > { %v1392_v53 = vadd.f32 %v6931_v36, %v9293_v32  ;;  %v1386_v41 = vpop.f32.mrb[55].mxu1 }
 0x293   : > { %12080 = vst [vmem:[#allocation22_spill] sm:$0xff] %v9452_v45  ;;  %v1387_v54 = vadd.f32 %v1386_v41, %v9293_v32  ;;  %7640 = vrot.lane.b32.xlu1 %v9438_v35, %s8639_s19 }
 0x294   : > { %2442 = vrot.lane.b32.xlu0 %v9448_v11, %s8639_s19  ;;  %7115 = vmatpush3.bf16.xpose.msk.msra.mxu0 %vm9415_vm2, %v7113_v0 }
 0x295   : > { %v6934_v27 = vpop.f32.mrb[56].mxu1  ;;  %7118 = vmatprep.subr.msk.bf16.mxu0 %vm9415_vm2, %v7116_v38  ;;  %v7122_v14 = vpack.c.bf16 %v1392_v53, %v1387_v54  ;;  %v9475_v12 = vpack.i.bf16 %v1392_v53, %v1387_v54  ;;  %v9495_v53 = vadd.f32 %v12063_v7, %v9271_v16 }
 0x296   : > { %v1402_v3 = vadd.f32 %v6934_v27, %v9293_v32  ;;  %v1396_v17 = vpop.f32.mrb[57].mxu1 }
 0x297   : > { %12083 = vst [vmem:[#allocation25_spill] sm:$0xff] %v9475_v12  ;;  %v1397_v52 = vadd.f32 %v1396_v17, %v9293_v32  ;;  %2436 = vrot.lane.b32.xlu1 %v9460_v61, %s8639_s19  ;;  %12086 = vst [vmem:[#allocation28_spill] sm:$0xff] %v9495_v53 }
 0x298   : > { %2446 = vrot.lane.b32.xlu0 %v9464_v13, %s8639_s19 }
 0x299   : > { %v6937_v28 = vpop.f32.mrb[58].mxu1  ;;  %v7128_v0 = vpack.c.bf16 %v1402_v3, %v1397_v52  ;;  %v9487_v59 = vpack.i.bf16 %v1402_v3, %v1397_v52 }
 0x29a   : > { %v1412_v62 = vadd.f32 %v6937_v28, %v9293_v32  ;;  %v1406_v36 = vpop.f32.mrb[59].mxu1 }
 0x29b   : > { %12085 = vst [vmem:[#allocation27_spill] sm:$0xff] %v9487_v59  ;;  %v1407_v38 = vadd.f32 %v1406_v36, %v9293_v32  ;;  %7645 = vrot.lane.b32.xlu1 %v9452_v45, %s8639_s19 }
 0x29c   : > { %2450 = vrot.lane.b32.xlu0 %v9483_v51, %s8639_s19  ;;  %7121 = vmatpush3.bf16.xpose.msk.msra.mxu0 %vm9415_vm2, %v7119_v57 }
 0x29d   : > { %v6940_v41 = vpop.f32.mrb[60].mxu1  ;;  %7124 = vmatprep.subr.msk.bf16.mxu0 %vm9415_vm2, %v7122_v14  ;;  %v7134_v54 = vpack.c.bf16 %v1412_v62, %v1407_v38  ;;  %v9510_v16 = vpack.i.bf16 %v1412_v62, %v1407_v38  ;;  %v9530_v62 = vadd.f32 %v12063_v7, %v9275_v18  ;;  %v9562_v18 = vadd.f32 %v12063_v7, %v9279_v22 }
 0x29e   : > { %v1422_v27 = vadd.f32 %v6940_v41, %v9293_v32  ;;  %v1416_v23 = vpop.f32.mrb[61].mxu1  ;;  %v9581_v22 = vadd.f32 %v12063_v7, %v9283_v24  ;;  %v9600_v24 = vadd.f32 %v12063_v7, %v9287_v29  ;;  %v9619_v29 = vadd.f32 %v12063_v7, %v9291_v31 }
 0x29f   : > { %12088 = vst [vmem:[#allocation30_spill] sm:$0xff] %v9510_v16  ;;  %v1417_v3 = vadd.f32 %v1416_v23, %v9293_v32  ;;  %2440 = vrot.lane.b32.xlu1 %v9495_v53, %s8639_s19  ;;  %12091 = vst [vmem:[#allocation33_spill] sm:$0xff] %v9530_v62 }
 0x2a0   : > { %2454 = vrot.lane.b32.xlu0 %v9499_v19, %s8639_s19  ;;  %12093 = vst [vmem:[#allocation35_spill] sm:$0xff] %v9562_v18  ;;  %12094 = vst [vmem:[#allocation36_spill] sm:$0xff] %v9581_v22 }
 0x2a1   : > { %v6943_v63 = vpop.f32.mrb[62].mxu1  ;;  %v7140_v57 = vpack.c.bf16 %v1422_v27, %v1417_v3  ;;  %v9522_v14 = vpack.i.bf16 %v1422_v27, %v1417_v3  ;;  %12095 = vst [vmem:[#allocation37_spill] sm:$0xff] %v9600_v24  ;;  %12096 = vst [vmem:[#allocation38_spill] sm:$0xff] %v9619_v29 }
 0x2a2   : > { %v1432_v17 = vadd.f32 %v6943_v63, %v9293_v32  ;;  %v1426_v52 = vpop.f32.mrb[63].mxu1 }
 0x2a3   : > { %12090 = vst [vmem:[#allocation32_spill] sm:$0xff] %v9522_v14  ;;  %v1427_v28 = vadd.f32 %v1426_v52, %v9293_v32  ;;  %7650 = vrot.lane.b32.xlu1 %v9475_v12, %s8639_s19 }
 0x2a4   : > { %2458 = vrot.lane.b32.xlu0 %v9518_v44, %s8639_s19  ;;  %7127 = vmatpush3.bf16.xpose.msk.msra.mxu0 %vm9415_vm2, %v7125_v8 }
 0x2a5   : > { %7130 = vmatprep.subr.msk.bf16.mxu0 %vm9415_vm2, %v7128_v0  ;;  %v7146_v32 = vpack.c.bf16 %v1432_v17, %v1427_v28  ;;  %v9545_v36 = vpack.i.bf16 %v1432_v17, %v1427_v28 }
 0x2a7   : > { %12092 = vst [vmem:[#allocation34_spill] sm:$0xff] %v9545_v36  ;;  %2444 = vrot.lane.b32.xlu1 %v9530_v62, %s8639_s19 }
 0x2a8   : > { %2462 = vrot.lane.b32.xlu0 %v9534_v25, %s8639_s19 }
 0x2ab   : > { %7655 = vrot.lane.b32.xlu1 %v9487_v59, %s8639_s19 }
 0x2ac   : > { %7675 = vrot.lane.b32.xlu0 %v9419_v21, %s8640_s17  ;;  %7133 = vmatpush3.bf16.xpose.msk.msra.mxu0 %vm9415_vm2, %v7131_v48 }
 0x2ad   : > { %7136 = vmatprep.subr.msk.bf16.mxu0 %vm9415_vm2, %v7134_v54 }
 0x2af   : > { %2448 = vrot.lane.b32.xlu1 %v9562_v18, %s8639_s19 }
 0x2b0   : > { %7690 = vrot.lane.b32.xlu0 %v9317_v60, %s8640_s17 }
 0x2b3   : > { %7660 = vrot.lane.b32.xlu1 %v9510_v16, %s8639_s19 }
 0x2b4   : > { %7700 = vrot.lane.b32.xlu0 %v9331_v43, %s8640_s17  ;;  %7139 = vmatpush3.bf16.xpose.msk.msra.mxu0 %vm9415_vm2, %v7137_v4 }
 0x2b5   : > { %7142 = vmatprep.subr.msk.bf16.mxu0 %vm9415_vm2, %v7140_v57 }
 0x2b7   : > { %2452 = vrot.lane.b32.xlu1 %v9581_v22, %s8639_s19 }
 0x2b8   : > { %7705 = vrot.lane.b32.xlu0 %v9475_v12, %s8640_s17 }
 0x2bb   : > { %7665 = vrot.lane.b32.xlu1 %v9522_v14, %s8639_s19 }
 0x2bc   : > { %7710 = vrot.lane.b32.xlu0 %v9345_v33, %s8640_s17  ;;  %7145 = vmatpush3.bf16.xpose.msk.msra.mxu0 %vm9415_vm2, %v7143_v1 }
 0x2bd   : > { %7148 = vmatprep.subr.msk.bf16.mxu0 %vm9415_vm2, %v7146_v32 }
 0x2bf   : > { %2456 = vrot.lane.b32.xlu1 %v9600_v24, %s8639_s19 }
 0x2c0   : > { %7720 = vrot.lane.b32.xlu0 %v9359_v49, %s8640_s17 }
 0x2c3   : > { %7670 = vrot.lane.b32.xlu1 %v9545_v36, %s8639_s19 }
 0x2c4   : > { %7725 = vrot.lane.b32.xlu0 %v9510_v16, %s8640_s17  ;;  %7151 = vmatpush3.bf16.xpose.msk.msra.mxu0 %vm9415_vm2, %v7149_v40 }
 0x2c7   : > { %2460 = vrot.lane.b32.xlu1 %v9619_v29, %s8639_s19 }
 0x2c8   : > { %7730 = vrot.lane.b32.xlu0 %v9373_v55, %s8640_s17 }
 0x2cb   : > { %7680 = vrot.lane.b32.xlu1 %v9303_v42, %s8640_s17  ;;  %6213 = vmatmul.mubr.msk.f32.vlgmr.msra.gmra.mrb[32].mxu0 %vm1435_vm1, %v9261_v10 }
 0x2cc   : > { %7740 = vrot.lane.b32.xlu0 %v9387_v46, %s8640_s17  ;;  %6214 = vmatprep.mubr.msk.f32.mxu0 %vm1435_vm1, %v9411_v47 }
 0x2cf   : > { %7685 = vrot.lane.b32.xlu1 %v9438_v35, %s8640_s17  ;;  %6215 = vmatmul.mubr.msk.f32.gmra.mrb[34].mxu0 %vm1435_vm1, %v9411_v47 }
 0x2d0   : > { %7745 = vrot.lane.b32.xlu0 %v9401_v37, %s8640_s17  ;;  %6216 = vmatprep.mubr.msk.f32.mxu0 %vm1435_vm1, %v9460_v61 }
 0x2d3   : > { %7695 = vrot.lane.b32.xlu1 %v9452_v45, %s8640_s17  ;;  %6217 = vmatmul.mubr.msk.f32.gmra.mrb[36].mxu0 %vm1435_vm1, %v9460_v61 }
 0x2d4   : > { %7760 = vrot.lane.b32.xlu0 %v9438_v35, %s8641_s25  ;;  %6218 = vmatprep.mubr.msk.f32.mxu0 %vm1435_vm1, %v9429_v5 }
 0x2d7   : > { %7715 = vrot.lane.b32.xlu1 %v9487_v59, %s8640_s17  ;;  %6219 = vmatmul.mubr.msk.f32.gmra.mrb[38].mxu0 %vm1435_vm1, %v9429_v5 }
 0x2d8   : > { %7765 = vrot.lane.b32.xlu0 %v9317_v60, %s8641_s25  ;;  %6220 = vmatprep.mubr.msk.f32.mxu0 %vm1435_vm1, %v9495_v53 }
 0x2db   : > { %7735 = vrot.lane.b32.xlu1 %v9522_v14, %s8640_s17  ;;  %6221 = vmatmul.mubr.msk.f32.gmra.mrb[40].mxu0 %vm1435_vm1, %v9495_v53 }
 0x2dc   : > { %7780 = vrot.lane.b32.xlu0 %v9475_v12, %s8641_s25  ;;  %6222 = vmatprep.mubr.msk.f32.mxu0 %vm1435_vm1, %v9448_v11 }
 0x2dd   : > { %v7596_v7 = vpop.permute.xlu0 %7595 }
 0x2de   : > { %v7598_v56 = vunpack.i.h.bf16 %v7596_v7  ;;  %v7597_v58 = vunpack.i.l.bf16 %v7596_v7 }
 0x2df   : > { %7750 = vrot.lane.b32.xlu1 %v9419_v21, %s8641_s25  ;;  %6223 = vmatmul.mubr.msk.f32.gmra.mrb[42].mxu0 %vm1435_vm1, %v9448_v11 }
 0x2e0   : > { %7785 = vrot.lane.b32.xlu0 %v9345_v33, %s8641_s25  ;;  %6224 = vmatprep.mubr.msk.f32.mxu0 %vm1435_vm1, %v9530_v62  ;;  %v7187_v6 = vpack.c.bf16 %v7598_v56, %v7597_v58 }
 0x2e1   : > { %v9673_v30 = vpop.permute.xlu0 %7600 }
 0x2e2   : > { %v7603_v38 = vunpack.i.h.bf16 %v9673_v30  ;;  %v7602_v41 = vunpack.i.l.bf16 %v9673_v30 }
 0x2e3   : > { %7755 = vrot.lane.b32.xlu1 %v9303_v42, %s8641_s25  ;;  %6225 = vmatmul.mubr.msk.f32.gmra.mrb[44].mxu0 %vm1435_vm1, %v9530_v62 }
 0x2e4   : > { %7795 = vrot.lane.b32.xlu0 %v9359_v49, %s8641_s25  ;;  %6226 = vmatprep.mubr.msk.f32.mxu0 %vm1435_vm1, %v9464_v13  ;;  %v7193_v57 = vpack.c.bf16 %v7603_v38, %v7602_v41 }
 0x2e5   : > { %v9683_v31 = vpop.permute.xlu0 %7605 }
 0x2e6   : > { %v7608_v28 = vunpack.i.h.bf16 %v9683_v31  ;;  %v7607_v32 = vunpack.i.l.bf16 %v9683_v31 }
 0x2e7   : > { %7770 = vrot.lane.b32.xlu1 %v9452_v45, %s8641_s25  ;;  %6227 = vmatmul.mubr.msk.f32.gmra.mrb[46].mxu0 %vm1435_vm1, %v9464_v13 }
 0x2e8   : > { %7805 = vrot.lane.b32.xlu0 %v9373_v55, %s8641_s25  ;;  %6228 = vmatprep.mubr.msk.f32.mxu0 %vm1435_vm1, %v9562_v18 }
 0x2e9   : > { %v9693_v15 = vpop.permute.xlu0 %7610 }
 0x2eb   : > { %7775 = vrot.lane.b32.xlu1 %v9331_v43, %s8641_s25  ;;  %6229 = vmatmul.mubr.msk.f32.gmra.mrb[48].mxu0 %vm1435_vm1, %v9562_v18 }
 0x2ec   : > { %7815 = vrot.lane.b32.xlu0 %v9387_v46, %s8641_s25  ;;  %6230 = vmatprep.mubr.msk.f32.mxu0 %vm1435_vm1, %v9483_v51 }
 0x2ed   : > { %v9703_v34 = vpop.permute.xlu0 %7615 }
 0x2ef   : > { %7790 = vrot.lane.b32.xlu1 %v9487_v59, %s8641_s25  ;;  %6231 = vmatmul.mubr.msk.f32.gmra.mrb[50].mxu0 %vm1435_vm1, %v9483_v51 }
 0x2f0   : > { %7820 = vrot.lane.b32.xlu0 %v9401_v37, %s8641_s25  ;;  %6232 = vmatprep.mubr.msk.f32.mxu0 %vm1435_vm1, %v9581_v22 }
 0x2f1   : > { %v9713_v8 = vpop.permute.xlu0 %7620 }
 0x2f3   : > { %7800 = vrot.lane.b32.xlu1 %v9510_v16, %s8641_s25  ;;  %6233 = vmatmul.mubr.msk.f32.gmra.mrb[52].mxu0 %vm1435_vm1, %v9581_v22 }
 0x2f4   : > { %3478 = vrot.lane.b32.xlu0 %v9411_v47, %s8641_s25  ;;  %6234 = vmatprep.mubr.msk.f32.mxu0 %vm1435_vm1, %v9499_v19 }
 0x2f5   : > { %v9723_v26 = vpop.permute.xlu0 %7625 }
 0x2f7   : > { %7810 = vrot.lane.b32.xlu1 %v9522_v14, %s8641_s25  ;;  %6235 = vmatmul.mubr.msk.f32.gmra.mrb[54].mxu0 %vm1435_vm1, %v9499_v19 }
 0x2f8   : > { %3480 = vrot.lane.b32.xlu0 %v9460_v61, %s8641_s25  ;;  %6236 = vmatprep.mubr.msk.f32.mxu0 %vm1435_vm1, %v9600_v24 }
 0x2f9   : > { %v9733_v20 = vpop.permute.xlu0 %7630 }
 0x2fb   : > { %3476 = vrot.lane.b32.xlu1 %v9261_v10, %s8641_s25  ;;  %6237 = vmatmul.mubr.msk.f32.gmra.mrb[56].mxu0 %vm1435_vm1, %v9600_v24 }
 0x2fc   : > { %3490 = vrot.lane.b32.xlu0 %v9464_v13, %s8641_s25  ;;  %6238 = vmatprep.mubr.msk.f32.mxu0 %vm1435_vm1, %v9518_v44 }
 0x2fd   : > { %v7636_v48 = vpop.permute.xlu1 %7635 }
 0x2fe   : > { %v7638_v4 = vunpack.i.h.bf16 %v7636_v48  ;;  %v7637_v39 = vunpack.i.l.bf16 %v7636_v48  ;;  %v9743_v9 = vpop.permute.xlu0 %2434 }
 0x2ff   : > { %3482 = vrot.lane.b32.xlu1 %v9429_v5, %s8641_s25  ;;  %6239 = vmatmul.mubr.msk.f32.gmra.mrb[58].mxu0 %vm1435_vm1, %v9518_v44 }
 0x300   : > { %v7184_v1 = vpack.c.bf16 %v7638_v4, %v7637_v39  ;;  %7830 = vrot.lane.b32.xlu0 %v9303_v42, %s8638_s13  ;;  %6240 = vmatprep.mubr.msk.f32.mxu0 %vm1435_vm1, %v9619_v29  ;;  %v7199_v4 = vpack.c.bf16 %v7608_v28, %v7607_v32  ;;  %v7617_v28 = vunpack.i.l.bf16 %v9703_v34 }
 0x301   : > { %v9753_v2 = vpop.permute.xlu1 %2432 }
 0x302   : > { %v9755_v40 = vpop.permute.xlu0 %2438  ;;  %7186 = vmatprep.subr.msk.bf16.mxu0 %vm9415_vm2, %v7184_v1  ;;  %v7613_v1 = vunpack.i.h.bf16 %v9693_v15 }
 0x303   : > { %3484 = vrot.lane.b32.xlu1 %v9495_v53, %s8641_s25  ;;  %6241 = vmatmul.mubr.msk.f32.gmra.mrb[60].mxu0 %vm1435_vm1, %v9619_v29 }
 0x304   : > { %7835 = vrot.lane.b32.xlu0 %v9545_v36, %s8640_s17  ;;  %7189 = vmatpush3.bf16.xpose.msk.msra.mxu0 %vm9415_vm2, %v7187_v6  ;;  %v7612_v6 = vunpack.i.l.bf16 %v9693_v15 }
 0x305   : > { %6242 = vmatprep.mubr.msk.f32.mxu0 %vm1435_vm1, %v9534_v25  ;;  %v7641_v0 = vpop.permute.xlu1 %7640 }
 0x306   : > { %v9771_v54 = vpop.permute.xlu0 %2442  ;;  %v7643_v27 = vunpack.i.h.bf16 %v7641_v0  ;;  %v7642_v23 = vunpack.i.l.bf16 %v7641_v0 }
 0x307   : > { %3486 = vrot.lane.b32.xlu1 %v9448_v11, %s8641_s25  ;;  %6243 = vmatmul.mubr.msk.f32.gmra.mrb[62].mxu0 %vm1435_vm1, %v9534_v25 }
 0x308   : > { %v7190_v3 = vpack.c.bf16 %v7643_v27, %v7642_v23  ;;  %6373 = vmatprep.mubr.msk.f32.mxu0 %vm1435_vm1, %v9753_v2 }
 0x309   : > { %v9779_v63 = vpop.permute.xlu1 %2436 }
 0x30a   : > { %v9781_v17 = vpop.permute.xlu0 %2446  ;;  %7192 = vmatprep.subr.msk.bf16.mxu0 %vm9415_vm2, %v7190_v3  ;;  %v7205_v3 = vpack.c.bf16 %v7613_v1, %v7612_v6  ;;  %v7623_v6 = vunpack.i.h.bf16 %v9713_v8 }
 0x30b   : > { %3488 = vrot.lane.b32.xlu1 %v9530_v62, %s8641_s25 }
 0x30c   : > { %7195 = vmatpush3.bf16.xpose.msk.msra.mxu0 %vm9415_vm2, %v7193_v57 }
 0x30d   : > { %v7646_v52 = vpop.permute.xlu1 %7645 }
 0x30e   : > { %v9791_v7 = vpop.permute.xlu0 %2450  ;;  %v7648_v30 = vunpack.i.h.bf16 %v7646_v52  ;;  %v7647_v48 = vunpack.i.l.bf16 %v7646_v52  ;;  %v7618_v52 = vunpack.i.h.bf16 %v9703_v34 }
 0x30f   : > { %3492 = vrot.lane.b32.xlu1 %v9562_v18, %s8641_s25 }
 0x310   : > { %v7196_v56 = vpack.c.bf16 %v7648_v30, %v7647_v48 }
 0x311   : > { %v9795_v58 = vpop.permute.xlu1 %2440 }
 0x312   : > { %v9797_v39 = vpop.permute.xlu0 %2454  ;;  %7198 = vmatprep.subr.msk.bf16.mxu0 %vm9415_vm2, %v7196_v56 }
 0x313   : > { %3494 = vrot.lane.b32.xlu1 %v9483_v51, %s8641_s25 }
 0x314   : > { %7201 = vmatpush3.bf16.xpose.msk.msra.mxu0 %vm9415_vm2, %v7199_v4 }
 0x315   : > { %v7651_v31 = vpop.permute.xlu1 %7650 }
 0x316   : > { %v9807_v0 = vpop.permute.xlu0 %2458  ;;  %v7653_v38 = vunpack.i.h.bf16 %v7651_v31  ;;  %v7652_v41 = vunpack.i.l.bf16 %v7651_v31  ;;  %v7211_v31 = vpack.c.bf16 %v7618_v52, %v7617_v28 }
 0x317   : > { %3496 = vrot.lane.b32.xlu1 %v9581_v22, %s8641_s25 }
 0x318   : > { %v7202_v27 = vpack.c.bf16 %v7653_v38, %v7652_v41  ;;  %v7622_v38 = vunpack.i.l.bf16 %v9713_v8 }
 0x319   : > { %v9811_v23 = vpop.permute.xlu1 %2444 }
 0x31a   : > { %v9813_v57 = vpop.permute.xlu0 %2462  ;;  %7204 = vmatprep.subr.msk.bf16.mxu0 %vm9415_vm2, %v7202_v27  ;;  %v7217_v28 = vpack.c.bf16 %v7623_v6, %v7622_v38 }
 0x31b   : > { %3498 = vrot.lane.b32.xlu1 %v9499_v19, %s8641_s25 }
 0x31c   : > { %7207 = vmatpush3.bf16.xpose.msk.msra.mxu0 %vm9415_vm2, %v7205_v3 }
 0x31d   : > { %v7656_v15 = vpop.permute.xlu1 %7655 }
 0x31e   : > { %v7676_v32 = vpop.permute.xlu0 %7675  ;;  %v7658_v30 = vunpack.i.h.bf16 %v7656_v15  ;;  %v7657_v48 = vunpack.i.l.bf16 %v7656_v15 }
 0x31f   : > { %7825 = vrot.lane.b32.xlu1 %v9419_v21, %s8638_s13  ;;  %v7677_v51 = vunpack.i.l.bf16 %v7676_v32 }
 0x320   : > { %v7208_v56 = vpack.c.bf16 %v7658_v30, %v7657_v48  ;;  %v7628_v48 = vunpack.i.h.bf16 %v9723_v26 }
 0x321   : > { %v9825_v4 = vpop.permute.xlu1 %2448 }
 0x322   : > { %v7691_v1 = vpop.permute.xlu0 %7690  ;;  %7210 = vmatprep.subr.msk.bf16.mxu0 %vm9415_vm2, %v7208_v56  ;;  %v7627_v56 = vunpack.i.l.bf16 %v9723_v26  ;;  %v7632_v26 = vunpack.i.l.bf16 %v9733_v20 }
 0x323   : > { %3500 = vrot.lane.b32.xlu1 %v9600_v24, %s8641_s25 }
 0x324   : > { %7213 = vmatpush3.bf16.xpose.msk.msra.mxu0 %vm9415_vm2, %v7211_v31  ;;  %v7223_v6 = vpack.c.bf16 %v7628_v48, %v7627_v56 }
 0x325   : > { %v7661_v34 = vpop.permute.xlu1 %7660 }
 0x326   : > { %v9835_v41 = vpop.permute.xlu0 %7700  ;;  %v7663_v27 = vunpack.i.h.bf16 %v7661_v34  ;;  %v7662_v3 = vunpack.i.l.bf16 %v7661_v34 }
 0x327   : > { %7840 = vrot.lane.b32.xlu1 %v9545_v36, %s8641_s25 }
 0x328   : > { %v7214_v15 = vpack.c.bf16 %v7663_v27, %v7662_v3 }
 0x329   : > { %v9839_v52 = vpop.permute.xlu1 %2452 }
 0x32a   : > { %v9841_v30 = vpop.permute.xlu0 %7705  ;;  %7216 = vmatprep.subr.msk.bf16.mxu0 %vm9415_vm2, %v7214_v15 }
 0x32c   : > { %7219 = vmatpush3.bf16.xpose.msk.msra.mxu0 %vm9415_vm2, %v7217_v28  ;;  %v7633_v28 = vunpack.i.h.bf16 %v9733_v20 }
 0x32d   : > { %v7666_v8 = vpop.permute.xlu1 %7665 }
 0x32e   : > { %v9849_v31 = vpop.permute.xlu0 %7710  ;;  %v7668_v34 = vunpack.i.h.bf16 %v7666_v8  ;;  %v7667_v27 = vunpack.i.l.bf16 %v7666_v8  ;;  %v7229_v13 = vpack.c.bf16 %v7633_v28, %v7632_v26 }
 0x330   : > { %v7220_v3 = vpack.c.bf16 %v7668_v34, %v7667_v27  ;;  %v7678_v27 = vunpack.i.h.bf16 %v7676_v32 }
 0x331   : > { %v9851_v24 = vpop.permute.xlu1 %2456 }
 0x332   : > { %v9853_v38 = vpop.permute.xlu0 %7720  ;;  %7222 = vmatprep.subr.msk.bf16.mxu0 %vm9415_vm2, %v7220_v3  ;;  %v7232_v3 = vpack.c.bf16 %v7678_v27, %v7677_v51 }
 0x334   : > { %7225 = vmatpush3.bf16.xpose.msk.msra.mxu0 %vm9415_vm2, %v7223_v6 }
 0x335   : > { %v7671_v15 = vpop.permute.xlu1 %7670 }
 0x336   : > { %v9861_v22 = vpop.permute.xlu0 %7725  ;;  %v7673_v8 = vunpack.i.h.bf16 %v7671_v15  ;;  %v7672_v34 = vunpack.i.l.bf16 %v7671_v15 }
 0x338   : > { %v7226_v48 = vpack.c.bf16 %v7673_v8, %v7672_v34  ;;  %v7693_v8 = vunpack.i.h.bf16 %v7691_v1  ;;  %v7692_v34 = vunpack.i.l.bf16 %v7691_v1 }
 0x339   : > { %v9863_v56 = vpop.permute.xlu1 %2460 }
 0x33a   : > { %v9865_v62 = vpop.permute.xlu0 %7730  ;;  %7228 = vmatprep.subr.msk.bf16.mxu0 %vm9415_vm2, %v7226_v48  ;;  %v7238_v51 = vpack.c.bf16 %v7693_v8, %v7692_v34  ;;  %v7703_v48 = vunpack.i.h.bf16 %v9835_v41  ;;  %v7712_v8 = vunpack.i.l.bf16 %v9849_v31 }
 0x33c   : > { %7231 = vmatpush3.bf16.xpose.msk.msra.mxu0 %vm9415_vm2, %v7229_v13 }
 0x33d   : > { %7233 = vmatprep.subr.bf16.mxu0 %v7232_v3  ;;  %v7681_v20 = vpop.permute.xlu1 %7680 }
 0x33e   : > { %v9871_v6 = vpop.permute.xlu0 %7740  ;;  %v7683_v15 = vunpack.i.h.bf16 %v7681_v20  ;;  %v7682_v53 = vunpack.i.l.bf16 %v7681_v20 }
 0x340   : > { %v7234_v32 = vpack.c.bf16 %v7683_v15, %v7682_v53  ;;  %v7702_v53 = vunpack.i.l.bf16 %v9835_v41  ;;  %v7713_v41 = vunpack.i.h.bf16 %v9849_v31  ;;  %v7722_v31 = vunpack.i.l.bf16 %v9853_v38 }
 0x341   : > { %v7686_v5 = vpop.permute.xlu1 %7685 }
 0x342   : > { %v9873_v28 = vpop.permute.xlu0 %7745  ;;  %v7688_v26 = vunpack.i.h.bf16 %v7686_v5  ;;  %v7687_v47 = vunpack.i.l.bf16 %v7686_v5  ;;  %v7708_v5 = vunpack.i.h.bf16 %v9841_v30 }
 0x343   : > { %6374 = vmatmul.mubr.msk.f32.vlgmr.msra.gmra.mrb[64].mxu0 %vm1435_vm1, %v9753_v2  ;;  %v7707_v2 = vunpack.i.l.bf16 %v9841_v30 }
 0x344   : > { %6375 = vmatprep.mubr.msk.f32.mxu0 %vm1435_vm1, %v9743_v9  ;;  %7235 = vmatpush3.bf16.msra.mxu0 %v7234_v32  ;;  %v7236_v13 = vpack.c.bf16 %v7688_v26, %v7687_v47  ;;  %v7242_v32 = vpack.c.bf16 %v7703_v48, %v7702_v53  ;;  %v7728_v53 = vunpack.i.h.bf16 %v9861_v22 }
 0x345   : > { %v7696_v27 = vpop.permute.xlu1 %7695 }
 0x346   : > { %v9881_v1 = vpop.permute.xlu0 %7760  ;;  %v7698_v3 = vunpack.i.h.bf16 %v7696_v27  ;;  %v7697_v20 = vunpack.i.l.bf16 %v7696_v27  ;;  %7237 = vmatprep.subr.bf16.mxu0 %v7236_v13  ;;  %v7723_v27 = vunpack.i.h.bf16 %v9853_v38  ;;  %v7733_v38 = vunpack.i.h.bf16 %v9865_v62 }
 0x347   : > { %6376 = vmatmul.mubr.msk.f32.gmra.mrb[66].mxu0 %vm1435_vm1, %v9743_v9  ;;  %v7244_v9 = vpack.c.bf16 %v7708_v5, %v7707_v2  ;;  %v7732_v2 = vunpack.i.l.bf16 %v9865_v62  ;;  %v7742_v62 = vunpack.i.l.bf16 %v9871_v6 }
 0x348   : > { %6377 = vmatprep.mubr.msk.f32.mxu0 %vm1435_vm1, %v9779_v63  ;;  %7239 = vmatpush3.bf16.msra.mxu0 %v7238_v51  ;;  %v7240_v47 = vpack.c.bf16 %v7698_v3, %v7697_v20  ;;  %v7246_v51 = vpack.c.bf16 %v7713_v41, %v7712_v8  ;;  %v7727_v3 = vunpack.i.l.bf16 %v9861_v22  ;;  %v7250_v5 = vpack.c.bf16 %v7723_v27, %v7722_v31 }
 0x349   : > { %v7716_v15 = vpop.permute.xlu1 %7715  ;;  %v7254_v41 = vpack.c.bf16 %v7733_v38, %v7732_v2  ;;  %v7743_v8 = vunpack.i.h.bf16 %v9871_v6  ;;  %v7747_v38 = vunpack.i.l.bf16 %v9873_v28 }
 0x34a   : > { %v9891_v34 = vpop.permute.xlu0 %7765  ;;  %7241 = vmatprep.subr.bf16.mxu0 %v7240_v47  ;;  %v7718_v26 = vunpack.i.h.bf16 %v7716_v15  ;;  %v7717_v13 = vunpack.i.l.bf16 %v7716_v15 }
 0x34b   : > { %6378 = vmatmul.mubr.msk.f32.gmra.mrb[68].mxu0 %vm1435_vm1, %v9779_v63 }
 0x34c   : > { %6379 = vmatprep.mubr.msk.f32.mxu0 %vm1435_vm1, %v9755_v40  ;;  %7243 = vmatpush3.bf16.msra.mxu0 %v7242_v32  ;;  %v7248_v63 = vpack.c.bf16 %v7718_v26, %v7717_v13 }
 0x34d   : > { %7245 = vmatprep.subr.bf16.mxu0 %v7244_v9  ;;  %v7736_v30 = vpop.permute.xlu1 %7735  ;;  %v7258_v9 = vpack.c.bf16 %v7743_v8, %v7742_v62 }
 0x34e   : > { %v9899_v48 = vpop.permute.xlu0 %7780  ;;  %v7738_v15 = vunpack.i.h.bf16 %v7736_v30  ;;  %v7737_v22 = vunpack.i.l.bf16 %v7736_v30 }
 0x34f   : > { %6380 = vmatmul.mubr.msk.f32.gmra.mrb[70].mxu0 %vm1435_vm1, %v9755_v40  ;;  %v7252_v40 = vpack.c.bf16 %v7728_v53, %v7727_v3 }
 0x350   : > { %6381 = vmatprep.mubr.msk.f32.mxu0 %vm1435_vm1, %v9795_v58  ;;  %7247 = vmatpush3.bf16.msra.mxu0 %v7246_v51  ;;  %v7256_v13 = vpack.c.bf16 %v7738_v15, %v7737_v22 }
 0x351   : > { %7249 = vmatprep.subr.bf16.mxu0 %v7248_v63  ;;  %v9907_v20 = vpop.permute.xlu1 %7750 }
 0x352   : > { %v9911_v47 = vpop.permute.xlu0 %7785  ;;  %v7752_v15 = vunpack.i.l.bf16 %v9907_v20 }
 0x353   : > { %12097 = vst [vmem:[#allocation39_spill] sm:$0xff] %v9911_v47  ;;  %6382 = vmatmul.mubr.msk.f32.gmra.mrb[72].mxu0 %vm1435_vm1, %v9795_v58 }
 0x354   : > { %6383 = vmatprep.mubr.msk.f32.mxu0 %vm1435_vm1, %v9771_v54  ;;  %7251 = vmatpush3.bf16.msra.mxu0 %v7250_v5  ;;  %v7748_v5 = vunpack.i.h.bf16 %v9873_v28 }
 0x355   : > { %7253 = vmatprep.subr.bf16.mxu0 %v7252_v40  ;;  %v9917_v32 = vpop.permute.xlu1 %7755 }
 0x356   : > { %v9921_v26 = vpop.permute.xlu0 %7795  ;;  %v7262_v8 = vpack.c.bf16 %v7748_v5, %v7747_v38 }
 0x357   : > { %12098 = vst [vmem:[#allocation40_spill] sm:$0xff] %v9921_v26  ;;  %6384 = vmatmul.mubr.msk.f32.gmra.mrb[74].mxu0 %vm1435_vm1, %v9771_v54 }
 0x358   : > { %6385 = vmatprep.mubr.msk.f32.mxu0 %vm1435_vm1, %v9811_v23  ;;  %7255 = vmatpush3.bf16.msra.mxu0 %v7254_v41 }
 0x359   : > { %7257 = vmatprep.subr.bf16.mxu0 %v7256_v13  ;;  %v9927_v58 = vpop.permute.xlu1 %7770 }
 0x35a   : > { %v9929_v30 = vpop.permute.xlu0 %7805 }
 0x35b   : > { %12099 = vst [vmem:[#allocation41_spill] sm:$0xff] %v9929_v30  ;;  %6386 = vmatmul.mubr.msk.f32.gmra.mrb[76].mxu0 %vm1435_vm1, %v9811_v23 }
 0x35c   : > { %6387 = vmatprep.mubr.msk.f32.mxu0 %vm1435_vm1, %v9781_v17  ;;  %7259 = vmatpush3.bf16.msra.mxu0 %v7258_v9 }
 0x35d   : > { %v9935_v6 = vpop.permute.xlu1 %7775 }
 0x35e   : > { %v9937_v54 = vpop.permute.xlu0 %7815 }
 0x35f   : > { %12100 = vst [vmem:[#allocation42_spill] sm:$0xff] %v9937_v54  ;;  %6388 = vmatmul.mubr.msk.f32.gmra.mrb[78].mxu0 %vm1435_vm1, %v9781_v17 }
 0x360   : > { %6389 = vmatprep.mubr.msk.f32.mxu0 %vm1435_vm1, %v9825_v4 }
 0x361   : > { %v9943_v51 = vpop.permute.xlu1 %7790 }
 0x362   : > { %12101 = vst [vmem:[#allocation43_spill] sm:$0xff] %v9943_v51  ;;  %v9945_v27 = vpop.permute.xlu0 %7820 }
 0x363   : > { %12102 = vst [vmem:[#allocation44_spill] sm:$0xff] %v9945_v27  ;;  %6390 = vmatmul.mubr.msk.f32.gmra.mrb[80].mxu0 %vm1435_vm1, %v9825_v4 }
 0x364   : > { %6391 = vmatprep.mubr.msk.f32.mxu0 %vm1435_vm1, %v9791_v7 }
 0x365   : > { %v9951_v23 = vpop.permute.xlu1 %7800 }
 0x366   : > { %12103 = vst [vmem:[#allocation45_spill] sm:$0xff] %v9951_v23  ;;  %v9953_v31 = vpop.permute.xlu0 %3478 }
 0x367   : > { %12104 = vst [vmem:[#allocation46_spill] sm:$0xff] %v9953_v31  ;;  %6392 = vmatmul.mubr.msk.f32.gmra.mrb[82].mxu0 %vm1435_vm1, %v9791_v7 }
 0x368   : > { %6393 = vmatprep.mubr.msk.f32.mxu0 %vm1435_vm1, %v9839_v52 }
 0x369   : > { %v9959_v17 = vpop.permute.xlu1 %7810 }
 0x36a   : > { %12105 = vst [vmem:[#allocation47_spill] sm:$0xff] %v9959_v17  ;;  %v9961_v53 = vpop.permute.xlu0 %3480 }
 0x36b   : > { %12106 = vst [vmem:[#allocation48_spill] sm:$0xff] %v9961_v53  ;;  %6394 = vmatmul.mubr.msk.f32.gmra.mrb[84].mxu0 %vm1435_vm1, %v9839_v52 }
 0x36c   : > { %6395 = vmatprep.mubr.msk.f32.mxu0 %vm1435_vm1, %v9797_v39 }
 0x36d   : > { %v9967_v4 = vpop.permute.xlu1 %3476 }
 0x36e   : > { %12107 = vst [vmem:[#allocation49_spill] sm:$0xff] %v9967_v4  ;;  %v9969_v3 = vpop.permute.xlu0 %3490 }
 0x36f   : > { %12108 = vst [vmem:[#allocation50_spill] sm:$0xff] %v9969_v3  ;;  %6396 = vmatmul.mubr.msk.f32.gmra.mrb[86].mxu0 %vm1435_vm1, %v9797_v39  ;;  %v7753_v39 = vunpack.i.h.bf16 %v9907_v20 }
 0x370   : > { %6397 = vmatprep.mubr.msk.f32.mxu0 %vm1435_vm1, %v9851_v24 }
 0x371   : > { %v9975_v7 = vpop.permute.xlu1 %3482  ;;  %v7264_v62 = vpack.c.bf16 %v7753_v39, %v7752_v15 }
 0x372   : > { %12109 = vst [vmem:[#allocation51_spill] sm:$0xff] %v9975_v7  ;;  %v7831_v63 = vpop.permute.xlu0 %7830 }
 0x373   : > { %6398 = vmatmul.mubr.msk.f32.gmra.mrb[88].mxu0 %vm1435_vm1, %v9851_v24  ;;  %v7833_v9 = vunpack.i.h.bf16 %v7831_v63  ;;  %v7832_v5 = vunpack.i.l.bf16 %v7831_v63 }
 0x374   : > { %6399 = vmatprep.mubr.msk.f32.mxu0 %vm1435_vm1, %v9807_v0 }
 0x375   : > { %v9981_v52 = vpop.permute.xlu1 %3484 }
 0x376   : > { %12110 = vst [vmem:[#allocation52_spill] sm:$0xff] %v9981_v52  ;;  %v7836_v2 = vpop.permute.xlu0 %7835 }
 0x377   : > { %v7838_v22 = vunpack.i.h.bf16 %v7836_v2  ;;  %v7837_v40 = vunpack.i.l.bf16 %v7836_v2  ;;  %6400 = vmatmul.mubr.msk.f32.gmra.mrb[90].mxu0 %vm1435_vm1, %v9807_v0 }
 0x378   : > { %6401 = vmatprep.mubr.msk.f32.mxu0 %vm1435_vm1, %v9863_v56 }
 0x379   : > { %v9991_v24 = vpop.permute.xlu1 %3486  ;;  %v7260_v41 = vpack.c.bf16 %v7838_v22, %v7837_v40  ;;  %v7154_v22 = vpack.c.bf16 %v7833_v9, %v7832_v5 }
 0x37a   : > { %12111 = vst [vmem:[#allocation53_spill] sm:$0xff] %v9991_v24 }
 0x37b   : > { %6402 = vmatmul.mubr.msk.f32.gmra.mrb[92].mxu0 %vm1435_vm1, %v9863_v56  ;;  %7261 = vmatprep.subr.bf16.mxu0 %v7260_v41 }
 0x37c   : > { %6403 = vmatprep.mubr.msk.f32.mxu0 %vm1435_vm1, %v9813_v57  ;;  %7263 = vmatpush3.bf16.msra.mxu0 %v7262_v8 }
 0x37d   : > { %7266 = vmatprep.subr.msk.bf16.mxu0 %vm9415_vm2, %v7264_v62  ;;  %v9999_v0 = vpop.permute.xlu1 %3488 }
 0x37e   : > { %12112 = vst [vmem:[#allocation54_spill] sm:$0xff] %v9999_v0 }
 0x37f   : > { %6404 = vmatmul.mubr.msk.f32.gmra.mrb[94].mxu0 %vm1435_vm1, %v9813_v57 }
 0x381   : > { %v10003_v28 = vpop.permute.xlu1 %3492 }
 0x382   : > { %12113 = vst [vmem:[#allocation55_spill] sm:$0xff] %v10003_v28 }
 0x385   : > { %v10005_v20 = vpop.permute.xlu1 %3494 }
 0x386   : > { %12114 = vst [vmem:[#allocation56_spill] sm:$0xff] %v10005_v20 }
 0x389   : > { %v10007_v13 = vpop.permute.xlu1 %3496 }
 0x38a   : > { %12115 = vst [vmem:[#allocation57_spill] sm:$0xff] %v10007_v13 }
 0x38d   : > { %v10009_v56 = vpop.permute.xlu1 %3498 }
 0x38e   : > { %12116 = vst [vmem:[#allocation58_spill] sm:$0xff] %v10009_v56 }
 0x391   : > { %v7826_v38 = vpop.permute.xlu1 %7825 }
 0x392   : > { %v7828_v2 = vunpack.i.h.bf16 %v7826_v38  ;;  %v7827_v39 = vunpack.i.l.bf16 %v7826_v38 }
 0x394   : > { %v7152_v15 = vpack.c.bf16 %v7828_v2, %v7827_v39 }
 0x395   : > { %v10205_v26 = vpop.permute.xlu1 %3500 }
 0x396   : > { %7153 = vmatprep.subr.bf16.mxu1 %v7152_v15  ;;  %12145 = vst [vmem:[#allocation87_spill] sm:$0xff] %v10205_v26 }
 0x397   : > { %7155 = vmatpush3.bf16.msra.mxu1 %v7154_v22 }
 0x399   : > { %v10209_v30 = vpop.permute.xlu1 %7840 }
 0x39e   : > { %v10011_v40 = vpop.f32.mrb[32].mxu0 }
 0x39f   : > { %v10013_v57 = vpop.f32.mrb[33].mxu0 }
 0x3a0   : > { %v1741_v41 = vmax.f32 %v10011_v40, %v10013_v57 }
 0x3a2   : > { %1742 = vmax.xlane.f32.xlu1 %v1741_v41  ;;  %v10017_v8 = vpop.f32.mrb[34].mxu0 }
 0x3a3   : > { %v10019_v62 = vpop.f32.mrb[35].mxu0 }
 0x3a4   : > { %v1744_v63 = vmax.f32 %v10017_v8, %v10019_v62 }
 0x3a6   : > { %1745 = vmax.xlane.f32.xlu1 %v1744_v63  ;;  %v10023_v38 = vpop.f32.mrb[36].mxu0 }
 0x3a7   : > { %12117 = vst [vmem:[#allocation59_spill] sm:$0xff] %v10023_v38  ;;  %v10025_v9 = vpop.f32.mrb[37].mxu0 }
 0x3a8   : > { %12118 = vst [vmem:[#allocation60_spill] sm:$0xff] %v10025_v9  ;;  %v1747_v5 = vmax.f32 %v10023_v38, %v10025_v9 }
 0x3aa   : > { %1748 = vmax.xlane.f32.xlu0 %v1747_v5  ;;  %v10029_v2 = vpop.f32.mrb[38].mxu0 }
 0x3ab   : > { %12119 = vst [vmem:[#allocation61_spill] sm:$0xff] %v10029_v2  ;;  %v10031_v39 = vpop.f32.mrb[39].mxu0 }
 0x3ac   : > { %12120 = vst [vmem:[#allocation62_spill] sm:$0xff] %v10031_v39  ;;  %v1750_v15 = vmax.f32 %v10029_v2, %v10031_v39 }
 0x3ae   : > { %1751 = vmax.xlane.f32.xlu1 %v1750_v15  ;;  %v10035_v22 = vpop.f32.mrb[40].mxu0 }
 0x3af   : > { %12121 = vst [vmem:[#allocation63_spill] sm:$0xff] %v10035_v22  ;;  %v10037_v41 = vpop.f32.mrb[41].mxu0 }
 0x3b0   : > { %12122 = vst [vmem:[#allocation64_spill] sm:$0xff] %v10037_v41  ;;  %v1753_v63 = vmax.f32 %v10035_v22, %v10037_v41 }
 0x3b2   : > { %1754 = vmax.xlane.f32.xlu1 %v1753_v63  ;;  %v10041_v56 = vpop.f32.mrb[42].mxu0 }
 0x3b3   : > { %12123 = vst [vmem:[#allocation65_spill] sm:$0xff] %v10041_v56  ;;  %v10043_v13 = vpop.f32.mrb[43].mxu0 }
 0x3b4   : > { %12124 = vst [vmem:[#allocation66_spill] sm:$0xff] %v10043_v13  ;;  %v1756_v5 = vmax.f32 %v10041_v56, %v10043_v13 }
 0x3b6   : > { %1757 = vmax.xlane.f32.xlu0 %v1756_v5  ;;  %v10047_v20 = vpop.f32.mrb[44].mxu0 }
 0x3b7   : > { %12125 = vst [vmem:[#allocation67_spill] sm:$0xff] %v10047_v20  ;;  %v10049_v28 = vpop.f32.mrb[45].mxu0 }
 0x3b8   : > { %12126 = vst [vmem:[#allocation68_spill] sm:$0xff] %v10049_v28  ;;  %v1759_v15 = vmax.f32 %v10047_v20, %v10049_v28 }
 0x3ba   : > { %1760 = vmax.xlane.f32.xlu1 %v1759_v15  ;;  %v10053_v3 = vpop.f32.mrb[46].mxu0 }
 0x3bb   : > { %12127 = vst [vmem:[#allocation69_spill] sm:$0xff] %v10053_v3  ;;  %v10055_v19 = vpop.f32.mrb[47].mxu0 }
 0x3bc   : > { %12128 = vst [vmem:[#allocation70_spill] sm:$0xff] %v10055_v19  ;;  %v1762_v63 = vmax.f32 %v10053_v3, %v10055_v19 }
 0x3be   : > { %1763 = vmax.xlane.f32.xlu0 %v1762_v63  ;;  %v10059_v0 = vpop.f32.mrb[48].mxu0 }
 0x3bf   : > { %12129 = vst [vmem:[#allocation71_spill] sm:$0xff] %v10059_v0  ;;  %v10061_v18 = vpop.f32.mrb[49].mxu0 }
 0x3c0   : > { %12130 = vst [vmem:[#allocation72_spill] sm:$0xff] %v10061_v18  ;;  %v1765_v5 = vmax.f32 %v10059_v0, %v10061_v18 }
 0x3c2   : > { %1766 = vmax.xlane.f32.xlu1 %v1765_v5  ;;  %v10065_v24 = vpop.f32.mrb[50].mxu0 }
 0x3c3   : > { %12131 = vst [vmem:[#allocation73_spill] sm:$0xff] %v10065_v24  ;;  %v10067_v11 = vpop.f32.mrb[51].mxu0 }
 0x3c4   : > { %12132 = vst [vmem:[#allocation74_spill] sm:$0xff] %v10067_v11  ;;  %v1768_v15 = vmax.f32 %v10065_v24, %v10067_v11 }
 0x3c6   : > { %1769 = vmax.xlane.f32.xlu0 %v1768_v15  ;;  %v10071_v52 = vpop.f32.mrb[52].mxu0 }
 0x3c7   : > { %12133 = vst [vmem:[#allocation75_spill] sm:$0xff] %v10071_v52  ;;  %v10073_v61 = vpop.f32.mrb[53].mxu0 }
 0x3c8   : > { %12134 = vst [vmem:[#allocation76_spill] sm:$0xff] %v10073_v61  ;;  %v1771_v63 = vmax.f32 %v10071_v52, %v10073_v61 }
 0x3ca   : > { %1772 = vmax.xlane.f32.xlu0 %v1771_v63  ;;  %v10077_v7 = vpop.f32.mrb[54].mxu0 }
 0x3cb   : > { %12135 = vst [vmem:[#allocation77_spill] sm:$0xff] %v10077_v7  ;;  %v10079_v10 = vpop.f32.mrb[55].mxu0 }
 0x3cc   : > { %12136 = vst [vmem:[#allocation78_spill] sm:$0xff] %v10079_v10  ;;  %v1774_v5 = vmax.f32 %v10077_v7, %v10079_v10 }
 0x3ce   : > { %1775 = vmax.xlane.f32.xlu1 %v1774_v5  ;;  %v10083_v53 = vpop.f32.mrb[56].mxu0 }
 0x3cf   : > { %12137 = vst [vmem:[#allocation79_spill] sm:$0xff] %v10083_v53  ;;  %v10085_v31 = vpop.f32.mrb[57].mxu0 }
 0x3d0   : > { %12138 = vst [vmem:[#allocation80_spill] sm:$0xff] %v10085_v31  ;;  %v1777_v15 = vmax.f32 %v10083_v53, %v10085_v31 }
 0x3d2   : > { %1778 = vmax.xlane.f32.xlu0 %v1777_v15  ;;  %v10089_v21 = vpop.f32.mrb[58].mxu0 }
 0x3d3   : > { %12139 = vst [vmem:[#allocation81_spill] sm:$0xff] %v10089_v21  ;;  %v10091_v4 = vpop.f32.mrb[59].mxu0 }
 0x3d4   : > { %12140 = vst [vmem:[#allocation82_spill] sm:$0xff] %v10091_v4  ;;  %v1780_v63 = vmax.f32 %v10089_v21, %v10091_v4 }
 0x3d6   : > { %1781 = vmax.xlane.f32.xlu0 %v1780_v63  ;;  %v10095_v42 = vpop.f32.mrb[60].mxu0 }
 0x3d7   : > { %12141 = vst [vmem:[#allocation83_spill] sm:$0xff] %v10095_v42  ;;  %v10097_v10 = vpop.f32.mrb[61].mxu0 }
 0x3d8   : > { %12142 = vst [vmem:[#allocation84_spill] sm:$0xff] %v10097_v10  ;;  %v1783_v5 = vmax.f32 %v10095_v42, %v10097_v10 }
 0x3da   : > { %1784 = vmax.xlane.f32.xlu0 %v1783_v5  ;;  %v10101_v7 = vpop.f32.mrb[62].mxu0 }
 0x3db   : > { %12143 = vst [vmem:[#allocation85_spill] sm:$0xff] %v10101_v7  ;;  %v10103_v31 = vpop.f32.mrb[63].mxu0 }
 0x3dc   : > { %12144 = vst [vmem:[#allocation86_spill] sm:$0xff] %v10103_v31  ;;  %v1786_v15 = vmax.f32 %v10101_v7, %v10103_v31 }
 0x3de   : > { %1787 = vmax.xlane.f32.xlu0 %v1786_v15 }
 0x416   : > { %v10107_v53 = vpop.f32.mrb[64].mxu0 }
 0x417   : > { %v10109_v4 = vpop.f32.mrb[65].mxu0 }
 0x418   : > { %v2785_v63 = vmax.f32 %v10107_v53, %v10109_v4 }
 0x41a   : > { %2786 = vmax.xlane.f32.xlu1 %v2785_v63  ;;  %v10113_v21 = vpop.f32.mrb[66].mxu0 }
 0x41b   : > { %v10115_v10 = vpop.f32.mrb[67].mxu0 }
 0x41c   : > { %v2788_v5 = vmax.f32 %v10113_v21, %v10115_v10 }
 0x41e   : > { %v10119_v42 = vpop.f32.mrb[68].mxu0  ;;  %2789 = vmax.xlane.f32.xlu0 %v2788_v5 }
 0x41f   : > { %v10121_v61 = vpop.f32.mrb[69].mxu0 }
 0x420   : > { %v2791_v15 = vmax.f32 %v10119_v42, %v10121_v61 }
 0x422   : > { %v10125_v52 = vpop.f32.mrb[70].mxu0  ;;  %2792 = vmax.xlane.f32.xlu0 %v2791_v15 }
 0x423   : > { %v10127_v31 = vpop.f32.mrb[71].mxu0 }
 0x424   : > { %v2794_v63 = vmax.f32 %v10125_v52, %v10127_v31 }
 0x426   : > { %2795 = vmax.xlane.f32.xlu1 %v2794_v63  ;;  %v10131_v7 = vpop.f32.mrb[72].mxu0 }
 0x427   : > { %v10133_v11 = vpop.f32.mrb[73].mxu0 }
 0x428   : > { %v2797_v5 = vmax.f32 %v10131_v7, %v10133_v11 }
 0x42a   : > { %v10137_v24 = vpop.f32.mrb[74].mxu0  ;;  %2798 = vmax.xlane.f32.xlu0 %v2797_v5 }
 0x42b   : > { %v10139_v18 = vpop.f32.mrb[75].mxu0 }
 0x42c   : > { %v2800_v15 = vmax.f32 %v10137_v24, %v10139_v18 }
 0x42e   : > { %2801 = vmax.xlane.f32.xlu1 %v2800_v15  ;;  %v10143_v0 = vpop.f32.mrb[76].mxu0 }
 0x42f   : > { %v10145_v28 = vpop.f32.mrb[77].mxu0 }
 0x430   : > { %v2803_v63 = vmax.f32 %v10143_v0, %v10145_v28 }
 0x432   : > { %v10149_v20 = vpop.f32.mrb[78].mxu0  ;;  %2804 = vmax.xlane.f32.xlu0 %v2803_v63 }
 0x433   : > { %v10151_v19 = vpop.f32.mrb[79].mxu0 }
 0x434   : > { %v2806_v5 = vmax.f32 %v10149_v20, %v10151_v19 }
 0x436   : > { %2807 = vmax.xlane.f32.xlu1 %v2806_v5  ;;  %v10155_v3 = vpop.f32.mrb[80].mxu0 }
 0x437   : > { %v10157_v13 = vpop.f32.mrb[81].mxu0 }
 0x438   : > { %v2809_v15 = vmax.f32 %v10155_v3, %v10157_v13 }
 0x43a   : > { %v10161_v56 = vpop.f32.mrb[82].mxu0  ;;  %2810 = vmax.xlane.f32.xlu0 %v2809_v15 }
 0x43b   : > { %v10163_v37 = vpop.f32.mrb[83].mxu0 }
 0x43c   : > { %v2812_v63 = vmax.f32 %v10161_v56, %v10163_v37 }
 0x43e   : > { %2813 = vmax.xlane.f32.xlu1 %v2812_v63  ;;  %v10167_v14 = vpop.f32.mrb[84].mxu0 }
 0x43f   : > { %v10169_v36 = vpop.f32.mrb[85].mxu0 }
 0x440   : > { %v2815_v5 = vmax.f32 %v10167_v14, %v10169_v36 }
 0x442   : > { %v10173_v55 = vpop.f32.mrb[86].mxu0  ;;  %2816 = vmax.xlane.f32.xlu0 %v2815_v5 }
 0x443   : > { %v10175_v46 = vpop.f32.mrb[87].mxu0 }
 0x444   : > { %v2818_v15 = vmax.f32 %v10173_v55, %v10175_v46 }
 0x446   : > { %v10179_v16 = vpop.f32.mrb[88].mxu0 }
 0x447   : > { %v10181_v27 = vpop.f32.mrb[89].mxu0 }
 0x448   : > { %v2821_v63 = vmax.f32 %v10179_v16, %v10181_v27 }
 0x44a   : > { %v10185_v54 = vpop.f32.mrb[90].mxu0 }
 0x44b   : > { %v10187_v17 = vpop.f32.mrb[91].mxu0 }
 0x44e   : > { %v10191_v5 = vpop.f32.mrb[92].mxu0 }
 0x44f   : > { %7850 = vrot.lane.b32.xlu1 %v9317_v60, %s8638_s13  ;;  %v10195_v41 = vpop.f32.mrb[93].mxu0  ;;  %v1743_v60 = vpop.xlane.xlu1 %1742 }
 0x450   : > { %v2827_v22 = vmax.f32 %v10191_v5, %v10195_v41  ;;  %v1789_v9 = vsub.f32 %v10011_v40, %v1743_v60  ;;  %v1790_v38 = vsub.f32 %v10013_v57, %v1743_v60 }
 0x452   : > { %v10199_v39 = vpop.f32.mrb[94].mxu0  ;;  %v1821_v51 = vmul.f32 1.442695, %v1789_v9  ;;  %v1823_v47 = vmul.f32 1.442695, %v1790_v38 }
 0x453   : > { %v10201_v23 = vpop.f32.mrb[95].mxu0 }
 0x454   : > { %8154 = vpow2.f32 %v1821_v51  ;;  %v1746_v51 = vpop.xlane.xlu1 %1745 }
 0x455   : > { %8156 = vpow2.f32 %v1823_v47 }
 0x458   : > { %7845 = vrot.lane.b32.xlu0 %v9438_v35, %s8638_s13  ;;  %v10219_v35 = vpop.xlane.xlu0 %1748 }
 0x45c   : > { %v10221_v40 = vpop.xlane.xlu0 %1757 }
 0x45d   : > { %12147 = vst [vmem:[#allocation89_spill] sm:$0xff] %v10221_v40 }
 0x45e   : > { %v10213_v33 = vpop.eup %8154 }
 0x45f   : > { %12146 = vst [vmem:[#allocation88_spill] sm:$0xff] %v10213_v33  ;;  %v10215_v2 = vpop.eup %8156 }
 0x460   : > { %v1885_v26 = vadd.f32 %v10215_v2, %v10213_v33  ;;  %v10225_v60 = vpop.xlane.xlu0 %1763 }
 0x461   : > { %12148 = vst [vmem:[#allocation90_spill] sm:$0xff] %v10225_v60 }
 0x464   : > { %v10229_v47 = vpop.xlane.xlu0 %1769 }
 0x465   : > { %12149 = vst [vmem:[#allocation91_spill] sm:$0xff] %v10229_v47 }
 0x468   : > { %v10235_v57 = vpop.xlane.xlu0 %1772 }
 0x469   : > { %12150 = vst [vmem:[#allocation92_spill] sm:$0xff] %v10235_v57 }
 0x46c   : > { %v10237_v38 = vpop.xlane.xlu0 %1778 }
 0x46d   : > { %12151 = vst [vmem:[#allocation93_spill] sm:$0xff] %v10237_v38 }
 0x470   : > { %v10245_v33 = vpop.xlane.xlu0 %1781 }
 0x471   : > { %12153 = vst [vmem:[#allocation95_spill] sm:$0xff] %v10245_v33 }
 0x473   : > { %2819 = vmax.xlane.f32.xlu1 %v2818_v15  ;;  %v1792_v15 = vsub.f32 %v10019_v62, %v1746_v51 }
 0x474   : > { %v10249_v47 = vpop.xlane.xlu0 %1784 }
 0x475   : > { %12155 = vst [vmem:[#allocation97_spill] sm:$0xff] %v10249_v47 }
 0x477   : > { %2822 = vmax.xlane.f32.xlu0 %v2821_v63 }
 0x478   : > { %v10253_v38 = vpop.xlane.xlu0 %1787 }
 0x479   : > { %12157 = vst [vmem:[#allocation99_spill] sm:$0xff] %v10253_v38 }
 0x47b   : > { %1886 = vadd.xlane.f32.xlu0 %v1885_v26  ;;  %v10233_v26 = vpop.xlane.xlu1 %1751 }
 0x47f   : > { %2828 = vmax.xlane.f32.xlu0 %v2827_v22  ;;  %v10239_v9 = vpop.xlane.xlu1 %1754  ;;  %v1791_v22 = vsub.f32 %v10017_v8, %v1746_v51 }
 0x483   : > { %v10243_v63 = vpop.xlane.xlu1 %1760 }
 0x484   : > { %3502 = vrot.lane.b32.xlu1 %v9518_v44, %s8641_s25  ;;  %12152 = vst [vmem:[#allocation94_spill] sm:$0xff] %v10243_v63  ;;  %v1825_v44 = vmul.f32 1.442695, %v1791_v22 }
 0x486   : > { %8158 = vpow2.f32 %v1825_v44 }
 0x488   : > { %7855 = vrot.lane.b32.xlu1 %v9452_v45, %s8638_s13  ;;  %v1827_v45 = vmul.f32 1.442695, %v1792_v15 }
 0x48a   : > { %8160 = vpow2.f32 %v1827_v45 }
 0x48c   : > { %7860 = vrot.lane.b32.xlu1 %v9331_v43, %s8638_s13  ;;  %v10247_v43 = vpop.xlane.xlu1 %1766 }
 0x48d   : > { %12154 = vst [vmem:[#allocation96_spill] sm:$0xff] %v10247_v43 }
 0x490   : > { %v10251_v57 = vpop.xlane.xlu1 %1775  ;;  %v10257_v51 = vpop.eup %8158 }
 0x491   : > { %12156 = vst [vmem:[#allocation98_spill] sm:$0xff] %v10251_v57  ;;  %12158 = vst [vmem:[#allocation100_spill] sm:$0xff] %v10257_v51 }
 0x494   : > { %v10259_v15 = vpop.eup %8160 }
 0x495   : > { %12159 = vst [vmem:[#allocation101_spill] sm:$0xff] %v10259_v15 }
 0x4a7   : > { %v2787_v60 = vpop.xlane.xlu1 %2786 }
 0x4a8   : > { %v2833_v8 = vsub.f32 %v10107_v53, %v2787_v60  ;;  %v2834_v62 = vsub.f32 %v10109_v4, %v2787_v60  ;;  %v1888_v53 = vadd.f32 %v10259_v15, %v10257_v51 }
 0x4aa   : > { %v2865_v33 = vmul.f32 1.442695, %v2833_v8  ;;  %v2867_v22 = vmul.f32 1.442695, %v2834_v62 }
 0x4ab   : > { %v2790_v43 = vpop.xlane.xlu0 %2789 }
 0x4ac   : > { %8162 = vpow2.f32 %v2865_v33  ;;  %v2835_v45 = vsub.f32 %v10113_v21, %v2790_v43  ;;  %v2836_v44 = vsub.f32 %v10115_v10, %v2790_v43  ;;  %v12160_v21 = vmax.f32 %v10185_v54, %v10187_v17 }
 0x4ad   : > { %8164 = vpow2.f32 %v2867_v22 }
 0x4ae   : > { %v2869_v47 = vmul.f32 1.442695, %v2835_v45  ;;  %v2871_v57 = vmul.f32 1.442695, %v2836_v44 }
 0x4af   : > { %v2793_v38 = vpop.xlane.xlu0 %2792 }
 0x4b0   : > { %8166 = vpow2.f32 %v2869_v47  ;;  %v2837_v4 = vsub.f32 %v10119_v42, %v2793_v38  ;;  %v2838_v60 = vsub.f32 %v10121_v61, %v2793_v38  ;;  %1889 = vadd.xlane.f32.xlu1 %v1888_v53 }
 0x4b1   : > { %8168 = vpow2.f32 %v2871_v57 }
 0x4b2   : > { %v2873_v8 = vmul.f32 1.442695, %v2837_v4  ;;  %v2875_v33 = vmul.f32 1.442695, %v2838_v60 }
 0x4b3   : > { %v2796_v62 = vpop.xlane.xlu1 %2795 }
 0x4b4   : > { %8170 = vpow2.f32 %v2873_v8  ;;  %v2839_v10 = vsub.f32 %v10125_v52, %v2796_v62  ;;  %v2840_v43 = vsub.f32 %v10127_v31, %v2796_v62  ;;  %2825 = vmax.xlane.f32.xlu1 %v12160_v21  ;;  %v12161_v31 = vmax.f32 %v10199_v39, %v10201_v23 }
 0x4b5   : > { %8172 = vpow2.f32 %v2875_v33 }
 0x4b6   : > { %v10272_v47 = vpop.eup %8162  ;;  %v2877_v42 = vmul.f32 1.442695, %v2839_v10  ;;  %v2879_v22 = vmul.f32 1.442695, %v2840_v43 }
 0x4b7   : > { %v10274_v61 = vpop.eup %8164  ;;  %v2799_v57 = vpop.xlane.xlu0 %2798 }
 0x4b8   : > { %8174 = vpow2.f32 %v2877_v42  ;;  %v2841_v38 = vsub.f32 %v10131_v7, %v2799_v57  ;;  %v2842_v45 = vsub.f32 %v10133_v11, %v2799_v57  ;;  %2831 = vmax.xlane.f32.xlu1 %v12161_v31  ;;  %v2929_v4 = vadd.f32 %v10274_v61, %v10272_v47 }
 0x4b9   : > { %8176 = vpow2.f32 %v2879_v22 }
 0x4ba   : > { %v10281_v52 = vpop.eup %8166  ;;  %v2881_v44 = vmul.f32 1.442695, %v2841_v38  ;;  %v2883_v53 = vmul.f32 1.442695, %v2842_v45 }
 0x4bb   : > { %v10285_v60 = vpop.eup %8168  ;;  %v2802_v8 = vpop.xlane.xlu1 %2801 }
 0x4bc   : > { %8178 = vpow2.f32 %v2881_v44  ;;  %v2843_v7 = vsub.f32 %v10137_v24, %v2802_v8  ;;  %v2844_v11 = vsub.f32 %v10139_v18, %v2802_v8  ;;  %2930 = vadd.xlane.f32.xlu1 %v2929_v4  ;;  %v2932_v33 = vadd.f32 %v10285_v60, %v10281_v52 }
 0x4bd   : > { %8180 = vpow2.f32 %v2883_v53 }
 0x4be   : > { %v10291_v62 = vpop.eup %8170  ;;  %v2885_v10 = vmul.f32 1.442695, %v2843_v7  ;;  %v2887_v43 = vmul.f32 1.442695, %v2844_v11  ;;  %2933 = vadd.xlane.f32.xlu0 %v2932_v33 }
 0x4bf   : > { %v10293_v21 = vpop.eup %8172  ;;  %v2805_v42 = vpop.xlane.xlu0 %2804 }
 0x4c0   : > { %8182 = vpow2.f32 %v2885_v10  ;;  %v2845_v22 = vsub.f32 %v10143_v0, %v2805_v42  ;;  %v2846_v24 = vsub.f32 %v10145_v28, %v2805_v42  ;;  %v2935_v18 = vadd.f32 %v10293_v21, %v10291_v62 }
 0x4c1   : > { %8184 = vpow2.f32 %v2887_v43 }
 0x4c2   : > { %v10299_v57 = vpop.eup %8174  ;;  %v2889_v38 = vmul.f32 1.442695, %v2845_v22  ;;  %v2891_v45 = vmul.f32 1.442695, %v2846_v24  ;;  %2936 = vadd.xlane.f32.xlu1 %v2935_v18 }
 0x4c3   : > { %v10301_v31 = vpop.eup %8176  ;;  %v2808_v44 = vpop.xlane.xlu1 %2807 }
 0x4c4   : > { %8186 = vpow2.f32 %v2889_v38  ;;  %v2847_v53 = vsub.f32 %v10149_v20, %v2808_v44  ;;  %v2848_v4 = vsub.f32 %v10151_v19, %v2808_v44  ;;  %v2938_v0 = vadd.f32 %v10301_v31, %v10299_v57 }
 0x4c5   : > { %8188 = vpow2.f32 %v2891_v45 }
 0x4c6   : > { %v10307_v28 = vpop.eup %8178  ;;  %v2893_v8 = vmul.f32 1.442695, %v2847_v53  ;;  %v2895_v7 = vmul.f32 1.442695, %v2848_v4  ;;  %2939 = vadd.xlane.f32.xlu0 %v2938_v0 }
 0x4c7   : > { %v10309_v11 = vpop.eup %8180  ;;  %v2811_v20 = vpop.xlane.xlu0 %2810 }
 0x4c8   : > { %8190 = vpow2.f32 %v2893_v8  ;;  %v2941_v33 = vadd.f32 %v10309_v11, %v10307_v28 }
 0x4c9   : > { %8192 = vpow2.f32 %v2895_v7 }
 0x4ca   : > { %v10313_v10 = vpop.eup %8182  ;;  %2942 = vadd.xlane.f32.xlu1 %v2941_v33 }
 0x4cb   : > { %v10315_v19 = vpop.eup %8184  ;;  %v2814_v43 = vpop.xlane.xlu1 %2813 }
 0x4cc   : > { %v2944_v42 = vadd.f32 %v10315_v19, %v10313_v10  ;;  %v2852_v63 = vsub.f32 %v10163_v37, %v2814_v43 }
 0x4ce   : > { %v10319_v22 = vpop.eup %8186  ;;  %2945 = vadd.xlane.f32.xlu0 %v2944_v42 }
 0x4cf   : > { %v10321_v24 = vpop.eup %8188  ;;  %v2817_v18 = vpop.xlane.xlu0 %2816 }
 0x4d0   : > { %v7851_v38 = vpop.permute.xlu1 %7850  ;;  %v2947_v45 = vadd.f32 %v10321_v24, %v10319_v22 }
 0x4d1   : > { %v7853_v4 = vunpack.i.h.bf16 %v7851_v38  ;;  %v7852_v0 = vunpack.i.l.bf16 %v7851_v38  ;;  %v2849_v38 = vsub.f32 %v10155_v3, %v2811_v20 }
 0x4d2   : > { %v10325_v44 = vpop.eup %8190  ;;  %2948 = vadd.xlane.f32.xlu1 %v2947_v45  ;;  %v2850_v45 = vsub.f32 %v10157_v13, %v2811_v20 }
 0x4d3   : > { %v10327_v53 = vpop.eup %8192  ;;  %v7846_v8 = vpop.permute.xlu0 %7845  ;;  %v7158_v15 = vpack.c.bf16 %v7853_v4, %v7852_v0  ;;  %v2897_v40 = vmul.f32 1.442695, %v2849_v38  ;;  %v2903_v0 = vmul.f32 1.442695, %v2852_v63 }
 0x4d4   : > { %v7848_v7 = vunpack.i.h.bf16 %v7846_v8  ;;  %v7847_v33 = vunpack.i.l.bf16 %v7846_v8  ;;  %v2950_v42 = vadd.f32 %v10327_v53, %v10325_v44  ;;  %v2851_v8 = vsub.f32 %v10161_v56, %v2814_v43 }
 0x4d5   : > { %v2899_v4 = vmul.f32 1.442695, %v2850_v45  ;;  %8194 = vpow2.f32 %v2897_v40 }
 0x4d6   : > { %2951 = vadd.xlane.f32.xlu0 %v2950_v42  ;;  %v7156_v51 = vpack.c.bf16 %v7848_v7, %v7847_v33  ;;  %v2853_v7 = vsub.f32 %v10167_v14, %v2817_v18 }
 0x4d7   : > { %8196 = vpow2.f32 %v2899_v4 }
 0x4d8   : > { %7157 = vmatprep.subr.bf16.mxu1 %v7156_v51  ;;  %v2854_v51 = vsub.f32 %v10169_v36, %v2817_v18  ;;  %v2905_v33 = vmul.f32 1.442695, %v2853_v7 }
 0x4d9   : > { %7159 = vmatpush3.bf16.msra.mxu1 %v7158_v15  ;;  %v2901_v15 = vmul.f32 1.442695, %v2851_v8 }
 0x4da   : > { %v2907_v42 = vmul.f32 1.442695, %v2854_v51 }
 0x4db   : > { %8198 = vpow2.f32 %v2901_v15 }
 0x4dc   : > { %8200 = vpow2.f32 %v2903_v0 }
 0x4dd   : > { %8202 = vpow2.f32 %v2905_v33 }
 0x4de   : > { %8204 = vpow2.f32 %v2907_v42 }
 0x4df   : > { %v10343_v56 = vpop.eup %8194 }
 0x4e1   : > { %v10345_v14 = vpop.eup %8196 }
 0x4e3   : > { %7865 = vrot.lane.b32.xlu1 %v9475_v12, %s8638_s13 }
 0x4e5   : > { %v10347_v63 = vpop.eup %8198 }
 0x4e6   : > { %v10351_v18 = vpop.eup %8200 }
 0x4e7   : > { %v10355_v45 = vpop.eup %8202 }
 0x4e8   : > { %v10359_v8 = vpop.eup %8204 }
 0x4ec   : > { %3504 = vrot.lane.b32.xlu0 %v9619_v29, %s8641_s25 }
 0x500   : > { %v2820_v3 = vpop.xlane.xlu1 %2819 }
 0x501   : > { %v2855_v13 = vsub.f32 %v10173_v55, %v2820_v3  ;;  %v2856_v37 = vsub.f32 %v10175_v46, %v2820_v3  ;;  %v2953_v46 = vadd.f32 %v10345_v14, %v10343_v56 }
 0x503   : > { %v2909_v36 = vmul.f32 1.442695, %v2855_v13  ;;  %v2911_v20 = vmul.f32 1.442695, %v2856_v37 }
 0x504   : > { %v10349_v40 = vpop.permute.xlu1 %3502  ;;  %v2823_v43 = vpop.xlane.xlu0 %2822 }
 0x505   : > { %8206 = vpow2.f32 %v2909_v36  ;;  %v2857_v38 = vsub.f32 %v10179_v16, %v2823_v43  ;;  %v2858_v55 = vsub.f32 %v10181_v27, %v2823_v43  ;;  %v2956_v16 = vadd.f32 %v10351_v18, %v10347_v63 }
 0x506   : > { %8208 = vpow2.f32 %v2911_v20  ;;  %v2959_v27 = vadd.f32 %v10359_v8, %v10355_v45 }
 0x507   : > { %v2913_v7 = vmul.f32 1.442695, %v2857_v38  ;;  %v2915_v4 = vmul.f32 1.442695, %v2858_v55  ;;  %2954 = vadd.xlane.f32.xlu1 %v2953_v46 }
 0x508   : > { %v7856_v51 = vpop.permute.xlu1 %7855  ;;  %v1887_v15 = vpop.xlane.xlu0 %1886 }
 0x509   : > { %8210 = vpow2.f32 %v2913_v7  ;;  %v7858_v0 = vunpack.i.h.bf16 %v7856_v51  ;;  %v7857_v33 = vunpack.i.l.bf16 %v7856_v51 }
 0x50a   : > { %8212 = vpow2.f32 %v2915_v4 }
 0x50b   : > { %8214 = vrcp.f32 %v1887_v15  ;;  %2957 = vadd.xlane.f32.xlu0 %v2956_v16  ;;  %v7160_v42 = vpack.c.bf16 %v7858_v0, %v7857_v33  ;;  %2960 = vadd.xlane.f32.xlu1 %v2959_v27 }
 0x50c   : > { %v7861_v3 = vpop.permute.xlu1 %7860  ;;  %v2829_v15 = vpop.xlane.xlu0 %2828 }
 0x50d   : > { %v7863_v13 = vunpack.i.h.bf16 %v7861_v3  ;;  %v7862_v37 = vunpack.i.l.bf16 %v7861_v3  ;;  %7161 = vmatprep.subr.bf16.mxu1 %v7160_v42  ;;  %v2861_v0 = vsub.f32 %v10191_v5, %v2829_v15  ;;  %v2862_v33 = vsub.f32 %v10195_v41, %v2829_v15 }
 0x50f   : > { %v10365_v36 = vpop.eup %8206  ;;  %v7162_v20 = vpack.c.bf16 %v7863_v13, %v7862_v37  ;;  %v2921_v16 = vmul.f32 1.442695, %v2861_v0  ;;  %v2923_v27 = vmul.f32 1.442695, %v2862_v33 }
 0x510   : > { %v10367_v43 = vpop.eup %8208 }
 0x511   : > { %7163 = vmatpush3.bf16.msra.mxu1 %v7162_v20  ;;  %v2962_v38 = vadd.f32 %v10367_v43, %v10365_v36  ;;  %8216 = vpow2.f32 %v2921_v16 }
 0x512   : > { %8218 = vpow2.f32 %v2923_v27 }
 0x513   : > { %v10371_v55 = vpop.eup %8210  ;;  %2963 = vadd.xlane.f32.xlu0 %v2962_v38 }
 0x514   : > { %v10373_v46 = vpop.eup %8212 }
 0x515   : > { %v10375_v7 = vpop.eup %8214  ;;  %v2965_v4 = vadd.f32 %v10373_v46, %v10371_v55 }
 0x516   : > { %v1935_v51 = vmul.f32 %v10375_v7, %v10215_v2 }
 0x517   : > { %2966 = vadd.xlane.f32.xlu1 %v2965_v4 }
 0x518   : > { %2141 = vmatprep.mubr.f32.mxu1 %v1935_v51 }
 0x51b   : > { %v10393_v0 = vpop.eup %8216 }
 0x51c   : > { %v10395_v33 = vpop.eup %8218 }
 0x528   : > { %3506 = vrot.lane.b32.xlu1 %v9534_v25, %s8641_s25  ;;  %s11826_s25 = scalar_lea.hbm %s11883_s8, %s6023_s22 }
 0x52c   : > { %7875 = vrot.lane.b32.xlu1 %v9487_v59, %s8638_s13 }
 0x53d   : > { %v10387_v42 = vpop.xlane.xlu1 %1889 }
 0x541   : > { %v2826_v2 = vpop.xlane.xlu1 %2825 }
 0x542   : > { %v2859_v3 = vsub.f32 %v10185_v54, %v2826_v2  ;;  %v2860_v13 = vsub.f32 %v10187_v17, %v2826_v2  ;;  %v2971_v17 = vadd.f32 %v10395_v33, %v10393_v0 }
 0x544   : > { %v2917_v37 = vmul.f32 1.442695, %v2859_v3  ;;  %v2919_v20 = vmul.f32 1.442695, %v2860_v13 }
 0x545   : > { %v2832_v38 = vpop.xlane.xlu1 %2831 }
 0x546   : > { %8220 = vpow2.f32 %v2917_v37  ;;  %v2863_v4 = vsub.f32 %v10199_v39, %v2832_v38  ;;  %v2864_v5 = vsub.f32 %v10201_v23, %v2832_v38  ;;  %v7758_v37 = vunpack.i.h.bf16 %v9917_v32 }
 0x547   : > { %8222 = vpow2.f32 %v2919_v20  ;;  %v7757_v20 = vunpack.i.l.bf16 %v9917_v32 }
 0x548   : > { %v2925_v41 = vmul.f32 1.442695, %v2863_v4  ;;  %v2927_v51 = vmul.f32 1.442695, %v2864_v5  ;;  %v7763_v4 = vunpack.i.h.bf16 %v9881_v1  ;;  %v7762_v5 = vunpack.i.l.bf16 %v9881_v1 }
 0x549   : > { %v2931_v15 = vpop.xlane.xlu1 %2930 }
 0x54a   : > { %8224 = vpow2.f32 %v2925_v41 }
 0x54b   : > { %8226 = vpow2.f32 %v2927_v51  ;;  %v2934_v54 = vpop.xlane.xlu0 %2933 }
 0x54c   : > { %8228 = vrcp.f32 %v2931_v15 }
 0x54d   : > { %8230 = vrcp.f32 %v2934_v54 }
 0x54f   : > { %v2937_v16 = vpop.xlane.xlu1 %2936 }
 0x550   : > { %v10399_v39 = vpop.eup %8220  ;;  %8232 = vrcp.f32 %v2937_v16  ;;  %2972 = vadd.xlane.f32.xlu1 %v2971_v17 }
 0x551   : > { %v10401_v23 = vpop.eup %8222 }
 0x552   : > { %v2968_v27 = vadd.f32 %v10401_v23, %v10399_v39 }
 0x553   : > { %v2940_v2 = vpop.xlane.xlu0 %2939 }
 0x554   : > { %v10405_v3 = vpop.eup %8224  ;;  %8234 = vrcp.f32 %v2940_v2  ;;  %2969 = vadd.xlane.f32.xlu0 %v2968_v27  ;;  %v7267_v27 = vpack.c.bf16 %v7758_v37, %v7757_v20  ;;  %v7270_v2 = vpack.c.bf16 %v7763_v4, %v7762_v5  ;;  %v7773_v20 = vunpack.i.h.bf16 %v9927_v58 }
 0x555   : > { %v10407_v13 = vpop.eup %8226 }
 0x556   : > { %v8229_v38 = vpop.eup %8228  ;;  %v2974_v41 = vadd.f32 %v10407_v13, %v10405_v3 }
 0x557   : > { %v8231_v51 = vpop.eup %8230  ;;  %v2943_v15 = vpop.xlane.xlu1 %2942  ;;  %v2979_v54 = vmul.f32 %v8229_v38, %v10274_v61  ;;  %v2978_v17 = vmul.f32 %v8229_v38, %v10272_v47  ;;  %v7768_v61 = vunpack.i.h.bf16 %v9891_v34  ;;  %v7772_v38 = vunpack.i.l.bf16 %v9927_v58 }
 0x558   : > { %8236 = vrcp.f32 %v2943_v15  ;;  %2975 = vadd.xlane.f32.xlu1 %v2974_v41  ;;  %v2982_v16 = vmul.f32 %v8231_v51, %v10285_v60  ;;  %v2981_v47 = vmul.f32 %v8231_v51, %v10281_v52  ;;  %v7767_v60 = vunpack.i.l.bf16 %v9891_v34 }
 0x559   : > { %3185 = vmatprep.mubr.f32.mxu0 %v2979_v54  ;;  %v7276_v52 = vpack.c.bf16 %v7773_v20, %v7772_v38  ;;  %v12164_v38 = vld [vmem:[#allocation43_spill] sm:$0xff] }
 0x55a   : > { %v8233_v32 = vpop.eup %8232  ;;  %3186 = vmatmul.mubr.f32.vlgmr.msra.gmra.mrb[96].mxu0 %v2978_v17  ;;  %v7273_v41 = vpack.c.bf16 %v7768_v61, %v7767_v60 }
 0x55b   : > { %7269 = vmatpush3.bf16.xpose.msk.msra.mxu0 %vm9415_vm2, %v7267_v27  ;;  %3190 = vmatprep.mubr.f32.mxu0 %v2982_v16  ;;  %v2946_v1 = vpop.xlane.xlu0 %2945  ;;  %v2985_v29 = vmul.f32 %v8233_v32, %v10293_v21  ;;  %v2984_v5 = vmul.f32 %v8233_v32, %v10291_v62  ;;  %v7778_v62 = vunpack.i.h.bf16 %v9935_v6  ;;  %v7783_v27 = vunpack.i.h.bf16 %v9899_v48 }
 0x55c   : > { %7272 = vmatprep.subr.msk.bf16.mxu0 %vm9415_vm2, %v7270_v2  ;;  %8238 = vrcp.f32 %v2946_v1  ;;  %v7782_v32 = vunpack.i.l.bf16 %v9899_v48 }
 0x55e   : > { %v8235_v37 = vpop.eup %8234  ;;  %3191 = vmatmul.mubr.f32.gmra.mrb[98].mxu0 %v2981_v47 }
 0x55f   : > { %3195 = vmatprep.mubr.f32.mxu0 %v2985_v29  ;;  %v2988_v4 = vmul.f32 %v8235_v37, %v10301_v31  ;;  %v2949_v21 = vpop.xlane.xlu1 %2948  ;;  %v2987_v58 = vmul.f32 %v8235_v37, %v10299_v57  ;;  %v7777_v31 = vunpack.i.l.bf16 %v9935_v6  ;;  %v7282_v6 = vpack.c.bf16 %v7783_v27, %v7782_v32  ;;  %v12162_v57 = vld [vmem:[#allocation12_spill] sm:$0xff]  ;;  %v12170_v32 = vld [vmem:[#allocation62_spill] sm:$0xff] }
 0x560   : > { %8240 = vrcp.f32 %v2949_v21  ;;  %v7792_v21 = vunpack.i.l.bf16 %v12164_v38 }
 0x561   : > { %v7279_v47 = vpack.c.bf16 %v7778_v62, %v7777_v31  ;;  %v12168_v31 = vld [vmem:[#allocation61_spill] sm:$0xff] }
 0x562   : > { %v8237_v15 = vpop.eup %8236  ;;  %3196 = vmatmul.mubr.f32.gmra.mrb[100].mxu0 %v2984_v5 }
 0x563   : > { %7275 = vmatpush3.bf16.xpose.msk.msra.mxu0 %vm9415_vm2, %v7273_v41  ;;  %3200 = vmatprep.mubr.f32.mxu0 %v2988_v4  ;;  %v2952_v34 = vpop.xlane.xlu0 %2951  ;;  %v2991_v51 = vmul.f32 %v8237_v15, %v10309_v11  ;;  %v7866_v29 = vpop.permute.xlu1 %7865  ;;  %v2990_v1 = vmul.f32 %v8237_v15, %v10307_v28  ;;  %v7793_v4 = vunpack.i.h.bf16 %v12164_v38 }
 0x564   : > { %7278 = vmatprep.subr.msk.bf16.mxu0 %vm9415_vm2, %v7276_v52  ;;  %8242 = vrcp.f32 %v2952_v34  ;;  %v7868_v54 = vunpack.i.h.bf16 %v7866_v29  ;;  %v7867_v17 = vunpack.i.l.bf16 %v7866_v29  ;;  %v12166_v34 = vld [vmem:[#allocation60_spill] sm:$0xff] }
 0x565   : > { %v12167_v29 = vld [vmem:[#allocation40_spill] sm:$0xff] }
 0x566   : > { %v8239_v16 = vpop.eup %8238  ;;  %3201 = vmatmul.mubr.f32.gmra.mrb[102].mxu0 %v2987_v58  ;;  %v7164_v11 = vpack.c.bf16 %v7868_v54, %v7867_v17  ;;  %v7797_v58 = vunpack.i.l.bf16 %v12167_v29  ;;  %v1795_v54 = vsub.f32 %v12168_v31, %v10233_v26  ;;  %v12169_v17 = vld [vmem:[#allocation45_spill] sm:$0xff] }
 0x567   : > { %3205 = vmatprep.mubr.f32.mxu0 %v2991_v51  ;;  %v2994_v2 = vmul.f32 %v8239_v16, %v10315_v19  ;;  %v2993_v48 = vmul.f32 %v8239_v16, %v10313_v10  ;;  %v12163_v19 = vld [vmem:[#allocation39_spill] sm:$0xff]  ;;  %v1794_v51 = vsub.f32 %v12166_v34, %v10219_v35  ;;  %v7802_v16 = vunpack.i.l.bf16 %v12169_v17 }
 0x568   : > { %7165 = vmatprep.subr.bf16.mxu1 %v7164_v11  ;;  %v7788_v60 = vunpack.i.h.bf16 %v12163_v19  ;;  %v7787_v37 = vunpack.i.l.bf16 %v12163_v19  ;;  %v12165_v10 = vld [vmem:[#allocation59_spill] sm:$0xff]  ;;  %v1796_v11 = vsub.f32 %v12170_v32, %v10233_v26  ;;  %v12173_v26 = vld [vmem:[#allocation41_spill] sm:$0xff]  ;;  %v7843_v34 = vunpack.i.h.bf16 %v10209_v30 }
 0x569   : > { %7880 = vrot.lane.b32.xlu1 %v9359_v49, %s8638_s13  ;;  %v1793_v52 = vsub.f32 %v12165_v10, %v10219_v35  ;;  %v7803_v35 = vunpack.i.h.bf16 %v12169_v17  ;;  %v1831_v27 = vmul.f32 1.442695, %v1794_v51  ;;  %v7808_v19 = vunpack.i.h.bf16 %v12173_v26  ;;  %v12175_v10 = vld [vmem:[#allocation42_spill] sm:$0xff] }
 0x56a   : > { %3206 = vmatmul.mubr.f32.gmra.mrb[104].mxu0 %v2990_v1  ;;  %7870 = vrot.lane.b32.xlu0 %v12162_v57, %s8638_s13  ;;  %v8241_v61 = vpop.eup %8240  ;;  %v7285_v15 = vpack.c.bf16 %v7788_v60, %v7787_v37  ;;  %v12171_v1 = vld [vmem:[#allocation63_spill] sm:$0xff]  ;;  %v7807_v60 = vunpack.i.l.bf16 %v12173_v26  ;;  %v7842_v51 = vunpack.i.l.bf16 %v10209_v30  ;;  %v12176_v30 = vld [vmem:[#allocation44_spill] sm:$0xff] }
 0x56b   : > { %7281 = vmatpush3.bf16.xpose.msk.msra.mxu0 %vm9415_vm2, %v7279_v47  ;;  %3210 = vmatprep.mubr.f32.mxu0 %v2994_v2  ;;  %v2997_v28 = vmul.f32 %v8241_v61, %v10321_v24  ;;  %v2996_v41 = vmul.f32 %v8241_v61, %v10319_v22  ;;  %v7288_v24 = vpack.c.bf16 %v7793_v4, %v7792_v21  ;;  %v7798_v22 = vunpack.i.h.bf16 %v12167_v29  ;;  %v12178_v26 = vld [vmem:[#allocation15_spill] sm:$0xff] }
 0x56c   : > { %7284 = vmatprep.subr.msk.bf16.mxu0 %vm9415_vm2, %v7282_v6  ;;  %v1829_v62 = vmul.f32 1.442695, %v1793_v52  ;;  %v1797_v47 = vsub.f32 %v12171_v1, %v10239_v9  ;;  %v7294_v6 = vpack.c.bf16 %v7803_v35, %v7802_v16  ;;  %v1835_v61 = vmul.f32 1.442695, %v1796_v11  ;;  %v10521_v11 = vpop.permute.xlu0 %3504 }
 0x56d   : > { %v7291_v2 = vpack.c.bf16 %v7798_v22, %v7797_v58  ;;  %v7818_v52 = vunpack.i.h.bf16 %v12175_v10  ;;  %v7823_v35 = vunpack.i.h.bf16 %v12176_v30  ;;  %v7822_v16 = vunpack.i.l.bf16 %v12176_v30  ;;  %v12187_v30 = vld [vmem:[#allocation69_spill] sm:$0xff] }
 0x56e   : > { %v8243_v20 = vpop.eup %8242  ;;  %3211 = vmatmul.mubr.f32.gmra.mrb[106].mxu0 %v2993_v48  ;;  %8244 = vpow2.f32 %v1829_v62  ;;  %v12172_v48 = vld [vmem:[#allocation64_spill] sm:$0xff]  ;;  %v1837_v37 = vmul.f32 1.442695, %v1797_v47  ;;  %v7306_v62 = vpack.c.bf16 %v7843_v34, %v7842_v51  ;;  %v12177_v47 = vld [vmem:[#allocation30_spill] sm:$0xff] }
 0x56f   : > { %3215 = vmatprep.mubr.f32.mxu0 %v2997_v28  ;;  %v3000_v5 = vmul.f32 %v8243_v20, %v10327_v53  ;;  %v2999_v53 = vmul.f32 %v8243_v20, %v10325_v44  ;;  %v1833_v44 = vmul.f32 1.442695, %v1795_v54  ;;  %8246 = vpow2.f32 %v1831_v27  ;;  %v12174_v20 = vld [vmem:[#allocation47_spill] sm:$0xff] }
 0x570   : > { %v1798_v28 = vsub.f32 %v12172_v48, %v10239_v9  ;;  %v7813_v38 = vunpack.i.h.bf16 %v12174_v20  ;;  %v7812_v4 = vunpack.i.l.bf16 %v12174_v20  ;;  %v7309_v32 = vpack.c.bf16 %v7823_v35, %v7822_v16 }
 0x571   : > { %8248 = vpow2.f32 %v1833_v44 }
 0x572   : > { %3216 = vmatmul.mubr.f32.gmra.mrb[108].mxu0 %v2996_v41  ;;  %8250 = vpow2.f32 %v1835_v61  ;;  %v1839_v21 = vmul.f32 1.442695, %v1798_v28  ;;  %v7300_v9 = vpack.c.bf16 %v7813_v38, %v7812_v4 }
 0x573   : > { %7287 = vmatpush3.bf16.xpose.msk.msra.mxu0 %vm9415_vm2, %v7285_v15  ;;  %3220 = vmatprep.mubr.f32.mxu0 %v3000_v5  ;;  %v7297_v5 = vpack.c.bf16 %v7808_v19, %v7807_v60  ;;  %8252 = vpow2.f32 %v1837_v37  ;;  %v12179_v60 = vld [vmem:[#allocation14_spill] sm:$0xff] }
 0x574   : > { %7290 = vmatprep.subr.msk.bf16.mxu0 %vm9415_vm2, %v7288_v24  ;;  %8254 = vpow2.f32 %v1839_v21  ;;  %v7817_v24 = vunpack.i.l.bf16 %v12175_v10 }
 0x576   : > { %3221 = vmatmul.mubr.f32.gmra.mrb[110].mxu0 %v2999_v53  ;;  %v7303_v58 = vpack.c.bf16 %v7818_v52, %v7817_v24  ;;  %v12183_v52 = vld [vmem:[#allocation89_spill] sm:$0xff] }
 0x577   : > { %v12184_v24 = vld [vmem:[#allocation65_spill] sm:$0xff] }
 0x578   : > { %v10487_v41 = vpop.eup %8244  ;;  %v1799_v34 = vsub.f32 %v12184_v24, %v12183_v52 }
 0x579   : > { %v10491_v15 = vpop.eup %8246 }
 0x57a   : > { %v1891_v29 = vadd.f32 %v10491_v15, %v10487_v41 }
 0x57b   : > { %7293 = vmatpush3.bf16.xpose.msk.msra.mxu0 %vm9415_vm2, %v7291_v2  ;;  %v10499_v53 = vpop.eup %8248 }
 0x57c   : > { %7296 = vmatprep.subr.msk.bf16.mxu0 %vm9415_vm2, %v7294_v6  ;;  %v10503_v22 = vpop.eup %8250 }
 0x57d   : > { %v10505_v31 = vpop.eup %8252  ;;  %v1894_v54 = vadd.f32 %v10503_v22, %v10499_v53 }
 0x57e   : > { %v10511_v17 = vpop.eup %8254 }
 0x57f   : > { %v1897_v27 = vadd.f32 %v10511_v17, %v10505_v31 }
 0x583   : > { %7299 = vmatpush3.bf16.xpose.msk.msra.mxu0 %vm9415_vm2, %v7297_v5  ;;  %v12182_v5 = vld [vmem:[#allocation16_spill] sm:$0xff] }
 0x584   : > { %7302 = vmatprep.subr.msk.bf16.mxu0 %vm9415_vm2, %v7300_v9 }
 0x589   : > { %1892 = vadd.xlane.f32.xlu0 %v1891_v29 }
 0x58b   : > { %7305 = vmatpush3.bf16.xpose.msk.msra.mxu0 %vm9415_vm2, %v7303_v58 }
 0x58c   : > { %7308 = vmatprep.subr.msk.bf16.mxu0 %vm9415_vm2, %v7306_v62 }
 0x58d   : > { %1895 = vadd.xlane.f32.xlu1 %v1894_v54  ;;  %v12186_v54 = vld [vmem:[#allocation90_spill] sm:$0xff] }
 0x58e   : > { %v1803_v35 = vsub.f32 %v12187_v30, %v12186_v54 }
 0x591   : > { %1898 = vadd.xlane.f32.xlu1 %v1897_v27  ;;  %v12189_v27 = vld [vmem:[#allocation94_spill] sm:$0xff] }
 0x593   : > { %7311 = vmatpush3.bf16.xpose.msk.msra.mxu0 %vm9415_vm2, %v7309_v32  ;;  %v12190_v32 = vld [vmem:[#allocation67_spill] sm:$0xff] }
 0x594   : > { %v2955_v2 = vpop.xlane.xlu1 %2954 }
 0x595   : > { %8256 = vrcp.f32 %v2955_v2  ;;  %v1801_v2 = vsub.f32 %v12190_v32, %v12189_v27 }
 0x598   : > { %v2958_v44 = vpop.xlane.xlu0 %2957  ;;  %v2961_v1 = vpop.xlane.xlu1 %2960 }
 0x599   : > { %8258 = vrcp.f32 %v2958_v44  ;;  %v12191_v44 = vld [vmem:[#allocation68_spill] sm:$0xff] }
 0x59a   : > { %8260 = vrcp.f32 %v2961_v1  ;;  %v1802_v1 = vsub.f32 %v12191_v44, %v12189_v27  ;;  %v12205_v44 = vld [vmem:[#allocation77_spill] sm:$0xff] }
 0x59f   : > { %7885 = vrot.lane.b32.xlu0 %v12177_v47, %s8638_s13  ;;  %v8257_v6 = vpop.eup %8256 }
 0x5a0   : > { %v2964_v61 = vpop.xlane.xlu0 %2963  ;;  %v3003_v48 = vmul.f32 %v8257_v6, %v10345_v14  ;;  %v3002_v28 = vmul.f32 %v8257_v6, %v10343_v56  ;;  %v12180_v14 = vld [vmem:[#allocation34_spill] sm:$0xff]  ;;  %v12181_v56 = vld [vmem:[#allocation32_spill] sm:$0xff] }
 0x5a1   : > { %8262 = vrcp.f32 %v2964_v61  ;;  %v12192_v6 = vld [vmem:[#allocation96_spill] sm:$0xff] }
 0x5a2   : > { %7900 = vrot.lane.b32.xlu1 %v12178_v26, %s8638_s13  ;;  %3225 = vmatprep.mubr.f32.mxu0 %v3003_v48 }
 0x5a3   : > { %v8259_v19 = vpop.eup %8258  ;;  %7890 = vrot.lane.b32.xlu0 %v12179_v60, %s8638_s13  ;;  %3226 = vmatmul.mubr.f32.gmra.mrb[112].mxu0 %v3002_v28  ;;  %v12194_v28 = vld [vmem:[#allocation72_spill] sm:$0xff] }
 0x5a4   : > { %v8261_v37 = vpop.eup %8260  ;;  %v2967_v20 = vpop.xlane.xlu1 %2966  ;;  %v3006_v38 = vmul.f32 %v8259_v19, %v10351_v18  ;;  %v3005_v4 = vmul.f32 %v8259_v19, %v10347_v63  ;;  %v1806_v19 = vsub.f32 %v12194_v28, %v12192_v6 }
 0x5a5   : > { %8264 = vrcp.f32 %v2967_v20  ;;  %v3009_v21 = vmul.f32 %v8261_v37, %v10359_v8  ;;  %v3008_v9 = vmul.f32 %v8261_v37, %v10355_v45  ;;  %v12185_v8 = vld [vmem:[#allocation66_spill] sm:$0xff]  ;;  %v1841_v45 = vmul.f32 1.442695, %v1799_v34  ;;  %v12195_v20 = vld [vmem:[#allocation91_spill] sm:$0xff] }
 0x5a6   : > { %7905 = vrot.lane.b32.xlu1 %v12180_v14, %s8638_s13  ;;  %3230 = vmatprep.mubr.f32.mxu0 %v3006_v38  ;;  %v1800_v29 = vsub.f32 %v12185_v8, %v12183_v52  ;;  %v1845_v37 = vmul.f32 1.442695, %v1801_v2  ;;  %v12196_v38 = vld [vmem:[#allocation73_spill] sm:$0xff]  ;;  %v1855_v34 = vmul.f32 1.442695, %v1806_v19  ;;  %v12204_v2 = vld [vmem:[#allocation98_spill] sm:$0xff] }
 0x5a7   : > { %7895 = vrot.lane.b32.xlu0 %v12181_v56, %s8638_s13  ;;  %3231 = vmatmul.mubr.f32.gmra.mrb[114].mxu0 %v3005_v4  ;;  %8266 = vpow2.f32 %v1841_v45  ;;  %v1807_v4 = vsub.f32 %v12196_v38, %v12195_v20  ;;  %v12199_v52 = vld [vmem:[#allocation85_spill] sm:$0xff]  ;;  %v12202_v45 = vld [vmem:[#allocation75_spill] sm:$0xff] }
 0x5a8   : > { %3235 = vmatprep.mubr.f32.mxu0 %v3009_v21  ;;  %v1847_v21 = vmul.f32 1.442695, %v1802_v1  ;;  %v1811_v1 = vsub.f32 %v12205_v44, %v12204_v2  ;;  %v12208_v38 = vld [vmem:[#allocation79_spill] sm:$0xff]  ;;  %v12215_v44 = vld [vmem:[#allocation97_spill] sm:$0xff] }
 0x5aa   : > { %7910 = vrot.lane.b32.xlu1 %v12182_v5, %s8638_s13  ;;  %s8642_s13 = smov 104  }
 0x5ab   : > { %v8263_v18 = vpop.eup %8262  ;;  %3236 = vmatmul.mubr.f32.gmra.mrb[116].mxu0 %v3008_v9  ;;  %v12197_v9 = vld [vmem:[#allocation74_spill] sm:$0xff] }
 0x5ac   : > { %v3012_v63 = vmul.f32 %v8263_v18, %v10367_v43  ;;  %v3011_v10 = vmul.f32 %v8263_v18, %v10365_v36  ;;  %v1843_v43 = vmul.f32 1.442695, %v1800_v29  ;;  %v12188_v36 = vld [vmem:[#allocation70_spill] sm:$0xff]  ;;  %v1808_v18 = vsub.f32 %v12197_v9, %v12195_v20  ;;  %v12207_v20 = vld [vmem:[#allocation93_spill] sm:$0xff] }
 0x5ad   : > { %v1804_v16 = vsub.f32 %v12188_v36, %v12186_v54  ;;  %v1857_v29 = vmul.f32 1.442695, %v1807_v4  ;;  %v1813_v4 = vsub.f32 %v12208_v38, %v12207_v20 }
 0x5ae   : > { %3240 = vmatprep.mubr.f32.mxu0 %v3012_v63  ;;  %8268 = vpow2.f32 %v1843_v43 }
 0x5af   : > { %v8265_v51 = vpop.eup %8264  ;;  %3241 = vmatmul.mubr.f32.gmra.mrb[118].mxu0 %v3011_v10  ;;  %v1851_v48 = vmul.f32 1.442695, %v1804_v16  ;;  %v12198_v10 = vld [vmem:[#allocation99_spill] sm:$0xff] }
 0x5b0   : > { %v3015_v58 = vmul.f32 %v8265_v51, %v10373_v46  ;;  %v3014_v62 = vmul.f32 %v8265_v51, %v10371_v55  ;;  %v1849_v46 = vmul.f32 1.442695, %v1803_v35  ;;  %v12193_v55 = vld [vmem:[#allocation71_spill] sm:$0xff]  ;;  %v1819_v24 = vsub.f32 %v12199_v52, %v12198_v10  ;;  %v12200_v51 = vld [vmem:[#allocation86_spill] sm:$0xff]  ;;  %v12203_v35 = vld [vmem:[#allocation76_spill] sm:$0xff] }
 0x5b1   : > { %v1805_v61 = vsub.f32 %v12193_v55, %v12192_v6  ;;  %v1820_v8 = vsub.f32 %v12200_v51, %v12198_v10  ;;  %v10573_v16 = vpop.eup %8266  ;;  %v12206_v6 = vld [vmem:[#allocation78_spill] sm:$0xff]  ;;  %v1869_v51 = vmul.f32 1.442695, %v1813_v4 }
 0x5b2   : > { %3245 = vmatprep.mubr.f32.mxu0 %v3015_v58  ;;  %8270 = vpow2.f32 %v1849_v46  ;;  %v1859_v58 = vmul.f32 1.442695, %v1808_v18  ;;  %v1881_v30 = vmul.f32 1.442695, %v1819_v24  ;;  %v1812_v55 = vsub.f32 %v12206_v6, %v12204_v2  ;;  %v12209_v18 = vld [vmem:[#allocation80_spill] sm:$0xff] }
 0x5b3   : > { %3246 = vmatmul.mubr.f32.gmra.mrb[120].mxu0 %v3014_v62  ;;  %v1853_v63 = vmul.f32 1.442695, %v1805_v61  ;;  %8272 = vpow2.f32 %v1851_v48  ;;  %v12201_v62 = vld [vmem:[#allocation92_spill] sm:$0xff]  ;;  %v1883_v36 = vmul.f32 1.442695, %v1820_v8  ;;  %v12210_v8 = vld [vmem:[#allocation95_spill] sm:$0xff] }
 0x5b4   : > { %8274 = vpow2.f32 %v1845_v37  ;;  %v1809_v54 = vsub.f32 %v12202_v45, %v12201_v62  ;;  %v1810_v43 = vsub.f32 %v12203_v35, %v12201_v62  ;;  %v1865_v37 = vmul.f32 1.442695, %v1811_v1  ;;  %v12216_v1 = vld [vmem:[#allocation83_spill] sm:$0xff] }
 0x5b5   : > { %8276 = vpow2.f32 %v1847_v21  ;;  %v1867_v9 = vmul.f32 1.442695, %v1812_v55  ;;  %v12217_v55 = vld [vmem:[#allocation84_spill] sm:$0xff] }
 0x5b6   : > { %8278 = vpow2.f32 %v1853_v63  ;;  %v1861_v32 = vmul.f32 1.442695, %v1809_v54  ;;  %v1863_v46 = vmul.f32 1.442695, %v1810_v43  ;;  %v1814_v63 = vsub.f32 %v12209_v18, %v12207_v20  ;;  %v12212_v54 = vld [vmem:[#allocation82_spill] sm:$0xff] }
 0x5b7   : > { %8280 = vpow2.f32 %v1855_v34 }
 0x5b8   : > { %8282 = vpow2.f32 %v1857_v29  ;;  %v10575_v27 = vpop.eup %8268  ;;  %v12211_v29 = vld [vmem:[#allocation81_spill] sm:$0xff]  ;;  %v1871_v45 = vmul.f32 1.442695, %v1814_v63 }
 0x5b9   : > { %8284 = vpow2.f32 %v1859_v58  ;;  %v1900_v48 = vadd.f32 %v10575_v27, %v10573_v16  ;;  %v1815_v58 = vsub.f32 %v12211_v29, %v12210_v8 }
 0x5ba   : > { %8286 = vpow2.f32 %v1881_v30  ;;  %v1816_v30 = vsub.f32 %v12212_v54, %v12210_v8 }
 0x5bb   : > { %8288 = vpow2.f32 %v1883_v36  ;;  %v1873_v2 = vmul.f32 1.442695, %v1815_v58 }
 0x5bc   : > { %v10581_v61 = vpop.eup %8270  ;;  %8290 = vpow2.f32 %v1861_v32  ;;  %v1875_v6 = vmul.f32 1.442695, %v1816_v30 }
 0x5bd   : > { %v10585_v28 = vpop.eup %8272  ;;  %8292 = vpow2.f32 %v1863_v46  ;;  %v1817_v46 = vsub.f32 %v12216_v1, %v12215_v44 }
 0x5be   : > { %v10587_v19 = vpop.eup %8274  ;;  %v1906_v52 = vadd.f32 %v10585_v28, %v10581_v61  ;;  %8294 = vpow2.f32 %v1865_v37 }
 0x5bf   : > { %v10591_v21 = vpop.eup %8276  ;;  %8296 = vpow2.f32 %v1867_v9  ;;  %v1877_v9 = vmul.f32 1.442695, %v1817_v46 }
 0x5c0   : > { %v10595_v10 = vpop.eup %8278  ;;  %v1903_v36 = vadd.f32 %v10591_v21, %v10587_v19  ;;  %8298 = vpow2.f32 %v1869_v51 }
 0x5c1   : > { %v10599_v24 = vpop.eup %8280  ;;  %8300 = vpow2.f32 %v1871_v45 }
 0x5c2   : > { %v10601_v34 = vpop.eup %8282  ;;  %v1909_v43 = vadd.f32 %v10599_v24, %v10595_v10  ;;  %8302 = vpow2.f32 %v1873_v2 }
 0x5c3   : > { %v10605_v62 = vpop.eup %8284  ;;  %8304 = vpow2.f32 %v1875_v6 }
 0x5c4   : > { %v10609_v35 = vpop.eup %8286  ;;  %v1912_v20 = vadd.f32 %v10605_v62, %v10601_v34  ;;  %8306 = vpow2.f32 %v1877_v9 }
 0x5c5   : > { %12213 = vst [vmem:[#allocation39_spill] sm:$0xff] %v10609_v35  ;;  %v10615_v32 = vpop.eup %8288 }
 0x5c6   : > { %1901 = vadd.xlane.f32.xlu0 %v1900_v48  ;;  %12214 = vst [vmem:[#allocation43_spill] sm:$0xff] %v10615_v32  ;;  %v1818_v48 = vsub.f32 %v12217_v55, %v12215_v44  ;;  %v10621_v37 = vpop.eup %8290  ;;  %v1930_v38 = vadd.f32 %v10615_v32, %v10609_v35  ;;  %v12221_v55 = vld [vmem:[#allocation9_spill] sm:$0xff] }
 0x5c7   : > { %v10627_v4 = vpop.eup %8292 }
 0x5c8   : > { %v1879_v18 = vmul.f32 1.442695, %v1818_v48  ;;  %v10629_v63 = vpop.eup %8294  ;;  %v1915_v51 = vadd.f32 %v10627_v4, %v10621_v37 }
 0x5c9   : > { %v10635_v8 = vpop.eup %8296 }
 0x5ca   : > { %1907 = vadd.xlane.f32.xlu0 %v1906_v52  ;;  %v10631_v52 = vpop.permute.xlu1 %3506  ;;  %8308 = vpow2.f32 %v1879_v18  ;;  %v10637_v29 = vpop.eup %8298  ;;  %v1918_v58 = vadd.f32 %v10635_v8, %v10629_v63 }
 0x5cb   : > { %v10641_v45 = vpop.eup %8300 }
 0x5cc   : > { %v10643_v30 = vpop.eup %8302 }
 0x5cd   : > { %12218 = vst [vmem:[#allocation59_spill] sm:$0xff] %v10643_v30 }
 0x5ce   : > { %1910 = vadd.xlane.f32.xlu0 %v1909_v43  ;;  %1904 = vadd.xlane.f32.xlu1 %v1903_v36  ;;  %v7876_v54 = vpop.permute.xlu1 %7875  ;;  %v1921_v43 = vadd.f32 %v10641_v45, %v10637_v29  ;;  %v10647_v36 = vpop.eup %8304 }
 0x5cf   : > { %v10649_v44 = vpop.eup %8306  ;;  %v1924_v1 = vadd.f32 %v10647_v36, %v10643_v30 }
 0x5d0   : > { %12219 = vst [vmem:[#allocation60_spill] sm:$0xff] %v10649_v44 }
 0x5d2   : > { %1913 = vadd.xlane.f32.xlu0 %v1912_v20  ;;  %1931 = vadd.xlane.f32.xlu1 %v1930_v38  ;;  %v7878_v20 = vunpack.i.h.bf16 %v7876_v54  ;;  %v7877_v38 = vunpack.i.l.bf16 %v7876_v54 }
 0x5d4   : > { %v10653_v46 = vpop.eup %8308 }
 0x5d5   : > { %12220 = vst [vmem:[#allocation40_spill] sm:$0xff] %v10653_v46  ;;  %v1927_v48 = vadd.f32 %v10653_v46, %v10649_v44  ;;  %v12223_v44 = vld [vmem:[#allocation22_spill] sm:$0xff] }
 0x5d6   : > { %1916 = vadd.xlane.f32.xlu0 %v1915_v51 }
 0x5da   : > { %1919 = vadd.xlane.f32.xlu0 %v1918_v58 }
 0x5dd   : > { %v2973_v2 = vpop.xlane.xlu1 %2972 }
 0x5de   : > { %1922 = vadd.xlane.f32.xlu0 %v1921_v43  ;;  %8310 = vrcp.f32 %v2973_v2  ;;  %v12222_v43 = vld [vmem:[#allocation20_spill] sm:$0xff] }
 0x5e1   : > { %v2970_v6 = vpop.xlane.xlu0 %2969 }
 0x5e2   : > { %8312 = vrcp.f32 %v2970_v6  ;;  %1925 = vadd.xlane.f32.xlu0 %v1924_v1  ;;  %v7168_v6 = vpack.c.bf16 %v7878_v20, %v7877_v38 }
 0x5e3   : > { %7920 = vrot.lane.b32.xlu1 %v12221_v55, %s8642_s13 }
 0x5e5   : > { %v2976_v9 = vpop.xlane.xlu1 %2975  ;;  %v7871_v18 = vpop.permute.xlu0 %7870 }
 0x5e6   : > { %8314 = vrcp.f32 %v2976_v9  ;;  %v7873_v51 = vunpack.i.h.bf16 %v7871_v18  ;;  %v7872_v58 = vunpack.i.l.bf16 %v7871_v18  ;;  %1928 = vadd.xlane.f32.xlu0 %v1927_v48 }
 0x5e7   : > { %7925 = vrot.lane.b32.xlu1 %v12222_v43, %s8642_s13  ;;  %8316 = vrcp.f32 %v10387_v42  ;;  %v12248_v42 = vld [vmem:[#allocation33_spill] sm:$0xff] }
 0x5e8   : > { %v7166_v2 = vpack.c.bf16 %v7873_v51, %v7872_v58  ;;  %v8311_v30 = vpop.eup %8310  ;;  %v12232_v51 = vld [vmem:[#allocation23_spill] sm:$0xff]  ;;  %v12233_v58 = vld [vmem:[#allocation52_spill] sm:$0xff] }
 0x5e9   : > { %v7881_v1 = vpop.permute.xlu1 %7880  ;;  %v3021_v20 = vmul.f32 %v8311_v30, %v10395_v33  ;;  %v3020_v18 = vmul.f32 %v8311_v30, %v10393_v0  ;;  %v12225_v0 = vld [vmem:[#allocation18_spill] sm:$0xff]  ;;  %v12230_v30 = vld [vmem:[#allocation11_spill] sm:$0xff] }
 0x5ea   : > { %v7883_v35 = vunpack.i.h.bf16 %v7881_v1  ;;  %v7882_v32 = vunpack.i.l.bf16 %v7881_v1  ;;  %7167 = vmatpush3.bf16.msra.mxu1 %v7166_v2  ;;  %v12226_v33 = vld [vmem:[#allocation46_spill] sm:$0xff]  ;;  %v12234_v2 = vld [vmem:[#allocation21_spill] sm:$0xff] }
 0x5eb   : > { %7935 = vrot.lane.b32.xlu1 %v12223_v44, %s8642_s13  ;;  %7169 = vmatprep.subr.bf16.mxu1 %v7168_v6  ;;  %v12235_v1 = vld [vmem:[#allocation53_spill] sm:$0xff]  ;;  %v12236_v6 = vld [vmem:[#allocation35_spill] sm:$0xff] }
 0x5ec   : > { %v8313_v54 = vpop.eup %8312  ;;  %v7170_v46 = vpack.c.bf16 %v7883_v35, %v7882_v32  ;;  %v12229_v32 = vld [vmem:[#allocation8_spill] sm:$0xff] }
 0x5ed   : > { %v3018_v9 = vmul.f32 %v8313_v54, %v10401_v23  ;;  %v3017_v48 = vmul.f32 %v8313_v54, %v10399_v39  ;;  %v12224_v23 = vld [vmem:[#allocation49_spill] sm:$0xff]  ;;  %v12237_v54 = vld [vmem:[#allocation54_spill] sm:$0xff] }
 0x5ee   : > { %7171 = vmatpush3.bf16.msra.mxu1 %v7170_v46  ;;  %v12231_v46 = vld [vmem:[#allocation51_spill] sm:$0xff] }
 0x5ef   : > { %7945 = vrot.lane.b32.xlu1 %v9475_v12, %s8642_s13  ;;  %3250 = vmatprep.mubr.f32.mxu0 %v3018_v9  ;;  %v12238_v9 = vld [vmem:[#allocation29_spill] sm:$0xff] }
 0x5f0   : > { %v8315_v38 = vpop.eup %8314  ;;  %3251 = vmatmul.mubr.f32.gmra.mrb[122].mxu0 %v3017_v48  ;;  %v12239_v48 = vld [vmem:[#allocation50_spill] sm:$0xff] }
 0x5f1   : > { %3255 = vmatprep.mubr.f32.mxu0 %v3021_v20  ;;  %v3024_v35 = vmul.f32 %v8315_v38, %v10407_v13  ;;  %v3023_v39 = vmul.f32 %v8315_v38, %v10405_v3  ;;  %v12227_v3 = vld [vmem:[#allocation10_spill] sm:$0xff]  ;;  %v12228_v13 = vld [vmem:[#allocation48_spill] sm:$0xff]  ;;  %v12240_v38 = vld [vmem:[#allocation31_spill] sm:$0xff] }
 0x5f3   : > { %7955 = vrot.lane.b32.xlu1 %v9487_v59, %s8642_s13 }
 0x5f4   : > { %3256 = vmatmul.mubr.f32.gmra.mrb[124].mxu0 %v3020_v18  ;;  %v12241_v18 = vld [vmem:[#allocation55_spill] sm:$0xff] }
 0x5f5   : > { %3260 = vmatprep.mubr.f32.mxu0 %v3024_v35 }
 0x5f7   : > { %7965 = vrot.lane.b32.xlu1 %v12177_v47, %s8642_s13 }
 0x5f8   : > { %3261 = vmatmul.mubr.f32.gmra.mrb[126].mxu0 %v3023_v39 }
 0x5f9   : > { %6534 = vmatprep.mubr.msk.f32.mxu0 %vm1435_vm1, %v12224_v23 }
 0x5fb   : > { %7975 = vrot.lane.b32.xlu1 %v12181_v56, %s8642_s13 }
 0x5fc   : > { %7915 = vrot.lane.b32.xlu0 %v12225_v0, %s8642_s13  ;;  %6535 = vmatmul.mubr.msk.f32.vlgmr.msra.gmra.mrb[128].mxu0 %vm1435_vm1, %v12224_v23 }
 0x5fd   : > { %6536 = vmatprep.mubr.msk.f32.mxu0 %vm1435_vm1, %v12226_v33 }
 0x5ff   : > { %7985 = vrot.lane.b32.xlu1 %v12180_v14, %s8642_s13 }
 0x600   : > { %7930 = vrot.lane.b32.xlu0 %v12227_v3, %s8642_s13  ;;  %6537 = vmatmul.mubr.msk.f32.gmra.mrb[130].mxu0 %vm1435_vm1, %v12226_v33 }
 0x601   : > { %6538 = vmatprep.mubr.msk.f32.mxu0 %vm1435_vm1, %v12228_v13 }
 0x603   : > { %4520 = vrot.lane.b32.xlu1 %v12229_v32, %s8642_s13  ;;  %v12243_v32 = vld [vmem:[#allocation56_spill] sm:$0xff] }
 0x604   : > { %7940 = vrot.lane.b32.xlu0 %v12230_v30, %s8642_s13  ;;  %6539 = vmatmul.mubr.msk.f32.gmra.mrb[132].mxu0 %vm1435_vm1, %v12228_v13  ;;  %v12242_v13 = vld [vmem:[#allocation17_spill] sm:$0xff] }
 0x605   : > { %6540 = vmatprep.mubr.msk.f32.mxu0 %vm1435_vm1, %v12231_v46 }
 0x607   : > { %4524 = vrot.lane.b32.xlu1 %v12232_v51, %s8642_s13 }
 0x608   : > { %7950 = vrot.lane.b32.xlu0 %v12162_v57, %s8642_s13  ;;  %6541 = vmatmul.mubr.msk.f32.gmra.mrb[134].mxu0 %vm1435_vm1, %v12231_v46 }
 0x609   : > { %6542 = vmatprep.mubr.msk.f32.mxu0 %vm1435_vm1, %v12233_v58 }
 0x60b   : > { %4530 = vrot.lane.b32.xlu1 %v12234_v2, %s8642_s13 }
 0x60c   : > { %7960 = vrot.lane.b32.xlu0 %v9359_v49, %s8642_s13  ;;  %6543 = vmatmul.mubr.msk.f32.gmra.mrb[136].mxu0 %vm1435_vm1, %v12233_v58 }
 0x60d   : > { %6544 = vmatprep.mubr.msk.f32.mxu0 %vm1435_vm1, %v12235_v1 }
 0x60f   : > { %4536 = vrot.lane.b32.xlu1 %v12236_v6, %s8642_s13 }
 0x610   : > { %7970 = vrot.lane.b32.xlu0 %v12179_v60, %s8642_s13  ;;  %6545 = vmatmul.mubr.msk.f32.gmra.mrb[138].mxu0 %vm1435_vm1, %v12235_v1 }
 0x611   : > { %6546 = vmatprep.mubr.msk.f32.mxu0 %vm1435_vm1, %v12237_v54 }
 0x613   : > { %4542 = vrot.lane.b32.xlu1 %v12238_v9, %s8642_s13 }
 0x614   : > { %7980 = vrot.lane.b32.xlu0 %v12178_v26, %s8642_s13  ;;  %6547 = vmatmul.mubr.msk.f32.gmra.mrb[140].mxu0 %vm1435_vm1, %v12237_v54  ;;  %v12245_v54 = vld [vmem:[#allocation57_spill] sm:$0xff] }
 0x615   : > { %6548 = vmatprep.mubr.msk.f32.mxu0 %vm1435_vm1, %v12239_v48 }
 0x616   : > { %v1893_v20 = vpop.xlane.xlu0 %1892 }
 0x617   : > { %4546 = vrot.lane.b32.xlu1 %v12240_v38, %s8642_s13  ;;  %8318 = vrcp.f32 %v1893_v20  ;;  %v12250_v20 = vld [vmem:[#allocation24_spill] sm:$0xff] }
 0x618   : > { %7990 = vrot.lane.b32.xlu0 %v12182_v5, %s8642_s13  ;;  %6549 = vmatmul.mubr.msk.f32.gmra.mrb[142].mxu0 %vm1435_vm1, %v12239_v48 }
 0x619   : > { %6550 = vmatprep.mubr.msk.f32.mxu0 %vm1435_vm1, %v12241_v18 }
 0x61a   : > { %v1896_v35 = vpop.xlane.xlu1 %1895  ;;  %v7886_v39 = vpop.permute.xlu0 %7885 }
 0x61b   : > { %v7888_v23 = vunpack.i.h.bf16 %v7886_v39  ;;  %v7887_v33 = vunpack.i.l.bf16 %v7886_v39  ;;  %4550 = vrot.lane.b32.xlu1 %v9534_v25, %s8642_s13  ;;  %v12244_v25 = vld [vmem:[#allocation19_spill] sm:$0xff]  ;;  %8320 = vrcp.f32 %v1896_v35  ;;  %v12251_v35 = vld [vmem:[#allocation26_spill] sm:$0xff] }
 0x61c   : > { %4522 = vrot.lane.b32.xlu0 %v12242_v13, %s8642_s13  ;;  %6551 = vmatmul.mubr.msk.f32.gmra.mrb[144].mxu0 %vm1435_vm1, %v12241_v18 }
 0x61d   : > { %6552 = vmatprep.mubr.msk.f32.mxu0 %vm1435_vm1, %v12243_v32  ;;  %v7172_v46 = vpack.c.bf16 %v7888_v23, %v7887_v33  ;;  %v12246_v33 = vld [vmem:[#allocation28_spill] sm:$0xff] }
 0x61e   : > { %v1899_v51 = vpop.xlane.xlu1 %1898  ;;  %v7891_v58 = vpop.permute.xlu0 %7890 }
 0x61f   : > { %v7893_v2 = vunpack.i.h.bf16 %v7891_v58  ;;  %v7892_v1 = vunpack.i.l.bf16 %v7891_v58  ;;  %8005 = vrot.lane.b32.xlu1 %v12222_v43, %s8643_s24  ;;  %7173 = vmatprep.subr.bf16.mxu1 %v7172_v46  ;;  %8322 = vrcp.f32 %v1899_v51  ;;  %v12254_v51 = vld [vmem:[#allocation36_spill] sm:$0xff] }
 0x620   : > { %4526 = vrot.lane.b32.xlu0 %v12244_v25, %s8642_s13  ;;  %6553 = vmatmul.mubr.msk.f32.gmra.mrb[146].mxu0 %vm1435_vm1, %v12243_v32  ;;  %v12247_v32 = vld [vmem:[#allocation58_spill] sm:$0xff] }
 0x621   : > { %v7174_v6 = vpack.c.bf16 %v7893_v2, %v7892_v1  ;;  %6554 = vmatprep.mubr.msk.f32.mxu0 %vm1435_vm1, %v12245_v54 }
 0x622   : > { %v7901_v9 = vpop.permute.xlu1 %7900  ;;  %v7896_v48 = vpop.permute.xlu0 %7895 }
 0x623   : > { %v7903_v38 = vunpack.i.h.bf16 %v7901_v9  ;;  %v7902_v18 = vunpack.i.l.bf16 %v7901_v9  ;;  %v7898_v39 = vunpack.i.h.bf16 %v7896_v48  ;;  %v7897_v23 = vunpack.i.l.bf16 %v7896_v48  ;;  %8015 = vrot.lane.b32.xlu1 %v12223_v44, %s8643_s24  ;;  %7175 = vmatpush3.bf16.msra.mxu1 %v7174_v6  ;;  %v12249_v6 = vld [vmem:[#allocation87_spill] sm:$0xff] }
 0x624   : > { %4528 = vrot.lane.b32.xlu0 %v12246_v33, %s8642_s13  ;;  %6555 = vmatmul.mubr.msk.f32.gmra.mrb[148].mxu0 %vm1435_vm1, %v12245_v54 }
 0x625   : > { %v7178_v13 = vpack.c.bf16 %v7903_v38, %v7902_v18  ;;  %6556 = vmatprep.mubr.msk.f32.mxu0 %vm1435_vm1, %v12247_v32  ;;  %v7176_v46 = vpack.c.bf16 %v7898_v39, %v7897_v23  ;;  %v8317_v39 = vpop.eup %8316 }
 0x626   : > { %v7906_v58 = vpop.permute.xlu1 %7905 }
 0x627   : > { %v7908_v2 = vunpack.i.h.bf16 %v7906_v58  ;;  %v7907_v1 = vunpack.i.l.bf16 %v7906_v58  ;;  %8020 = vrot.lane.b32.xlu1 %v12230_v30, %s8643_s24  ;;  %7177 = vmatprep.subr.bf16.mxu1 %v7176_v46  ;;  %v12253_v58 = vld [vmem:[#allocation101_spill] sm:$0xff] }
 0x628   : > { %4532 = vrot.lane.b32.xlu0 %v12248_v42, %s8642_s13  ;;  %7179 = vmatpush3.bf16.msra.mxu1 %v7178_v13  ;;  %v12252_v13 = vld [vmem:[#allocation88_spill] sm:$0xff] }
 0x629   : > { %6557 = vmatmul.mubr.msk.f32.gmra.mrb[150].mxu0 %vm1435_vm1, %v12247_v32  ;;  %v7180_v25 = vpack.c.bf16 %v7908_v2, %v7907_v1  ;;  %v1934_v32 = vmul.f32 %v10375_v7, %v12252_v13  ;;  %v1938_v2 = vmul.f32 %v8317_v39, %v12253_v58  ;;  %v8319_v1 = vpop.eup %8318  ;;  %v12257_v13 = vld [vmem:[#allocation38_spill] sm:$0xff] }
 0x62a   : > { %6558 = vmatprep.mubr.msk.f32.mxu0 %vm1435_vm1, %v12249_v6  ;;  %v7911_v54 = vpop.permute.xlu1 %7910 }
 0x62b   : > { %v7913_v9 = vunpack.i.h.bf16 %v7911_v54  ;;  %v7912_v48 = vunpack.i.l.bf16 %v7911_v54  ;;  %8040 = vrot.lane.b32.xlu1 %v9359_v49, %s8643_s24  ;;  %7181 = vmatprep.subr.bf16.mxu1 %v7180_v25 }
 0x62c   : > { %4534 = vrot.lane.b32.xlu0 %v12250_v20, %s8642_s13 }
 0x62d   : > { %v7182_v38 = vpack.c.bf16 %v7913_v9, %v7912_v48  ;;  %v6437_v18 = vpop.f32.mrb[96].mxu0  ;;  %6559 = vmatmul.mubr.msk.f32.gmra.mrb[152].mxu0 %vm1435_vm1, %v12249_v6  ;;  %v12255_v6 = vld [vmem:[#allocation100_spill] sm:$0xff]  ;;  %v8321_v9 = vpop.eup %8320 }
 0x62e   : > { %v6438_v23 = vpop.f32.mrb[97].mxu0  ;;  %6560 = vmatprep.mubr.msk.f32.mxu0 %vm1435_vm1, %v10349_v40  ;;  %v1937_v7 = vmul.f32 %v8317_v39, %v12255_v6 }
 0x62f   : > { %v10782_v33 = vadd.f32 %v6438_v23, %v6437_v18  ;;  %8045 = vrot.lane.b32.xlu1 %v12177_v47, %s8643_s24  ;;  %7183 = vmatpush3.bf16.msra.mxu1 %v7182_v38  ;;  %v12256_v38 = vld [vmem:[#allocation37_spill] sm:$0xff]  ;;  %v1940_v18 = vmul.f32 %v8319_v1, %v10487_v41 }
 0x630   : > { %4538 = vrot.lane.b32.xlu0 %v12251_v35, %s8642_s13 }
 0x631   : > { %v6440_v46 = vpop.f32.mrb[98].mxu0  ;;  %6561 = vmatmul.mubr.msk.f32.gmra.mrb[154].mxu0 %vm1435_vm1, %v10349_v40  ;;  %v1941_v40 = vmul.f32 %v8319_v1, %v10491_v15  ;;  %v1944_v15 = vmul.f32 %v8321_v9, %v10503_v22 }
 0x632   : > { %v6441_v42 = vpop.f32.mrb[99].mxu0  ;;  %6562 = vmatprep.mubr.msk.f32.mxu0 %vm1435_vm1, %v10521_v11  ;;  %2142 = vmatmul.mubr.f32.vlgmr.msra.gmra.mrb[64].mxu1 %v1934_v32  ;;  %v1943_v32 = vmul.f32 %v8321_v9, %v10499_v53 }
 0x633   : > { %v10795_v25 = vadd.f32 %v6441_v42, %v6440_v46  ;;  %2146 = vmatprep.mubr.f32.mxu1 %v1938_v2 }
 0x634   : > { %4540 = vrot.lane.b32.xlu0 %v12254_v51, %s8642_s13 }
 0x635   : > { %v6443_v54 = vpop.f32.mrb[100].mxu0  ;;  %6563 = vmatmul.mubr.msk.f32.gmra.mrb[156].mxu0 %vm1435_vm1, %v10521_v11  ;;  %v8323_v11 = vpop.eup %8322 }
 0x636   : > { %v6444_v48 = vpop.f32.mrb[101].mxu0  ;;  %6564 = vmatprep.mubr.msk.f32.mxu0 %vm1435_vm1, %v10631_v52  ;;  %2147 = vmatmul.mubr.f32.gmra.mrb[66].mxu1 %v1937_v7  ;;  %v1947_v41 = vmul.f32 %v8323_v11, %v10511_v17  ;;  %v1946_v22 = vmul.f32 %v8323_v11, %v10505_v31 }
 0x637   : > { %v10805_v20 = vadd.f32 %v6444_v48, %v6443_v54  ;;  %2151 = vmatprep.mubr.f32.mxu1 %v1941_v40 }
 0x638   : > { %4544 = vrot.lane.b32.xlu0 %v12256_v38, %s8642_s13 }
 0x639   : > { %v6446_v39 = vpop.f32.mrb[102].mxu0  ;;  %6565 = vmatmul.mubr.msk.f32.gmra.mrb[158].mxu0 %vm1435_vm1, %v10631_v52 }
 0x63a   : > { %v6447_v23 = vpop.f32.mrb[103].mxu0  ;;  %2152 = vmatmul.mubr.f32.gmra.mrb[68].mxu1 %v1940_v18 }
 0x63b   : > { %v10813_v35 = vadd.f32 %v6447_v23, %v6446_v39  ;;  %2156 = vmatprep.mubr.f32.mxu1 %v1944_v15 }
 0x63c   : > { %4548 = vrot.lane.b32.xlu0 %v12257_v13, %s8642_s13  ;;  %s11834_s13 = scalar_lea.sflag [#allocation4], %s330_s10 }
 0x63d   : > { %v6449_v46 = vpop.f32.mrb[104].mxu0 }
 0x63e   : > { %v6450_v58 = vpop.f32.mrb[105].mxu0  ;;  %2157 = vmatmul.mubr.f32.gmra.mrb[70].mxu1 %v1943_v32 }
 0x63f   : > { %v10819_v2 = vadd.f32 %v6450_v58, %v6449_v46  ;;  %2161 = vmatprep.mubr.f32.mxu1 %v1947_v41 }
 0x640   : > { %7995 = vrot.lane.b32.xlu0 %v12225_v0, %s8643_s24 }
 0x641   : > { %v6452_v52 = vpop.f32.mrb[106].mxu0 }
 0x642   : > { %v6453_v1 = vpop.f32.mrb[107].mxu0  ;;  %2162 = vmatmul.mubr.f32.gmra.mrb[72].mxu1 %v1946_v22 }
 0x643   : > { %v10824_v42 = vadd.f32 %v6453_v1, %v6452_v52 }
 0x644   : > { %8000 = vrot.lane.b32.xlu0 %v12221_v55, %s8643_s24 }
 0x645   : > { %v6455_v53 = vpop.f32.mrb[108].mxu0 }
 0x646   : > { %v6456_v17 = vpop.f32.mrb[109].mxu0 }
 0x647   : > { %v10828_v51 = vadd.f32 %v6456_v17, %v6455_v53 }
 0x648   : > { %8010 = vrot.lane.b32.xlu0 %v12227_v3, %s8643_s24 }
 0x649   : > { %v6458_v6 = vpop.f32.mrb[110].mxu0 }
 0x64a   : > { %v6459_v7 = vpop.f32.mrb[111].mxu0 }
 0x64b   : > { %v10832_v54 = vadd.f32 %v6459_v7, %v6458_v6 }
 0x64c   : > { %8025 = vrot.lane.b32.xlu0 %v9475_v12, %s8643_s24 }
 0x650   : > { %8030 = vrot.lane.b32.xlu0 %v12162_v57, %s8643_s24 }
 0x653   : > { %v1902_v31 = vpop.xlane.xlu0 %1901 }
 0x654   : > { %8324 = vrcp.f32 %v1902_v31  ;;  %8035 = vrot.lane.b32.xlu0 %v9487_v59, %s8643_s24 }
 0x657   : > { %v1908_v40 = vpop.xlane.xlu0 %1907 }
 0x658   : > { %8326 = vrcp.f32 %v1908_v40 }
 0x65b   : > { %v1905_v9 = vpop.xlane.xlu1 %1904  ;;  %v1911_v48 = vpop.xlane.xlu0 %1910 }
 0x65c   : > { %8328 = vrcp.f32 %v1905_v9 }
 0x65d   : > { %8330 = vrcp.f32 %v1911_v48 }
 0x65e   : > { %v8325_v38 = vpop.eup %8324 }
 0x65f   : > { %v10840_v18 = vpop.xlane.xlu1 %1931  ;;  %v1914_v39 = vpop.xlane.xlu0 %1913  ;;  %v1950_v15 = vmul.f32 %v8325_v38, %v10575_v27  ;;  %v1949_v11 = vmul.f32 %v8325_v38, %v10573_v16 }
 0x660   : > { %8332 = vrcp.f32 %v1914_v39 }
 0x661   : > { %2166 = vmatprep.mubr.f32.mxu1 %v1950_v15 }
 0x662   : > { %2167 = vmatmul.mubr.f32.gmra.mrb[74].mxu1 %v1949_v11  ;;  %v8327_v32 = vpop.eup %8326 }
 0x663   : > { %v7921_v23 = vpop.permute.xlu1 %7920  ;;  %v1917_v13 = vpop.xlane.xlu0 %1916  ;;  %v1956_v27 = vmul.f32 %v8327_v32, %v10585_v28  ;;  %v1955_v17 = vmul.f32 %v8327_v32, %v10581_v61 }
 0x664   : > { %8334 = vrcp.f32 %v1917_v13  ;;  %v7923_v39 = vunpack.i.h.bf16 %v7921_v23  ;;  %v7922_v15 = vunpack.i.l.bf16 %v7921_v23 }
 0x666   : > { %v8329_v46 = vpop.eup %8328 }
 0x667   : > { %v7926_v41 = vpop.permute.xlu1 %7925  ;;  %v1920_v58 = vpop.xlane.xlu0 %1919  ;;  %v1953_v22 = vmul.f32 %v8329_v46, %v10591_v21  ;;  %v1952_v52 = vmul.f32 %v8329_v46, %v10587_v19 }
 0x668   : > { %v8331_v1 = vpop.eup %8330  ;;  %8336 = vrcp.f32 %v1920_v58 }
 0x669   : > { %2171 = vmatprep.mubr.f32.mxu1 %v1953_v22  ;;  %v1959_v6 = vmul.f32 %v8331_v1, %v10599_v24  ;;  %v1958_v28 = vmul.f32 %v8331_v1, %v10595_v10  ;;  %v7928_v10 = vunpack.i.h.bf16 %v7926_v41 }
 0x66a   : > { %2172 = vmatmul.mubr.f32.gmra.mrb[76].mxu1 %v1952_v52  ;;  %v8333_v7 = vpop.eup %8332 }
 0x66b   : > { %v10847_v16 = vpop.permute.xlu1 %7935  ;;  %v1923_v53 = vpop.xlane.xlu0 %1922  ;;  %2176 = vmatprep.mubr.f32.mxu1 %v1956_v27  ;;  %v1962_v31 = vmul.f32 %v8333_v7, %v10605_v62  ;;  %v1961_v61 = vmul.f32 %v8333_v7, %v10601_v34  ;;  %v7927_v62 = vunpack.i.l.bf16 %v7926_v41  ;;  %v7347_v41 = vpack.c.bf16 %v7923_v39, %v7922_v15 }
 0x66c   : > { %8338 = vrcp.f32 %v1923_v53 }
 0x66e   : > { %2177 = vmatmul.mubr.f32.gmra.mrb[78].mxu1 %v1955_v17  ;;  %v8335_v40 = vpop.eup %8334 }
 0x66f   : > { %v10851_v21 = vpop.permute.xlu1 %7945  ;;  %v1926_v19 = vpop.xlane.xlu0 %1925  ;;  %2181 = vmatprep.mubr.f32.mxu1 %v1959_v6  ;;  %v1965_v24 = vmul.f32 %v8335_v40, %v10627_v4  ;;  %v1964_v58 = vmul.f32 %v8335_v40, %v10621_v37  ;;  %v7350_v37 = vpack.c.bf16 %v7928_v10, %v7927_v62 }
 0x670   : > { %8340 = vrcp.f32 %v1926_v19 }
 0x672   : > { %2182 = vmatmul.mubr.f32.gmra.mrb[80].mxu1 %v1958_v28  ;;  %v8337_v38 = vpop.eup %8336 }
 0x673   : > { %v10855_v9 = vpop.permute.xlu1 %7955  ;;  %v1929_v48 = vpop.xlane.xlu0 %1928  ;;  %2186 = vmatprep.mubr.f32.mxu1 %v1962_v31  ;;  %v1968_v4 = vmul.f32 %v8337_v38, %v10635_v8  ;;  %v1967_v6 = vmul.f32 %v8337_v38, %v10629_v63 }
 0x674   : > { %8342 = vrcp.f32 %v1929_v48 }
 0x675   : > { %8344 = vrcp.f32 %v10840_v18 }
 0x676   : > { %2187 = vmatmul.mubr.f32.gmra.mrb[82].mxu1 %v1961_v61  ;;  %v6461_v11 = vpop.f32.mrb[112].mxu0  ;;  %v8339_v27 = vpop.eup %8338 }
 0x677   : > { %v10859_v13 = vpop.permute.xlu1 %7965  ;;  %2191 = vmatprep.mubr.f32.mxu1 %v1965_v24  ;;  %v6462_v32 = vpop.f32.mrb[113].mxu0  ;;  %v1971_v8 = vmul.f32 %v8339_v27, %v10641_v45  ;;  %v1970_v61 = vmul.f32 %v8339_v27, %v10637_v29  ;;  %v7938_v24 = vunpack.i.h.bf16 %v10847_v16  ;;  %v7937_v45 = vunpack.i.l.bf16 %v10847_v16  ;;  %v12258_v29 = vld [vmem:[#allocation59_spill] sm:$0xff] }
 0x678   : > { %v7916_v46 = vpop.permute.xlu0 %7915  ;;  %v10862_v22 = vadd.f32 %v6462_v32, %v6461_v11 }
 0x679   : > { %v7918_v34 = vunpack.i.h.bf16 %v7916_v46  ;;  %v7917_v52 = vunpack.i.l.bf16 %v7916_v46 }
 0x67a   : > { %2192 = vmatmul.mubr.f32.gmra.mrb[84].mxu1 %v1964_v58  ;;  %v6464_v1 = vpop.f32.mrb[114].mxu0  ;;  %v8341_v28 = vpop.eup %8340  ;;  %v7356_v58 = vpack.c.bf16 %v7938_v24, %v7937_v45  ;;  %v10905_v24 = vld [vmem:[#allocation2 + $0x8] sm:$0xff] }
 0x67b   : > { %v7344_v23 = vpack.c.bf16 %v7918_v34, %v7917_v52  ;;  %v10865_v53 = vpop.permute.xlu1 %7975  ;;  %2196 = vmatprep.mubr.f32.mxu1 %v1968_v4  ;;  %v6465_v17 = vpop.f32.mrb[115].mxu0  ;;  %v1974_v39 = vmul.f32 %v8341_v28, %v10647_v36  ;;  %v1973_v46 = vmul.f32 %v8341_v28, %v12258_v29  ;;  %v12259_v52 = vld [vmem:[#allocation40_spill] sm:$0xff]  ;;  %v12261_v28 = vld [vmem:[#allocation43_spill] sm:$0xff] }
 0x67c   : > { %v10869_v7 = vadd.f32 %v6465_v17, %v6464_v1  ;;  %v7931_v19 = vpop.permute.xlu0 %7930  ;;  %v12260_v17 = vld [vmem:[#allocation60_spill] sm:$0xff] }
 0x67d   : > { %7346 = vmatprep.subr.msk.bf16.mxu0 %vm9415_vm2, %v7344_v23  ;;  %v7933_v63 = vunpack.i.h.bf16 %v7931_v19  ;;  %v7932_v40 = vunpack.i.l.bf16 %v7931_v19  ;;  %v7947_v19 = vunpack.i.l.bf16 %v10851_v21 }
 0x67e   : > { %7349 = vmatpush3.bf16.xpose.msk.msra.mxu0 %vm9415_vm2, %v7347_v41  ;;  %2197 = vmatmul.mubr.f32.gmra.mrb[86].mxu1 %v1967_v6  ;;  %v6467_v31 = vpop.f32.mrb[116].mxu0  ;;  %v8343_v15 = vpop.eup %8342 }
 0x67f   : > { %7352 = vmatprep.subr.msk.bf16.mxu0 %vm9415_vm2, %v7350_v37  ;;  %v10878_v18 = vpop.permute.xlu1 %7985  ;;  %2201 = vmatprep.mubr.f32.mxu1 %v1971_v8  ;;  %v6468_v48 = vpop.f32.mrb[117].mxu0  ;;  %v7353_v62 = vpack.c.bf16 %v7933_v63, %v7932_v40  ;;  %v1977_v4 = vmul.f32 %v8343_v15, %v12259_v52  ;;  %v1976_v6 = vmul.f32 %v8343_v15, %v12260_v17  ;;  %v7948_v37 = vunpack.i.h.bf16 %v10851_v21  ;;  %v2222_v63 = vld [vmem:[#allocation2] sm:$0xff] }
 0x680   : > { %v10883_v38 = vadd.f32 %v6468_v48, %v6467_v31  ;;  %v7941_v34 = vpop.permute.xlu0 %7940  ;;  %v8345_v36 = vpop.eup %8344  ;;  %v12262_v48 = vld [vmem:[#allocation39_spill] sm:$0xff]  ;;  %6944 = vmatprep.subr.mxu1 %v2222_v63  ;;  %v7968_v52 = vunpack.i.h.bf16 %v10859_v13  ;;  %v7977_v17 = vunpack.i.l.bf16 %v10865_v53 }
 0x681   : > { %v7943_v23 = vunpack.i.h.bf16 %v7941_v34  ;;  %v7942_v1 = vunpack.i.l.bf16 %v7941_v34  ;;  %v1980_v31 = vmul.f32 %v8345_v36, %v12261_v28  ;;  %v7362_v45 = vpack.c.bf16 %v7948_v37, %v7947_v19  ;;  %6945 = vmatpush3.msra.mxu1 %v2222_v63 }
 0x682   : > { %2202 = vmatmul.mubr.f32.gmra.mrb[88].mxu1 %v1970_v61  ;;  %v6470_v11 = vpop.f32.mrb[118].mxu0  ;;  %v1979_v61 = vmul.f32 %v8345_v36, %v12262_v48  ;;  %6970 = vmatprep.subr.mxu1 %v10905_v24  ;;  %v7987_v63 = vunpack.i.l.bf16 %v10878_v18 }
 0x683   : > { %v10886_v10 = vpop.permute.xlu1 %4520  ;;  %2206 = vmatprep.mubr.f32.mxu1 %v1974_v39  ;;  %v6471_v32 = vpop.f32.mrb[119].mxu0  ;;  %v7359_v40 = vpack.c.bf16 %v7943_v23, %v7942_v1 }
 0x684   : > { %6695 = vmatprep.mubr.msk.f32.mxu0 %vm1435_vm1, %v10886_v10  ;;  %v10891_v16 = vadd.f32 %v6471_v32, %v6470_v11  ;;  %v7951_v39 = vpop.permute.xlu0 %7950  ;;  %v7958_v11 = vunpack.i.h.bf16 %v10855_v9 }
 0x685   : > { %v7953_v21 = vunpack.i.h.bf16 %v7951_v39  ;;  %v7952_v15 = vunpack.i.l.bf16 %v7951_v39 }
 0x686   : > { %7355 = vmatpush3.bf16.xpose.msk.msra.mxu0 %vm9415_vm2, %v7353_v62  ;;  %2207 = vmatmul.mubr.f32.gmra.mrb[90].mxu1 %v1973_v46  ;;  %v6473_v27 = vpop.f32.mrb[120].mxu0  ;;  %v7957_v62 = vunpack.i.l.bf16 %v10855_v9 }
 0x687   : > { %7358 = vmatprep.subr.msk.bf16.mxu0 %vm9415_vm2, %v7356_v58  ;;  %2211 = vmatprep.mubr.f32.mxu1 %v1977_v4  ;;  %v6474_v41 = vpop.f32.mrb[121].mxu0  ;;  %v7365_v32 = vpack.c.bf16 %v7953_v21, %v7952_v15  ;;  %v7967_v4 = vunpack.i.l.bf16 %v10859_v13 }
 0x688   : > { %v10901_v8 = vadd.f32 %v6474_v41, %v6473_v27  ;;  %v7368_v29 = vpack.c.bf16 %v7958_v11, %v7957_v62  ;;  %v7961_v46 = vpop.permute.xlu0 %7960  ;;  %v7978_v41 = vunpack.i.h.bf16 %v10865_v53 }
 0x689   : > { %v7963_v58 = vunpack.i.h.bf16 %v7961_v46  ;;  %v7962_v34 = vunpack.i.l.bf16 %v7961_v46  ;;  %v7374_v27 = vpack.c.bf16 %v7968_v52, %v7967_v4 }
 0x68a   : > { %2212 = vmatmul.mubr.f32.gmra.mrb[92].mxu1 %v1976_v6  ;;  %v7380_v37 = vpack.c.bf16 %v7978_v41, %v7977_v17 }
 0x68b   : > { %2216 = vmatprep.mubr.f32.mxu1 %v1980_v31  ;;  %v7371_v36 = vpack.c.bf16 %v7963_v58, %v7962_v34  ;;  %v7988_v31 = vunpack.i.h.bf16 %v10878_v18  ;;  %v4525_v18 = vpop.permute.xlu1 %4524 }
 0x68c   : > { %v7971_v23 = vpop.permute.xlu0 %7970 }
 0x68d   : > { %v7973_v9 = vunpack.i.h.bf16 %v7971_v23  ;;  %v7972_v1 = vunpack.i.l.bf16 %v7971_v23  ;;  %v7386_v48 = vpack.c.bf16 %v7988_v31, %v7987_v63 }
 0x68e   : > { %7361 = vmatpush3.bf16.xpose.msk.msra.mxu0 %vm9415_vm2, %v7359_v40  ;;  %2217 = vmatmul.mubr.f32.gmra.mrb[94].mxu1 %v1979_v61 }
 0x68f   : > { %7364 = vmatprep.subr.msk.bf16.mxu0 %vm9415_vm2, %v7362_v45  ;;  %v7377_v6 = vpack.c.bf16 %v7973_v9, %v7972_v1  ;;  %v4531_v52 = vpop.permute.xlu1 %4530 }
 0x690   : > { %v7981_v19 = vpop.permute.xlu0 %7980 }
 0x691   : > { %v7983_v13 = vunpack.i.h.bf16 %v7981_v19  ;;  %v7982_v28 = vunpack.i.l.bf16 %v7981_v19 }
 0x693   : > { %v7383_v40 = vpack.c.bf16 %v7983_v13, %v7982_v28  ;;  %v4537_v13 = vpop.permute.xlu1 %4536 }
 0x694   : > { %v7991_v61 = vpop.permute.xlu0 %7990 }
 0x695   : > { %v7993_v53 = vunpack.i.h.bf16 %v7991_v61  ;;  %v7992_v45 = vunpack.i.l.bf16 %v7991_v61 }
 0x696   : > { %7367 = vmatpush3.bf16.xpose.msk.msra.mxu0 %vm9415_vm2, %v7365_v32 }
 0x697   : > { %7370 = vmatprep.subr.msk.bf16.mxu0 %vm9415_vm2, %v7368_v29  ;;  %v7389_v39 = vpack.c.bf16 %v7993_v53, %v7992_v45 }
 0x698   : > { %v4523_v21 = vpop.permute.xlu0 %4522 }
 0x69c   : > { %v4527_v15 = vpop.permute.xlu0 %4526 }
 0x69e   : > { %7373 = vmatpush3.bf16.xpose.msk.msra.mxu0 %vm9415_vm2, %v7371_v36 }
 0x69f   : > { %7376 = vmatprep.subr.msk.bf16.mxu0 %vm9415_vm2, %v7374_v27 }
 0x6a0   : > { %v4529_v46 = vpop.permute.xlu0 %4528 }
 0x6a4   : > { %v4533_v36 = vpop.permute.xlu0 %4532 }
 0x6a6   : > { %7379 = vmatpush3.bf16.xpose.msk.msra.mxu0 %vm9415_vm2, %v7377_v6 }
 0x6a7   : > { %7382 = vmatprep.subr.msk.bf16.mxu0 %vm9415_vm2, %v7380_v37 }
 0x6a8   : > { %v4535_v17 = vpop.permute.xlu0 %4534 }
 0x6ac   : > { %v4539_v31 = vpop.permute.xlu0 %4538 }
 0x6ae   : > { %7385 = vmatpush3.bf16.xpose.msk.msra.mxu0 %vm9415_vm2, %v7383_v40 }
 0x6af   : > { %7388 = vmatprep.subr.msk.bf16.mxu0 %vm9415_vm2, %v7386_v48 }
 0x6b0   : > { %v4541_v45 = vpop.permute.xlu0 %4540 }
 0x6b6   : > { %7391 = vmatpush3.bf16.xpose.msk.msra.mxu0 %vm9415_vm2, %v7389_v39 }
 0x6bd   : > { %6696 = vmatmul.mubr.msk.f32.vlgmr.msra.gmra.mrb[160].mxu0 %vm1435_vm1, %v10886_v10 }
 0x6be   : > { %6697 = vmatprep.mubr.msk.f32.mxu0 %vm1435_vm1, %v4523_v21 }
 0x6c1   : > { %6698 = vmatmul.mubr.msk.f32.gmra.mrb[162].mxu0 %vm1435_vm1, %v4523_v21 }
 0x6c2   : > { %6699 = vmatprep.mubr.msk.f32.mxu0 %vm1435_vm1, %v4525_v18 }
 0x6c3   : > { %v6476_v11 = vpop.f32.mrb[122].mxu0 }
 0x6c4   : > { %v6477_v62 = vpop.f32.mrb[123].mxu0 }
 0x6c5   : > { %v10943_v32 = vadd.f32 %v6477_v62, %v6476_v11  ;;  %6700 = vmatmul.mubr.msk.f32.gmra.mrb[164].mxu0 %vm1435_vm1, %v4525_v18 }
 0x6c6   : > { %6701 = vmatprep.mubr.msk.f32.mxu0 %vm1435_vm1, %v4527_v15 }
 0x6c7   : > { %v6479_v50 = vpop.f32.mrb[124].mxu0 }
 0x6c8   : > { %v6480_v29 = vpop.f32.mrb[125].mxu0 }
 0x6c9   : > { %v10947_v10 = vadd.f32 %v6480_v29, %v6479_v50  ;;  %6702 = vmatmul.mubr.msk.f32.gmra.mrb[166].mxu0 %vm1435_vm1, %v4527_v15  ;;  %v4543_v15 = vpop.permute.xlu1 %4542  ;;  %v4545_v29 = vpop.permute.xlu0 %4544 }
 0x6ca   : > { %6703 = vmatprep.mubr.msk.f32.mxu0 %vm1435_vm1, %v4529_v46 }
 0x6cb   : > { %v6482_v58 = vpop.f32.mrb[126].mxu0 }
 0x6cc   : > { %v6483_v34 = vpop.f32.mrb[127].mxu0 }
 0x6cd   : > { %v10951_v4 = vadd.f32 %v6483_v34, %v6482_v58  ;;  %6704 = vmatmul.mubr.msk.f32.gmra.mrb[168].mxu0 %vm1435_vm1, %v4529_v46 }
 0x6ce   : > { %6705 = vmatprep.mubr.msk.f32.mxu0 %vm1435_vm1, %v4531_v52 }
 0x6cf   : > { %v10955_v27 = vpop.f32.mrb[128].mxu0 }
 0x6d0   : > { %v10957_v23 = vpop.f32.mrb[129].mxu0 }
 0x6d1   : > { %v3829_v9 = vmax.f32 %v10955_v27, %v10957_v23  ;;  %6706 = vmatmul.mubr.msk.f32.gmra.mrb[170].mxu0 %vm1435_vm1, %v4531_v52  ;;  %v4547_v52 = vpop.permute.xlu1 %4546 }
 0x6d2   : > { %6707 = vmatprep.mubr.msk.f32.mxu0 %vm1435_vm1, %v4533_v36 }
 0x6d3   : > { %3830 = vmax.xlane.f32.xlu1 %v3829_v9  ;;  %v10963_v1 = vpop.f32.mrb[130].mxu0 }
 0x6d4   : > { %v10965_v41 = vpop.f32.mrb[131].mxu0 }
 0x6d5   : > { %v3832_v6 = vmax.f32 %v10963_v1, %v10965_v41  ;;  %6708 = vmatmul.mubr.msk.f32.gmra.mrb[172].mxu0 %vm1435_vm1, %v4533_v36 }
 0x6d6   : > { %6709 = vmatprep.mubr.msk.f32.mxu0 %vm1435_vm1, %v4535_v17 }
 0x6d7   : > { %3833 = vmax.xlane.f32.xlu0 %v3832_v6  ;;  %v10971_v37 = vpop.f32.mrb[132].mxu0  ;;  %v4549_v6 = vpop.permute.xlu0 %4548 }
 0x6d8   : > { %v10973_v19 = vpop.f32.mrb[133].mxu0 }
 0x6d9   : > { %v3835_v28 = vmax.f32 %v10971_v37, %v10973_v19  ;;  %6710 = vmatmul.mubr.msk.f32.gmra.mrb[174].mxu0 %vm1435_vm1, %v4535_v17 }
 0x6da   : > { %6711 = vmatprep.mubr.msk.f32.mxu0 %vm1435_vm1, %v4537_v13 }
 0x6db   : > { %3836 = vmax.xlane.f32.xlu0 %v3835_v28  ;;  %v10979_v63 = vpop.f32.mrb[134].mxu0  ;;  %v7996_v59 = vpop.permute.xlu0 %7995 }
 0x6dc   : > { %v10981_v40 = vpop.f32.mrb[135].mxu0  ;;  %v7998_v44 = vunpack.i.h.bf16 %v7996_v59  ;;  %v7997_v3 = vunpack.i.l.bf16 %v7996_v59 }
 0x6dd   : > { %v3838_v48 = vmax.f32 %v10979_v63, %v10981_v40  ;;  %6712 = vmatmul.mubr.msk.f32.gmra.mrb[176].mxu0 %vm1435_vm1, %v4537_v13 }
 0x6de   : > { %6713 = vmatprep.mubr.msk.f32.mxu0 %vm1435_vm1, %v4539_v31 }
 0x6df   : > { %3839 = vmax.xlane.f32.xlu1 %v3838_v48  ;;  %v10987_v61 = vpop.f32.mrb[136].mxu0  ;;  %v4551_v48 = vpop.permute.xlu1 %4550 }
 0x6e0   : > { %v10989_v53 = vpop.f32.mrb[137].mxu0 }
 0x6e1   : > { %v3841_v39 = vmax.f32 %v10987_v61, %v10989_v53  ;;  %6714 = vmatmul.mubr.msk.f32.gmra.mrb[178].mxu0 %vm1435_vm1, %v4539_v31 }
 0x6e2   : > { %6715 = vmatprep.mubr.msk.f32.mxu0 %vm1435_vm1, %v4541_v45 }
 0x6e3   : > { %3842 = vmax.xlane.f32.xlu0 %v3841_v39  ;;  %v10995_v21 = vpop.f32.mrb[138].mxu0 }
 0x6e4   : > { %v10997_v18 = vpop.f32.mrb[139].mxu0 }
 0x6e5   : > { %v3844_v11 = vmax.f32 %v10995_v21, %v10997_v18  ;;  %6716 = vmatmul.mubr.msk.f32.gmra.mrb[180].mxu0 %vm1435_vm1, %v4541_v45 }
 0x6e6   : > { %6717 = vmatprep.mubr.msk.f32.mxu0 %vm1435_vm1, %v4543_v15 }
 0x6e7   : > { %3845 = vmax.xlane.f32.xlu0 %v3844_v11  ;;  %v11003_v62 = vpop.f32.mrb[140].mxu0 }
 0x6e8   : > { %v11005_v50 = vpop.f32.mrb[141].mxu0 }
 0x6e9   : > { %v3847_v46 = vmax.f32 %v11003_v62, %v11005_v50  ;;  %6718 = vmatmul.mubr.msk.f32.gmra.mrb[182].mxu0 %vm1435_vm1, %v4543_v15 }
 0x6ea   : > { %6719 = vmatprep.mubr.msk.f32.mxu0 %vm1435_vm1, %v4545_v29 }
 0x6eb   : > { %3848 = vmax.xlane.f32.xlu1 %v3847_v46  ;;  %v11011_v58 = vpop.f32.mrb[142].mxu0 }
 0x6ec   : > { %v11013_v34 = vpop.f32.mrb[143].mxu0 }
 0x6ed   : > { %v3850_v36 = vmax.f32 %v11011_v58, %v11013_v34  ;;  %6720 = vmatmul.mubr.msk.f32.gmra.mrb[184].mxu0 %vm1435_vm1, %v4545_v29 }
 0x6ee   : > { %6721 = vmatprep.mubr.msk.f32.mxu0 %vm1435_vm1, %v4547_v52 }
 0x6ef   : > { %3851 = vmax.xlane.f32.xlu0 %v3850_v36  ;;  %v11019_v9 = vpop.f32.mrb[144].mxu0 }
 0x6f0   : > { %v11021_v17 = vpop.f32.mrb[145].mxu0 }
 0x6f1   : > { %v3853_v13 = vmax.f32 %v11019_v9, %v11021_v17  ;;  %6722 = vmatmul.mubr.msk.f32.gmra.mrb[186].mxu0 %vm1435_vm1, %v4547_v52 }
 0x6f2   : > { %6723 = vmatprep.mubr.msk.f32.mxu0 %vm1435_vm1, %v4549_v6 }
 0x6f3   : > { %3854 = vmax.xlane.f32.xlu1 %v3853_v13  ;;  %v11027_v28 = vpop.f32.mrb[146].mxu0 }
 0x6f4   : > { %v11029_v31 = vpop.f32.mrb[147].mxu0 }
 0x6f5   : > { %12263 = vst [vmem:[#allocation61_spill] sm:$0xff] %v11029_v31  ;;  %v3856_v45 = vmax.f32 %v11027_v28, %v11029_v31  ;;  %6724 = vmatmul.mubr.msk.f32.gmra.mrb[188].mxu0 %vm1435_vm1, %v4549_v6 }
 0x6f6   : > { %6725 = vmatprep.mubr.msk.f32.mxu0 %vm1435_vm1, %v4551_v48 }
 0x6f7   : > { %v11035_v39 = vpop.f32.mrb[148].mxu0 }
 0x6f8   : > { %12264 = vst [vmem:[#allocation45_spill] sm:$0xff] %v11035_v39  ;;  %v11037_v15 = vpop.f32.mrb[149].mxu0 }
 0x6f9   : > { %12265 = vst [vmem:[#allocation62_spill] sm:$0xff] %v11037_v15  ;;  %v3859_v11 = vmax.f32 %v11035_v39, %v11037_v15  ;;  %6726 = vmatmul.mubr.msk.f32.gmra.mrb[190].mxu0 %vm1435_vm1, %v4551_v48 }
 0x6fc   : > { %v11042_v29 = vpop.f32.mrb[150].mxu0 }
 0x6fd   : > { %12266 = vst [vmem:[#allocation63_spill] sm:$0xff] %v11042_v29  ;;  %v11044_v46 = vpop.f32.mrb[151].mxu0 }
 0x6fe   : > { %12267 = vst [vmem:[#allocation64_spill] sm:$0xff] %v11044_v46  ;;  %v3862_v52 = vmax.f32 %v11042_v29, %v11044_v46 }
 0x700   : > { %v11048_v36 = vpop.f32.mrb[152].mxu0 }
 0x701   : > { %12268 = vst [vmem:[#allocation41_spill] sm:$0xff] %v11048_v36  ;;  %v11050_v6 = vpop.f32.mrb[153].mxu0 }
 0x702   : > { %12269 = vst [vmem:[#allocation47_spill] sm:$0xff] %v11050_v6  ;;  %v3865_v13 = vmax.f32 %v11048_v36, %v11050_v6 }
 0x704   : > { %v11054_v47 = vpop.f32.mrb[154].mxu0  ;;  %8050 = vrot.lane.b32.xlu1 %v12179_v60, %s8643_s24 }
 0x705   : > { %12270 = vst [vmem:[#allocation42_spill] sm:$0xff] %v11054_v47  ;;  %v11058_v48 = vpop.f32.mrb[155].mxu0  ;;  %8055 = vrot.lane.b32.xlu0 %v12181_v56, %s8643_s24  ;;  %v6276_v49 = vpop.f32.mrb[64].mxu1 }
 0x706   : > { %12271 = vst [vmem:[#allocation44_spill] sm:$0xff] %v11058_v48  ;;  %v3868_v57 = vmax.f32 %v11054_v47, %v11058_v48  ;;  %v6277_v30 = vpop.f32.mrb[65].mxu1 }
 0x707   : > { %v6278_v12 = vadd.f32 %v6277_v30, %v6276_v49  ;;  %v7312_v49 = vpack.c.bf16 %v7998_v44, %v7997_v3 }
 0x708   : > { %v11064_v55 = vpop.f32.mrb[156].mxu0 }
 0x709   : > { %12272 = vst [vmem:[#allocation15_spill] sm:$0xff] %v11064_v55  ;;  %v11066_v43 = vpop.f32.mrb[157].mxu0  ;;  %v6279_v0 = vpop.f32.mrb[66].mxu1  ;;  %6946 = vmatprep.mubr.msk.f32.mxu1 %vm1435_vm1, %v6278_v12 }
 0x70a   : > { %12273 = vst [vmem:[#allocation89_spill] sm:$0xff] %v11066_v43  ;;  %v3871_v60 = vmax.f32 %v11064_v55, %v11066_v43  ;;  %v6280_v56 = vpop.f32.mrb[67].mxu1 }
 0x70b   : > { %v6281_v6 = vadd.f32 %v6280_v56, %v6279_v0 }
 0x70c   : > { %v11071_v36 = vpop.f32.mrb[158].mxu0 }
 0x70d   : > { %12274 = vst [vmem:[#allocation65_spill] sm:$0xff] %v11071_v36  ;;  %v11073_v46 = vpop.f32.mrb[159].mxu0  ;;  %v6282_v48 = vpop.f32.mrb[68].mxu1  ;;  %6947 = vmatmul.mubr.msk.f32.vlgmr.msra.gmra.mrb[0].mxu1 %vm1435_vm1, %v6281_v6 }
 0x70e   : > { %12275 = vst [vmem:[#allocation66_spill] sm:$0xff] %v11073_v46  ;;  %v3874_v59 = vmax.f32 %v11071_v36, %v11073_v46  ;;  %6971 = vmatpush3.msra.mxu1 %v10905_v24  ;;  %v6283_v30 = vpop.f32.mrb[69].mxu1 }
 0x70f   : > { %v6284_v12 = vadd.f32 %v6283_v30, %v6282_v48  ;;  %7313 = vmatprep.subr.bf16.mxu1 %v7312_v49 }
 0x711   : > { %v6285_v47 = vpop.f32.mrb[70].mxu1  ;;  %6949 = vmatprep.mubr.msk.f32.mxu1 %vm1435_vm1, %v6284_v12 }
 0x712   : > { %v6286_v56 = vpop.f32.mrb[71].mxu1 }
 0x713   : > { %v6287_v0 = vadd.f32 %v6286_v56, %v6285_v47 }
 0x715   : > { %v6288_v43 = vpop.f32.mrb[72].mxu1  ;;  %6950 = vmatmul.mubr.msk.f32.gmra.mrb[2].mxu1 %vm1435_vm1, %v6287_v0 }
 0x716   : > { %v6289_v55 = vpop.f32.mrb[73].mxu1 }
 0x717   : > { %v6290_v29 = vadd.f32 %v6289_v55, %v6288_v43 }
 0x719   : > { %6952 = vmatprep.mubr.msk.f32.mxu1 %vm1435_vm1, %v6290_v29  ;;  %v8001_v29 = vpop.permute.xlu0 %8000 }
 0x71a   : > { %v8003_v39 = vunpack.i.h.bf16 %v8001_v29 }
 0x71d   : > { %v11089_v56 = vpop.permute.xlu0 %8010 }
 0x724   : > { %3857 = vmax.xlane.f32.xlu0 %v3856_v45  ;;  %v8006_v45 = vpop.permute.xlu1 %8005 }
 0x728   : > { %3860 = vmax.xlane.f32.xlu1 %v3859_v11  ;;  %3863 = vmax.xlane.f32.xlu0 %v3862_v52 }
 0x72c   : > { %3866 = vmax.xlane.f32.xlu1 %v3865_v13  ;;  %3869 = vmax.xlane.f32.xlu0 %v3868_v57  ;;  %v11086_v13 = vpop.permute.xlu1 %8015 }
 0x730   : > { %3872 = vmax.xlane.f32.xlu0 %v3871_v60 }
 0x734   : > { %3875 = vmax.xlane.f32.xlu0 %v3874_v59 }
 0x735   : > { %v6291_v44 = vpop.f32.mrb[74].mxu1 }
 0x736   : > { %v6292_v3 = vpop.f32.mrb[75].mxu1 }
 0x737   : > { %v6293_v24 = vadd.f32 %v6292_v3, %v6291_v44  ;;  %v11091_v3 = vpop.permute.xlu1 %8020 }
 0x739   : > { %6953 = vmatmul.mubr.msk.f32.gmra.mrb[4].mxu1 %vm1435_vm1, %v6293_v24 }
 0x73d   : > { %v6294_v47 = vpop.f32.mrb[76].mxu1 }
 0x73e   : > { %v6295_v6 = vpop.f32.mrb[77].mxu1 }
 0x73f   : > { %v6296_v48 = vadd.f32 %v6295_v6, %v6294_v47 }
 0x741   : > { %v6297_v49 = vpop.f32.mrb[78].mxu1  ;;  %6955 = vmatprep.mubr.msk.f32.mxu1 %vm1435_vm1, %v6296_v48  ;;  %v11094_v48 = vpop.permute.xlu0 %8025 }
 0x742   : > { %v6298_v55 = vpop.f32.mrb[79].mxu1 }
 0x743   : > { %v6299_v43 = vadd.f32 %v6298_v55, %v6297_v49  ;;  %v11097_v55 = vpop.permute.xlu1 %8040 }
 0x745   : > { %v6300_v11 = vpop.f32.mrb[80].mxu1  ;;  %6956 = vmatmul.mubr.msk.f32.gmra.mrb[6].mxu1 %vm1435_vm1, %v6299_v43 }
 0x746   : > { %v6301_v57 = vpop.f32.mrb[81].mxu1 }
 0x747   : > { %v6302_v60 = vadd.f32 %v6301_v57, %v6300_v11 }
 0x749   : > { %v6303_v52 = vpop.f32.mrb[82].mxu1  ;;  %6958 = vmatprep.mubr.msk.f32.mxu1 %vm1435_vm1, %v6302_v60  ;;  %v11100_v60 = vpop.permute.xlu0 %8030 }
 0x74a   : > { %v6304_v59 = vpop.f32.mrb[83].mxu1 }
 0x74b   : > { %v6305_v30 = vadd.f32 %v6304_v59, %v6303_v52 }
 0x74d   : > { %v6306_v12 = vpop.f32.mrb[84].mxu1  ;;  %6959 = vmatmul.mubr.msk.f32.gmra.mrb[8].mxu1 %vm1435_vm1, %v6305_v30  ;;  %v11102_v30 = vpop.permute.xlu1 %8045 }
 0x74e   : > { %v6307_v0 = vpop.f32.mrb[85].mxu1 }
 0x74f   : > { %v6308_v44 = vadd.f32 %v6307_v0, %v6306_v12 }
 0x751   : > { %v6309_v24 = vpop.f32.mrb[86].mxu1  ;;  %6961 = vmatprep.mubr.msk.f32.mxu1 %vm1435_vm1, %v6308_v44 }
 0x752   : > { %v6310_v47 = vpop.f32.mrb[87].mxu1 }
 0x753   : > { %v6311_v6 = vadd.f32 %v6310_v47, %v6309_v24  ;;  %v11105_v24 = vpop.permute.xlu0 %8035 }
 0x755   : > { %v6312_v49 = vpop.f32.mrb[88].mxu1  ;;  %6962 = vmatmul.mubr.msk.f32.gmra.mrb[10].mxu1 %vm1435_vm1, %v6311_v6 }
 0x756   : > { %v6313_v43 = vpop.f32.mrb[89].mxu1 }
 0x757   : > { %v6314_v11 = vadd.f32 %v6313_v43, %v6312_v49 }
 0x759   : > { %v6315_v57 = vpop.f32.mrb[90].mxu1  ;;  %6964 = vmatprep.mubr.msk.f32.mxu1 %vm1435_vm1, %v6314_v11  ;;  %v8008_v11 = vunpack.i.h.bf16 %v8006_v45 }
 0x75a   : > { %v6316_v52 = vpop.f32.mrb[91].mxu1 }
 0x75b   : > { %v6317_v59 = vadd.f32 %v6316_v52, %v6315_v57  ;;  %v8007_v57 = vunpack.i.l.bf16 %v8006_v45 }
 0x75d   : > { %v6318_v12 = vpop.f32.mrb[92].mxu1  ;;  %6965 = vmatmul.mubr.msk.f32.gmra.mrb[12].mxu1 %vm1435_vm1, %v6317_v59  ;;  %v8002_v59 = vunpack.i.l.bf16 %v8001_v29  ;;  %v8013_v29 = vunpack.i.h.bf16 %v11089_v56 }
 0x75e   : > { %v6319_v0 = vpop.f32.mrb[93].mxu1 }
 0x75f   : > { %v6320_v44 = vadd.f32 %v6319_v0, %v6318_v12 }
 0x760   : > { %v3831_v47 = vpop.xlane.xlu1 %3830 }
 0x761   : > { %v3877_v6 = vsub.f32 %v10955_v27, %v3831_v47  ;;  %v3878_v49 = vsub.f32 %v10957_v23, %v3831_v47  ;;  %v6321_v43 = vpop.f32.mrb[94].mxu1  ;;  %6967 = vmatprep.mubr.msk.f32.mxu1 %vm1435_vm1, %v6320_v44  ;;  %v7316_v27 = vpack.c.bf16 %v8008_v11, %v8007_v57  ;;  %v8018_v44 = vunpack.i.h.bf16 %v11086_v13 }
 0x762   : > { %v6322_v46 = vpop.f32.mrb[95].mxu1  ;;  %v8012_v47 = vunpack.i.l.bf16 %v11089_v56 }
 0x763   : > { %v3909_v52 = vmul.f32 1.442695, %v3877_v6  ;;  %v3911_v36 = vmul.f32 1.442695, %v3878_v49  ;;  %v6323_v15 = vadd.f32 %v6322_v46, %v6321_v43  ;;  %v7314_v46 = vpack.c.bf16 %v8003_v39, %v8002_v59 }
 0x764   : > { %v3834_v31 = vpop.xlane.xlu0 %3833  ;;  %v8028_v39 = vunpack.i.h.bf16 %v11094_v48  ;;  %v8037_v59 = vunpack.i.l.bf16 %v11105_v24 }
 0x765   : > { %8346 = vpow2.f32 %v3909_v52  ;;  %v3879_v12 = vsub.f32 %v10963_v1, %v3834_v31  ;;  %v3880_v0 = vsub.f32 %v10965_v41, %v3834_v31  ;;  %6968 = vmatmul.mubr.msk.f32.gmra.mrb[14].mxu1 %vm1435_vm1, %v6323_v15  ;;  %v8017_v1 = vunpack.i.l.bf16 %v11086_v13 }
 0x766   : > { %8348 = vpow2.f32 %v3911_v36  ;;  %6972 = vmatprep.mubr.msk.f32.mxu1 %vm1435_vm1, %v10782_v33  ;;  %v8023_v33 = vunpack.i.h.bf16 %v11091_v3  ;;  %v8022_v15 = vunpack.i.l.bf16 %v11091_v3  ;;  %v8027_v36 = vunpack.i.l.bf16 %v11094_v48 }
 0x767   : > { %v3913_v23 = vmul.f32 1.442695, %v3879_v12  ;;  %v3915_v45 = vmul.f32 1.442695, %v3880_v0  ;;  %v7320_v49 = vpack.c.bf16 %v8018_v44, %v8017_v1 }
 0x768   : > { %v3837_v6 = vpop.xlane.xlu0 %3836  ;;  %v7322_v48 = vpack.c.bf16 %v8023_v33, %v8022_v15  ;;  %v7324_v43 = vpack.c.bf16 %v8028_v39, %v8027_v36 }
 0x769   : > { %8350 = vpow2.f32 %v3913_v23  ;;  %v3881_v41 = vsub.f32 %v10971_v37, %v3837_v6  ;;  %v3882_v31 = vsub.f32 %v10973_v19, %v3837_v6  ;;  %6973 = vmatmul.mubr.msk.f32.vlgmr.msra.gmra.mrb[0].mxu1 %vm1435_vm1, %v10795_v25  ;;  %v7318_v19 = vpack.c.bf16 %v8013_v29, %v8012_v47 }
 0x76a   : > { %8352 = vpow2.f32 %v3915_v45  ;;  %7315 = vmatpush3.bf16.msra.mxu1 %v7314_v46  ;;  %6975 = vmatprep.mubr.msk.f32.mxu1 %vm1435_vm1, %v10805_v20  ;;  %v8048_v45 = vunpack.i.h.bf16 %v11102_v30  ;;  %v8047_v46 = vunpack.i.l.bf16 %v11102_v30 }
 0x76b   : > { %v3917_v13 = vmul.f32 1.442695, %v3881_v41  ;;  %v3919_v37 = vmul.f32 1.442695, %v3882_v31  ;;  %7317 = vmatprep.subr.bf16.mxu1 %v7316_v27 }
 0x76c   : > { %v3840_v56 = vpop.xlane.xlu1 %3839  ;;  %v7332_v1 = vpack.c.bf16 %v8048_v45, %v8047_v46 }
 0x76d   : > { %8354 = vpow2.f32 %v3917_v13  ;;  %v3883_v25 = vsub.f32 %v10979_v63, %v3840_v56  ;;  %v3884_v3 = vsub.f32 %v10981_v40, %v3840_v56  ;;  %6976 = vmatmul.mubr.msk.f32.gmra.mrb[2].mxu1 %vm1435_vm1, %v10813_v35  ;;  %v8033_v63 = vunpack.i.h.bf16 %v11100_v60 }
 0x76e   : > { %8356 = vpow2.f32 %v3919_v37  ;;  %7319 = vmatpush3.bf16.msra.mxu1 %v7318_v19  ;;  %6978 = vmatprep.mubr.msk.f32.mxu1 %vm1435_vm1, %v10819_v2  ;;  %v8032_v40 = vunpack.i.l.bf16 %v11100_v60  ;;  %v8038_v35 = vunpack.i.h.bf16 %v11105_v24 }
 0x76f   : > { %v11135_v20 = vpop.eup %8346  ;;  %v3921_v11 = vmul.f32 1.442695, %v3883_v25  ;;  %v3923_v57 = vmul.f32 1.442695, %v3884_v3  ;;  %7321 = vmatprep.subr.bf16.mxu1 %v7320_v49 }
 0x770   : > { %v11137_v52 = vpop.eup %8348  ;;  %v3843_v12 = vpop.xlane.xlu0 %3842  ;;  %v7326_v44 = vpack.c.bf16 %v8033_v63, %v8032_v40  ;;  %v7328_v29 = vpack.c.bf16 %v8038_v35, %v8037_v59 }
 0x771   : > { %8358 = vpow2.f32 %v3921_v11  ;;  %v3885_v2 = vsub.f32 %v10987_v61, %v3843_v12  ;;  %v3886_v0 = vsub.f32 %v10989_v53, %v3843_v12  ;;  %6979 = vmatmul.mubr.msk.f32.gmra.mrb[4].mxu1 %vm1435_vm1, %v10824_v42  ;;  %v3973_v27 = vadd.f32 %v11137_v52, %v11135_v20 }
 0x772   : > { %8360 = vpow2.f32 %v3923_v57  ;;  %7323 = vmatpush3.bf16.msra.mxu1 %v7322_v48  ;;  %6981 = vmatprep.mubr.msk.f32.mxu1 %vm1435_vm1, %v10828_v51  ;;  %v8043_v53 = vunpack.i.h.bf16 %v11097_v55  ;;  %v8042_v42 = vunpack.i.l.bf16 %v11097_v55 }
 0x773   : > { %v11151_v60 = vpop.eup %8350  ;;  %v3925_v24 = vmul.f32 1.442695, %v3885_v2  ;;  %v3927_v23 = vmul.f32 1.442695, %v3886_v0  ;;  %3974 = vadd.xlane.f32.xlu0 %v3973_v27  ;;  %7325 = vmatprep.subr.bf16.mxu1 %v7324_v43  ;;  %v12289_v43 = vld [vmem:[#allocation44_spill] sm:$0xff] }
 0x774   : > { %v11153_v61 = vpop.eup %8352  ;;  %v7330_v30 = vpack.c.bf16 %v8043_v53, %v8042_v42  ;;  %v3846_v6 = vpop.xlane.xlu0 %3845 }
 0x775   : > { %8362 = vpow2.f32 %v3925_v24  ;;  %6982 = vmatmul.mubr.msk.f32.gmra.mrb[6].mxu1 %vm1435_vm1, %v10832_v54  ;;  %v3976_v51 = vadd.f32 %v11153_v61, %v11151_v60  ;;  %v3887_v40 = vsub.f32 %v10995_v21, %v3846_v6  ;;  %v3888_v59 = vsub.f32 %v10997_v18, %v3846_v6 }
 0x776   : > { %8364 = vpow2.f32 %v3927_v23  ;;  %7327 = vmatpush3.bf16.msra.mxu1 %v7326_v44  ;;  %6984 = vmatprep.mubr.msk.f32.mxu1 %vm1435_vm1, %v10862_v22 }
 0x777   : > { %v11165_v47 = vpop.eup %8354  ;;  %3977 = vadd.xlane.f32.xlu1 %v3976_v51  ;;  %7329 = vmatprep.subr.bf16.mxu1 %v7328_v29  ;;  %v3929_v27 = vmul.f32 1.442695, %v3887_v40  ;;  %v3931_v53 = vmul.f32 1.442695, %v3888_v59 }
 0x778   : > { %v11167_v55 = vpop.eup %8356  ;;  %v11179_v31 = vpop.xlane.xlu1 %3848 }
 0x779   : > { %6985 = vmatmul.mubr.msk.f32.gmra.mrb[8].mxu1 %vm1435_vm1, %v10869_v7  ;;  %v3979_v54 = vadd.f32 %v11167_v55, %v11165_v47  ;;  %8366 = vpow2.f32 %v3929_v27  ;;  %v3890_v51 = vsub.f32 %v11005_v50, %v11179_v31 }
 0x77a   : > { %7331 = vmatpush3.bf16.msra.mxu1 %v7330_v30  ;;  %6987 = vmatprep.mubr.msk.f32.mxu1 %vm1435_vm1, %v10883_v38  ;;  %8368 = vpow2.f32 %v3931_v53 }
 0x77b   : > { %v11175_v22 = vpop.eup %8358  ;;  %3980 = vadd.xlane.f32.xlu1 %v3979_v54  ;;  %7333 = vmatprep.subr.bf16.mxu1 %v7332_v1 }
 0x77c   : > { %v11177_v41 = vpop.eup %8360  ;;  %v3852_v33 = vpop.xlane.xlu0 %3851 }
 0x77d   : > { %6988 = vmatmul.mubr.msk.f32.gmra.mrb[10].mxu1 %vm1435_vm1, %v10891_v16  ;;  %v3982_v7 = vadd.f32 %v11177_v41, %v11175_v22  ;;  %v3891_v0 = vsub.f32 %v11011_v58, %v3852_v33  ;;  %v3892_v24 = vsub.f32 %v11013_v34, %v3852_v33  ;;  %v3889_v58 = vsub.f32 %v11003_v62, %v11179_v31  ;;  %v12293_v62 = vld [vmem:[#allocation89_spill] sm:$0xff] }
 0x77e   : > { %6990 = vmatprep.mubr.msk.f32.mxu1 %vm1435_vm1, %v10901_v8  ;;  %v3935_v33 = vmul.f32 1.442695, %v3890_v51 }
 0x77f   : > { %v11187_v15 = vpop.eup %8362  ;;  %3983 = vadd.xlane.f32.xlu0 %v3982_v7  ;;  %v3937_v45 = vmul.f32 1.442695, %v3891_v0  ;;  %v3939_v44 = vmul.f32 1.442695, %v3892_v24 }
 0x780   : > { %v11189_v38 = vpop.eup %8364  ;;  %v3855_v39 = vpop.xlane.xlu1 %3854 }
 0x781   : > { %v8056_v36 = vpop.permute.xlu0 %8055  ;;  %6991 = vmatmul.mubr.msk.f32.gmra.mrb[12].mxu1 %vm1435_vm1, %v10943_v32  ;;  %v3985_v13 = vadd.f32 %v11189_v38, %v11187_v15  ;;  %v3893_v18 = vsub.f32 %v11019_v9, %v3855_v39  ;;  %v3894_v46 = vsub.f32 %v11021_v17, %v3855_v39  ;;  %8370 = vpow2.f32 %v3937_v45 }
 0x782   : > { %6993 = vmatprep.mubr.msk.f32.mxu1 %vm1435_vm1, %v10947_v10  ;;  %v8058_v16 = vunpack.i.h.bf16 %v8056_v36  ;;  %v8057_v37 = vunpack.i.l.bf16 %v8056_v36  ;;  %8372 = vpow2.f32 %v3939_v44  ;;  %v3933_v17 = vmul.f32 1.442695, %v3889_v58  ;;  %v12280_v58 = vld [vmem:[#allocation45_spill] sm:$0xff] }
 0x783   : > { %3986 = vadd.xlane.f32.xlu1 %v3985_v13  ;;  %v3941_v9 = vmul.f32 1.442695, %v3893_v18  ;;  %v3943_v6 = vmul.f32 1.442695, %v3894_v46  ;;  %v11261_v31 = vpop.eup %8366 }
 0x784   : > { %v8051_v8 = vpop.permute.xlu1 %8050  ;;  %v7336_v25 = vpack.c.bf16 %v8058_v16, %v8057_v37  ;;  %v11265_v36 = vpop.eup %8368 }
 0x785   : > { %v8053_v19 = vunpack.i.h.bf16 %v8051_v8  ;;  %v8052_v56 = vunpack.i.l.bf16 %v8051_v8  ;;  %6994 = vmatmul.mubr.msk.f32.gmra.mrb[14].mxu1 %vm1435_vm1, %v10951_v4  ;;  %8374 = vpow2.f32 %v3941_v9  ;;  %v3988_v59 = vadd.f32 %v11265_v36, %v11261_v31  ;;  %v12281_v9 = vld [vmem:[#allocation62_spill] sm:$0xff] }
 0x786   : > { %8376 = vpow2.f32 %v3943_v6 }
 0x787   : > { %v7334_v49 = vpack.c.bf16 %v8053_v19, %v8052_v56  ;;  %8378 = vpow2.f32 %v3933_v17 }
 0x788   : > { %8380 = vpow2.f32 %v3935_v33 }
 0x789   : > { %7335 = vmatpush3.bf16.msra.mxu1 %v7334_v49 }
 0x78a   : > { %7337 = vmatprep.subr.bf16.mxu1 %v7336_v25  ;;  %v12277_v25 = vld [vmem:[#allocation61_spill] sm:$0xff] }
 0x78b   : > { %v11269_v16 = vpop.eup %8370 }
 0x78c   : > { %v11273_v19 = vpop.eup %8372 }
 0x78d   : > { %v3994_v44 = vadd.f32 %v11273_v19, %v11269_v16 }
 0x78f   : > { %v11283_v53 = vpop.eup %8374 }
 0x790   : > { %v11199_v32 = vpop.f32.mrb[160].mxu0  ;;  %v11289_v46 = vpop.eup %8376 }
 0x791   : > { %v11201_v3 = vpop.f32.mrb[161].mxu0  ;;  %v11295_v33 = vpop.eup %8378 }
 0x794   : > { %v11205_v48 = vpop.f32.mrb[162].mxu0  ;;  %8065 = vrot.lane.b32.xlu1 %v12180_v14, %s8643_s24 }
 0x795   : > { %8060 = vrot.lane.b32.xlu0 %v12178_v26, %s8643_s24  ;;  %v11211_v4 = vpop.f32.mrb[163].mxu0 }
 0x798   : > { %v11215_v11 = vpop.f32.mrb[164].mxu0  ;;  %8070 = vrot.lane.b32.xlu1 %v12182_v5, %s8643_s24  ;;  %s8645_s24 = smov [#allocation5]  }
 0x799   : > { %v11219_v57 = vpop.f32.mrb[165].mxu0 }
 0x79c   : > { %v11224_v35 = vpop.f32.mrb[166].mxu0 }
 0x79d   : > { %v11227_v12 = vpop.f32.mrb[167].mxu0 }
 0x7a0   : > { %v11233_v23 = vpop.f32.mrb[168].mxu0 }
 0x7a1   : > { %v11235_v42 = vpop.f32.mrb[169].mxu0 }
 0x7a4   : > { %v11241_v29 = vpop.f32.mrb[170].mxu0 }
 0x7a5   : > { %v11245_v34 = vpop.f32.mrb[171].mxu0 }
 0x7a8   : > { %v11251_v1 = vpop.f32.mrb[172].mxu0 }
 0x7a9   : > { %v11253_v54 = vpop.f32.mrb[173].mxu0 }
 0x7ac   : > { %v11257_v7 = vpop.f32.mrb[174].mxu0 }
 0x7ad   : > { %v11259_v50 = vpop.f32.mrb[175].mxu0 }
 0x7b0   : > { %v11267_v13 = vpop.f32.mrb[176].mxu0 }
 0x7b1   : > { %v11271_v37 = vpop.f32.mrb[177].mxu0  ;;  %v3858_v8 = vpop.xlane.xlu0 %3857 }
 0x7b2   : > { %12276 = vst [vmem:[#allocation90_spill] sm:$0xff] %v11271_v37  ;;  %v3895_v49 = vsub.f32 %v11027_v28, %v3858_v8  ;;  %v3896_v40 = vsub.f32 %v12277_v25, %v3858_v8  ;;  %v12282_v8 = vld [vmem:[#allocation63_spill] sm:$0xff]  ;;  %v12283_v25 = vld [vmem:[#allocation64_spill] sm:$0xff] }
 0x7b4   : > { %v3945_v0 = vmul.f32 1.442695, %v3895_v49  ;;  %v3947_v27 = vmul.f32 1.442695, %v3896_v40  ;;  %3989 = vadd.xlane.f32.xlu0 %v3988_v59  ;;  %v11281_v24 = vpop.f32.mrb[178].mxu0  ;;  %v11299_v59 = vpop.eup %8380 }
 0x7b5   : > { %12278 = vst [vmem:[#allocation69_spill] sm:$0xff] %v11281_v24  ;;  %v11285_v45 = vpop.f32.mrb[179].mxu0  ;;  %v3861_v18 = vpop.xlane.xlu1 %3860 }
 0x7b6   : > { %12279 = vst [vmem:[#allocation70_spill] sm:$0xff] %v11285_v45  ;;  %8382 = vpow2.f32 %v3945_v0  ;;  %v3897_v51 = vsub.f32 %v12280_v58, %v3861_v18  ;;  %v3898_v6 = vsub.f32 %v12281_v9, %v3861_v18  ;;  %v3864_v17 = vpop.xlane.xlu0 %3863  ;;  %v3997_v9 = vadd.f32 %v11289_v46, %v11283_v53 }
 0x7b7   : > { %8384 = vpow2.f32 %v3947_v27  ;;  %v3899_v49 = vsub.f32 %v12282_v8, %v3864_v17  ;;  %v3900_v40 = vsub.f32 %v12283_v25, %v3864_v17  ;;  %v12286_v17 = vld [vmem:[#allocation41_spill] sm:$0xff]  ;;  %v12287_v25 = vld [vmem:[#allocation47_spill] sm:$0xff] }
 0x7b8   : > { %v3949_v21 = vmul.f32 1.442695, %v3897_v51  ;;  %v3951_v2 = vmul.f32 1.442695, %v3898_v6  ;;  %3995 = vadd.xlane.f32.xlu0 %v3994_v44  ;;  %v11301_v0 = vpop.f32.mrb[180].mxu0  ;;  %v12288_v44 = vld [vmem:[#allocation42_spill] sm:$0xff] }
 0x7b9   : > { %12284 = vst [vmem:[#allocation94_spill] sm:$0xff] %v11301_v0  ;;  %v3953_v28 = vmul.f32 1.442695, %v3899_v49  ;;  %v3955_v63 = vmul.f32 1.442695, %v3900_v40  ;;  %v11303_v58 = vpop.f32.mrb[181].mxu0  ;;  %v3867_v18 = vpop.xlane.xlu1 %3866  ;;  %v3991_v49 = vadd.f32 %v11299_v59, %v11295_v33 }
 0x7ba   : > { %12285 = vst [vmem:[#allocation67_spill] sm:$0xff] %v11303_v58  ;;  %8386 = vpow2.f32 %v3949_v21  ;;  %v3901_v8 = vsub.f32 %v12286_v17, %v3867_v18  ;;  %v3902_v51 = vsub.f32 %v12287_v25, %v3867_v18  ;;  %v3870_v6 = vpop.xlane.xlu0 %3869 }
 0x7bb   : > { %8388 = vpow2.f32 %v3951_v2  ;;  %v3903_v56 = vsub.f32 %v12288_v44, %v3870_v6  ;;  %v3904_v39 = vsub.f32 %v12289_v43, %v3870_v6  ;;  %v12292_v44 = vld [vmem:[#allocation15_spill] sm:$0xff] }
 0x7bc   : > { %8390 = vpow2.f32 %v3953_v28  ;;  %v3957_v40 = vmul.f32 1.442695, %v3901_v8  ;;  %3998 = vadd.xlane.f32.xlu0 %v3997_v9  ;;  %v11315_v21 = vpop.f32.mrb[182].mxu0  ;;  %v3959_v27 = vmul.f32 1.442695, %v3902_v51  ;;  %3992 = vadd.xlane.f32.xlu1 %v3991_v49 }
 0x7bd   : > { %12290 = vst [vmem:[#allocation68_spill] sm:$0xff] %v11315_v21  ;;  %8392 = vpow2.f32 %v3955_v63  ;;  %v11317_v17 = vpop.f32.mrb[183].mxu0  ;;  %v3961_v18 = vmul.f32 1.442695, %v3903_v56  ;;  %v3963_v43 = vmul.f32 1.442695, %v3904_v39 }
 0x7be   : > { %12291 = vst [vmem:[#allocation96_spill] sm:$0xff] %v11317_v17  ;;  %v3873_v25 = vpop.xlane.xlu0 %3872  ;;  %8394 = vpow2.f32 %v3957_v40  ;;  %v12296_v40 = vld [vmem:[#allocation65_spill] sm:$0xff] }
 0x7bf   : > { %v3905_v10 = vsub.f32 %v12292_v44, %v3873_v25  ;;  %v3906_v28 = vsub.f32 %v12293_v62, %v3873_v25  ;;  %8396 = vpow2.f32 %v3959_v27  ;;  %v12297_v25 = vld [vmem:[#allocation66_spill] sm:$0xff] }
 0x7c0   : > { %v11323_v8 = vpop.eup %8382  ;;  %v11325_v9 = vpop.f32.mrb[184].mxu0  ;;  %8398 = vpow2.f32 %v3961_v18 }
 0x7c1   : > { %12294 = vst [vmem:[#allocation71_spill] sm:$0xff] %v11325_v9  ;;  %v11327_v63 = vpop.eup %8384  ;;  %v3965_v51 = vmul.f32 1.442695, %v3905_v10  ;;  %v3967_v6 = vmul.f32 1.442695, %v3906_v28  ;;  %v11329_v56 = vpop.f32.mrb[185].mxu0 }
 0x7c2   : > { %12295 = vst [vmem:[#allocation72_spill] sm:$0xff] %v11329_v56  ;;  %v4909_v49 = vmax.f32 %v11325_v9, %v11329_v56  ;;  %v3876_v44 = vpop.xlane.xlu0 %3875  ;;  %v4000_v62 = vadd.f32 %v11327_v63, %v11323_v8 }
 0x7c3   : > { %8400 = vpow2.f32 %v3965_v51  ;;  %v3907_v39 = vsub.f32 %v12296_v40, %v3876_v44  ;;  %v3908_v2 = vsub.f32 %v12297_v25, %v3876_v44 }
 0x7c4   : > { %v11337_v30 = vpop.eup %8386  ;;  %8402 = vpow2.f32 %v3967_v6  ;;  %4001 = vadd.xlane.f32.xlu0 %v4000_v62  ;;  %v11339_v10 = vpop.f32.mrb[186].mxu0 }
 0x7c5   : > { %12298 = vst [vmem:[#allocation91_spill] sm:$0xff] %v11339_v10  ;;  %v11341_v27 = vpop.eup %8388  ;;  %8404 = vpow2.f32 %v3963_v43  ;;  %v3969_v18 = vmul.f32 1.442695, %v3907_v39  ;;  %v3971_v28 = vmul.f32 1.442695, %v3908_v2  ;;  %v11343_v5 = vpop.f32.mrb[187].mxu0 }
 0x7c6   : > { %12299 = vst [vmem:[#allocation73_spill] sm:$0xff] %v11343_v5  ;;  %v11345_v14 = vpop.eup %8390  ;;  %v4912_v51 = vmax.f32 %v11339_v10, %v11343_v5  ;;  %v4003_v44 = vadd.f32 %v11341_v27, %v11337_v30 }
 0x7c7   : > { %12300 = vst [vmem:[#allocation74_spill] sm:$0xff] %v11345_v14  ;;  %v11351_v40 = vpop.eup %8392  ;;  %8406 = vpow2.f32 %v3969_v18 }
 0x7c8   : > { %12301 = vst [vmem:[#allocation99_spill] sm:$0xff] %v11351_v40  ;;  %4004 = vadd.xlane.f32.xlu0 %v4003_v44  ;;  %v11353_v6 = vpop.f32.mrb[188].mxu0  ;;  %8408 = vpow2.f32 %v3971_v28  ;;  %v11357_v2 = vpop.eup %8394  ;;  %v4006_v39 = vadd.f32 %v11351_v40, %v11345_v14 }
 0x7c9   : > { %12302 = vst [vmem:[#allocation85_spill] sm:$0xff] %v11353_v6  ;;  %v11355_v43 = vpop.f32.mrb[189].mxu0  ;;  %v11363_v25 = vpop.eup %8396 }
 0x7ca   : > { %12303 = vst [vmem:[#allocation86_spill] sm:$0xff] %v11355_v43  ;;  %v4915_v62 = vmax.f32 %v11353_v6, %v11355_v43  ;;  %v11365_v5 = vpop.eup %8398  ;;  %v4009_v43 = vadd.f32 %v11363_v25, %v11357_v2 }
 0x7cc   : > { %4007 = vadd.xlane.f32.xlu0 %v4006_v39  ;;  %v11367_v18 = vpop.f32.mrb[190].mxu0 }
 0x7cd   : > { %12304 = vst [vmem:[#allocation92_spill] sm:$0xff] %v11367_v18  ;;  %v11369_v44 = vpop.eup %8400  ;;  %v11371_v28 = vpop.f32.mrb[191].mxu0 }
 0x7ce   : > { %12305 = vst [vmem:[#allocation75_spill] sm:$0xff] %v11369_v44  ;;  %12306 = vst [vmem:[#allocation76_spill] sm:$0xff] %v11371_v28  ;;  %v11373_v10 = vpop.eup %8402  ;;  %v4918_v56 = vmax.f32 %v11367_v18, %v11371_v28  ;;  %v12307_v28 = vmax.f32 %v11241_v29, %v11245_v34 }
 0x7cf   : > { %v11379_v6 = vpop.eup %8404  ;;  %v4015_v9 = vadd.f32 %v11373_v10, %v11369_v44  ;;  %v12310_v44 = vmax.f32 %v11257_v7, %v11259_v50 }
 0x7d0   : > { %4010 = vadd.xlane.f32.xlu0 %v4009_v43  ;;  %v4012_v14 = vadd.f32 %v11379_v6, %v11365_v5  ;;  %v12308_v43 = vmax.f32 %v11251_v1, %v11253_v54 }
 0x7d1   : > { %4016 = vadd.xlane.f32.xlu1 %v4015_v9  ;;  %v11383_v39 = vpop.eup %8406  ;;  %v12309_v9 = vmax.f32 %v11199_v32, %v11201_v3 }
 0x7d2   : > { %v11387_v40 = vpop.eup %8408 }
 0x7d3   : > { %v4018_v18 = vadd.f32 %v11387_v40, %v11383_v39 }
 0x7d4   : > { %4013 = vadd.xlane.f32.xlu0 %v4012_v14  ;;  %v12311_v14 = vmax.f32 %v11205_v48, %v11211_v4 }
 0x7d5   : > { %4889 = vmax.xlane.f32.xlu1 %v12307_v28  ;;  %v12312_v28 = vmax.f32 %v11267_v13, %v11271_v37 }
 0x7d8   : > { %4019 = vadd.xlane.f32.xlu0 %v4018_v18  ;;  %v12313_v18 = vmax.f32 %v11215_v11, %v11219_v57 }
 0x7d9   : > { %4892 = vmax.xlane.f32.xlu1 %v12308_v43  ;;  %v12314_v43 = vmax.f32 %v11281_v24, %v11285_v45  ;;  %v12326_v24 = vld [vmem:[#allocation12_spill] sm:$0xff] }
 0x7dc   : > { %4874 = vmax.xlane.f32.xlu0 %v12309_v9  ;;  %v12315_v9 = vmax.f32 %v11224_v35, %v11227_v12 }
 0x7dd   : > { %4895 = vmax.xlane.f32.xlu1 %v12310_v44  ;;  %v12316_v44 = vmax.f32 %v11301_v0, %v11303_v58 }
 0x7e0   : > { %4877 = vmax.xlane.f32.xlu0 %v12311_v14  ;;  %v12317_v14 = vmax.f32 %v11233_v23, %v11235_v42 }
 0x7e1   : > { %4898 = vmax.xlane.f32.xlu1 %v12312_v28  ;;  %v12318_v28 = vmax.f32 %v11315_v21, %v11317_v17  ;;  %v12324_v21 = vld [vmem:[#allocation25_spill] sm:$0xff] }
 0x7e4   : > { %4880 = vmax.xlane.f32.xlu0 %v12313_v18 }
 0x7e5   : > { %4901 = vmax.xlane.f32.xlu1 %v12314_v43  ;;  %v12319_v43 = vld [vmem:[#allocation18_spill] sm:$0xff] }
 0x7e8   : > { %4883 = vmax.xlane.f32.xlu0 %v12315_v9  ;;  %v12320_v9 = vld [vmem:[#allocation20_spill] sm:$0xff] }
 0x7e9   : > { %4904 = vmax.xlane.f32.xlu1 %v12316_v44 }
 0x7ec   : > { %4886 = vmax.xlane.f32.xlu0 %v12317_v14  ;;  %v12321_v14 = vld [vmem:[#allocation10_spill] sm:$0xff] }
 0x7ed   : > { %4910 = vmax.xlane.f32.xlu1 %v4909_v49 }
 0x7f0   : > { %4907 = vmax.xlane.f32.xlu0 %v12318_v28 }
 0x7f1   : > { %4916 = vmax.xlane.f32.xlu1 %v4915_v62 }
 0x7f4   : > { %4913 = vmax.xlane.f32.xlu0 %v4912_v51  ;;  %v12323_v51 = vld [vmem:[#allocation9_spill] sm:$0xff] }
 0x7f8   : > { %4919 = vmax.xlane.f32.xlu0 %v4918_v56  ;;  %v12322_v56 = vld [vmem:[#allocation22_spill] sm:$0xff] }
 0x800   : > { %v3975_v18 = vpop.xlane.xlu0 %3974 }
 0x801   : > { %8410 = vrcp.f32 %v3975_v18 }
 0x802   : > { %8075 = vrot.lane.b32.xlu1 %v12319_v43, %s8644_s26 }
 0x804   : > { %v3978_v44 = vpop.xlane.xlu1 %3977 }
 0x805   : > { %8412 = vrcp.f32 %v3978_v44  ;;  %v4310_v44 = vld [vmem:[#allocation2 + $0x10] sm:$0xff] }
 0x806   : > { %8085 = vrot.lane.b32.xlu1 %v12320_v9, %s8644_s26 }
 0x808   : > { %v3981_v62 = vpop.xlane.xlu1 %3980 }
 0x809   : > { %8414 = vrcp.f32 %v3981_v62 }
 0x80a   : > { %8090 = vrot.lane.b32.xlu1 %v12321_v14, %s8644_s26  ;;  %v12325_v14 = vld [vmem:[#allocation11_spill] sm:$0xff] }
 0x80b   : > { %v8411_v49 = vpop.eup %8410 }
 0x80c   : > { %v3984_v58 = vpop.xlane.xlu0 %3983  ;;  %v4023_v28 = vmul.f32 %v8411_v49, %v11137_v52 }
 0x80d   : > { %8416 = vrcp.f32 %v3984_v58 }
 0x80e   : > { %8095 = vrot.lane.b32.xlu1 %v12322_v56, %s8644_s26  ;;  %8080 = vrot.lane.b32.xlu0 %v12323_v51, %s8644_s26 }
 0x80f   : > { %4229 = vmatprep.mubr.f32.mxu1 %v4023_v28  ;;  %v12327_v28 = vld [vmem:[#allocation27_spill] sm:$0xff] }
 0x810   : > { %v8061_v18 = vpop.permute.xlu0 %8060  ;;  %v3987_v43 = vpop.xlane.xlu1 %3986 }
 0x811   : > { %v8063_v17 = vunpack.i.h.bf16 %v8061_v18  ;;  %v8062_v9 = vunpack.i.l.bf16 %v8061_v18  ;;  %8418 = vrcp.f32 %v3987_v43 }
 0x812   : > { %8105 = vrot.lane.b32.xlu1 %v12324_v21, %s8644_s26  ;;  %8100 = vrot.lane.b32.xlu0 %v12325_v14, %s8644_s26  ;;  %v12328_v14 = vld [vmem:[#allocation13_spill] sm:$0xff] }
 0x813   : > { %v7338_v52 = vpack.c.bf16 %v8063_v17, %v8062_v9  ;;  %v8413_v9 = vpop.eup %8412 }
 0x814   : > { %v8066_v0 = vpop.permute.xlu1 %8065  ;;  %v8415_v62 = vpop.eup %8414 }
 0x815   : > { %7339 = vmatpush3.bf16.msra.mxu1 %v7338_v52  ;;  %v8068_v45 = vunpack.i.h.bf16 %v8066_v0  ;;  %v8067_v56 = vunpack.i.l.bf16 %v8066_v0  ;;  %v12329_v0 = vld [vmem:[#allocation30_spill] sm:$0xff]  ;;  %v4029_v58 = vmul.f32 %v8415_v62, %v11167_v55 }
 0x816   : > { %8110 = vrot.lane.b32.xlu1 %v12326_v24, %s8644_s26  ;;  %8115 = vrot.lane.b32.xlu0 %v12327_v28, %s8644_s26  ;;  %v4022_v24 = vmul.f32 %v8411_v49, %v11135_v20  ;;  %v12330_v52 = vld [vmem:[#allocation14_spill] sm:$0xff]  ;;  %v12331_v20 = vld [vmem:[#allocation32_spill] sm:$0xff]  ;;  %v4028_v49 = vmul.f32 %v8415_v62, %v11165_v47 }
 0x817   : > { %v7340_v51 = vpack.c.bf16 %v8068_v45, %v8067_v56  ;;  %v4026_v45 = vmul.f32 %v8413_v9, %v11153_v61  ;;  %v8417_v56 = vpop.eup %8416 }
 0x818   : > { %v8071_v18 = vpop.permute.xlu1 %8070  ;;  %v4032_v61 = vmul.f32 %v8417_v56, %v11177_v41 }
 0x819   : > { %v8073_v37 = vunpack.i.h.bf16 %v8071_v18  ;;  %v8072_v21 = vunpack.i.l.bf16 %v8071_v18  ;;  %7341 = vmatprep.subr.bf16.mxu1 %v7340_v51 }
 0x81a   : > { %8120 = vrot.lane.b32.xlu0 %v12328_v14, %s8644_s26 }
 0x81b   : > { %v7342_v17 = vpack.c.bf16 %v8073_v37, %v8072_v21  ;;  %v4025_v37 = vmul.f32 %v8413_v9, %v11151_v60  ;;  %v8419_v43 = vpop.eup %8418  ;;  %v4031_v60 = vmul.f32 %v8417_v56, %v11175_v22 }
 0x81c   : > { %v4035_v55 = vmul.f32 %v8419_v43, %v11189_v38  ;;  %v4034_v28 = vmul.f32 %v8419_v43, %v11187_v15 }
 0x81d   : > { %7343 = vmatpush3.bf16.msra.mxu1 %v7342_v17 }
 0x81e   : > { %8125 = vrot.lane.b32.xlu0 %v12329_v0, %s8644_s26  ;;  %6996 = vmatprep.subr.mxu1 %v4310_v44 }
 0x820   : > { %4230 = vmatmul.mubr.f32.vlgmr.msra.gmra.mrb[96].mxu1 %v4022_v24 }
 0x821   : > { %4234 = vmatprep.mubr.f32.mxu1 %v4026_v45  ;;  %6997 = vmatpush3.msra.mxu1 %v4310_v44 }
 0x822   : > { %8130 = vrot.lane.b32.xlu0 %v12330_v52, %s8644_s26 }
 0x824   : > { %4235 = vmatmul.mubr.f32.gmra.mrb[98].mxu1 %v4025_v37 }
 0x825   : > { %4239 = vmatprep.mubr.f32.mxu1 %v4029_v58 }
 0x826   : > { %8135 = vrot.lane.b32.xlu0 %v12331_v20, %s8644_s26 }
 0x828   : > { %4240 = vmatmul.mubr.f32.gmra.mrb[100].mxu1 %v4028_v49 }
 0x829   : > { %4244 = vmatprep.mubr.f32.mxu1 %v4032_v61 }
 0x82a   : > { %8140 = vrot.lane.b32.xlu0 %v12178_v26, %s8644_s26 }
 0x82c   : > { %4245 = vmatmul.mubr.f32.gmra.mrb[102].mxu1 %v4031_v60 }
 0x82d   : > { %4249 = vmatprep.mubr.f32.mxu1 %v4035_v55 }
 0x830   : > { %4250 = vmatmul.mubr.f32.gmra.mrb[104].mxu1 %v4034_v28 }
 0x841   : > { %v3990_v51 = vpop.xlane.xlu0 %3989 }
 0x842   : > { %8420 = vrcp.f32 %v3990_v51 }
 0x845   : > { %v3996_v47 = vpop.xlane.xlu0 %3995 }
 0x846   : > { %8422 = vrcp.f32 %v3996_v47 }
 0x849   : > { %v3993_v41 = vpop.xlane.xlu1 %3992  ;;  %v3999_v21 = vpop.xlane.xlu0 %3998 }
 0x84a   : > { %8424 = vrcp.f32 %v3993_v41 }
 0x84b   : > { %8426 = vrcp.f32 %v3999_v21 }
 0x84c   : > { %v8421_v18 = vpop.eup %8420 }
 0x84d   : > { %v4038_v14 = vmul.f32 %v8421_v18, %v11265_v36  ;;  %v4037_v26 = vmul.f32 %v8421_v18, %v11261_v31 }
 0x84f   : > { %4254 = vmatprep.mubr.f32.mxu1 %v4038_v14 }
 0x850   : > { %4255 = vmatmul.mubr.f32.gmra.mrb[106].mxu1 %v4037_v26  ;;  %v8423_v38 = vpop.eup %8422 }
 0x851   : > { %v4002_v22 = vpop.xlane.xlu0 %4001  ;;  %v4044_v0 = vmul.f32 %v8423_v38, %v11273_v19  ;;  %v4043_v31 = vmul.f32 %v8423_v38, %v11269_v16 }
 0x852   : > { %8428 = vrcp.f32 %v4002_v22 }
 0x854   : > { %v8425_v15 = vpop.eup %8424 }
 0x855   : > { %v4005_v17 = vpop.xlane.xlu0 %4004  ;;  %v4041_v44 = vmul.f32 %v8425_v15, %v11299_v59  ;;  %v4040_v9 = vmul.f32 %v8425_v15, %v11295_v33  ;;  %v8427_v24 = vpop.eup %8426 }
 0x856   : > { %8430 = vrcp.f32 %v4005_v17  ;;  %v4047_v45 = vmul.f32 %v8427_v24, %v11289_v46  ;;  %v4046_v33 = vmul.f32 %v8427_v24, %v11283_v53 }
 0x857   : > { %4259 = vmatprep.mubr.f32.mxu1 %v4041_v44 }
 0x858   : > { %4260 = vmatmul.mubr.f32.gmra.mrb[108].mxu1 %v4040_v9 }
 0x859   : > { %v4008_v36 = vpop.xlane.xlu0 %4007  ;;  %4264 = vmatprep.mubr.f32.mxu1 %v4044_v0 }
 0x85a   : > { %8432 = vrcp.f32 %v4008_v36 }
 0x85c   : > { %v8429_v62 = vpop.eup %8428  ;;  %4265 = vmatmul.mubr.f32.gmra.mrb[110].mxu1 %v4043_v31 }
 0x85d   : > { %v4011_v52 = vpop.xlane.xlu0 %4010  ;;  %4269 = vmatprep.mubr.f32.mxu1 %v4047_v45  ;;  %v4050_v59 = vmul.f32 %v8429_v62, %v11327_v63  ;;  %v4049_v16 = vmul.f32 %v8429_v62, %v11323_v8  ;;  %v12332_v63 = vld [vmem:[#allocation99_spill] sm:$0xff] }
 0x85e   : > { %v4017_v37 = vpop.xlane.xlu1 %4016  ;;  %8434 = vrcp.f32 %v4011_v52 }
 0x860   : > { %v8431_v19 = vpop.eup %8430  ;;  %4270 = vmatmul.mubr.f32.gmra.mrb[112].mxu1 %v4046_v33 }
 0x861   : > { %v4014_v58 = vpop.xlane.xlu0 %4013  ;;  %4274 = vmatprep.mubr.f32.mxu1 %v4050_v59  ;;  %v4053_v46 = vmul.f32 %v8431_v19, %v11341_v27  ;;  %v4052_v53 = vmul.f32 %v8431_v19, %v11337_v30  ;;  %v12333_v27 = vld [vmem:[#allocation74_spill] sm:$0xff] }
 0x862   : > { %v4890_v56 = vpop.xlane.xlu1 %4889  ;;  %8436 = vrcp.f32 %v4014_v58 }
 0x863   : > { %8438 = vrcp.f32 %v4017_v37  ;;  %v4931_v41 = vsub.f32 %v11241_v29, %v4890_v56  ;;  %v4932_v26 = vsub.f32 %v11245_v34, %v4890_v56  ;;  %v12334_v37 = vld [vmem:[#allocation75_spill] sm:$0xff] }
 0x864   : > { %v8433_v20 = vpop.eup %8432  ;;  %4275 = vmatmul.mubr.f32.gmra.mrb[114].mxu1 %v4049_v16 }
 0x865   : > { %v4020_v49 = vpop.xlane.xlu0 %4019  ;;  %4279 = vmatprep.mubr.f32.mxu1 %v4053_v46  ;;  %v4056_v43 = vmul.f32 %v8433_v20, %v12332_v63  ;;  %v4055_v47 = vmul.f32 %v8433_v20, %v12333_v27  ;;  %v4973_v15 = vmul.f32 1.442695, %v4931_v41  ;;  %v4975_v34 = vmul.f32 1.442695, %v4932_v26 }
 0x866   : > { %v11476_v61 = vpop.xlane.xlu1 %4892  ;;  %8440 = vrcp.f32 %v4020_v49 }
 0x868   : > { %v8435_v60 = vpop.eup %8434  ;;  %4280 = vmatmul.mubr.f32.gmra.mrb[116].mxu1 %v4052_v53  ;;  %v12336_v53 = vld [vmem:[#allocation72_spill] sm:$0xff] }
 0x869   : > { %v4875_v55 = vpop.xlane.xlu0 %4874  ;;  %4284 = vmatprep.mubr.f32.mxu1 %v4056_v43  ;;  %v4059_v30 = vmul.f32 %v8435_v60, %v11363_v25  ;;  %v4058_v29 = vmul.f32 %v8435_v60, %v11357_v2 }
 0x86a   : > { %v4921_v28 = vsub.f32 %v11199_v32, %v4875_v55  ;;  %v4922_v8 = vsub.f32 %v11201_v3, %v4875_v55  ;;  %v11482_v51 = vpop.xlane.xlu1 %4895 }
 0x86c   : > { %v4953_v18 = vmul.f32 1.442695, %v4921_v28  ;;  %v4955_v21 = vmul.f32 1.442695, %v4922_v8  ;;  %v8437_v14 = vpop.eup %8436  ;;  %4285 = vmatmul.mubr.f32.gmra.mrb[118].mxu1 %v4055_v47  ;;  %v4936_v8 = vsub.f32 %v11259_v50, %v11482_v51 }
 0x86d   : > { %v4878_v22 = vpop.xlane.xlu0 %4877  ;;  %4289 = vmatprep.mubr.f32.mxu1 %v4059_v30  ;;  %v4062_v25 = vmul.f32 %v8437_v14, %v11379_v6  ;;  %v8439_v9 = vpop.eup %8438  ;;  %v4061_v2 = vmul.f32 %v8437_v14, %v11365_v5 }
 0x86e   : > { %8442 = vpow2.f32 %v4953_v18  ;;  %v4923_v32 = vsub.f32 %v11205_v48, %v4878_v22  ;;  %v4924_v3 = vsub.f32 %v11211_v4, %v4878_v22  ;;  %v11490_v38 = vpop.xlane.xlu1 %4898  ;;  %v4065_v6 = vmul.f32 %v8439_v9, %v11373_v10 }
 0x86f   : > { %8444 = vpow2.f32 %v4955_v21  ;;  %v4064_v5 = vmul.f32 %v8439_v9, %v12334_v37  ;;  %v4933_v10 = vsub.f32 %v11251_v1, %v11476_v61  ;;  %v4937_v18 = vsub.f32 %v11267_v13, %v11490_v38  ;;  %v12341_v37 = vld [vmem:[#allocation67_spill] sm:$0xff] }
 0x870   : > { %v4957_v17 = vmul.f32 1.442695, %v4923_v32  ;;  %v4959_v44 = vmul.f32 1.442695, %v4924_v3  ;;  %4290 = vmatmul.mubr.f32.gmra.mrb[120].mxu1 %v4058_v29  ;;  %v8441_v45 = vpop.eup %8440  ;;  %v4983_v26 = vmul.f32 1.442695, %v4936_v8 }
 0x871   : > { %v4881_v0 = vpop.xlane.xlu0 %4880  ;;  %4294 = vmatprep.mubr.f32.mxu1 %v4062_v25  ;;  %v4068_v58 = vmul.f32 %v8441_v45, %v11387_v40  ;;  %v12335_v40 = vld [vmem:[#allocation71_spill] sm:$0xff]  ;;  %v4985_v29 = vmul.f32 1.442695, %v4937_v18 }
 0x872   : > { %8446 = vpow2.f32 %v4957_v17  ;;  %v4925_v48 = vsub.f32 %v11215_v11, %v4881_v0  ;;  %v4926_v4 = vsub.f32 %v11219_v57, %v4881_v0  ;;  %v11496_v24 = vpop.xlane.xlu1 %4901  ;;  %v12339_v0 = vld [vmem:[#allocation70_spill] sm:$0xff] }
 0x873   : > { %8448 = vpow2.f32 %v4959_v44 }
 0x874   : > { %8450 = vpow2.f32 %v4973_v15  ;;  %v4961_v36 = vmul.f32 1.442695, %v4925_v48  ;;  %v4963_v31 = vmul.f32 1.442695, %v4926_v4  ;;  %4295 = vmatmul.mubr.f32.gmra.mrb[122].mxu1 %v4061_v2  ;;  %v12338_v15 = vld [vmem:[#allocation69_spill] sm:$0xff]  ;;  %v4940_v48 = vsub.f32 %v12339_v0, %v11496_v24 }
 0x875   : > { %8452 = vpow2.f32 %v4975_v34  ;;  %v4884_v62 = vpop.xlane.xlu0 %4883  ;;  %4299 = vmatprep.mubr.f32.mxu1 %v4065_v6  ;;  %v4939_v17 = vsub.f32 %v12338_v15, %v11496_v24 }
 0x876   : > { %8454 = vpow2.f32 %v4961_v36  ;;  %v4927_v11 = vsub.f32 %v11224_v35, %v4884_v62  ;;  %v4928_v57 = vsub.f32 %v11227_v12, %v4884_v62  ;;  %v11502_v52 = vpop.xlane.xlu1 %4904  ;;  %v4934_v35 = vsub.f32 %v11253_v54, %v11476_v61  ;;  %v12340_v62 = vld [vmem:[#allocation94_spill] sm:$0xff] }
 0x877   : > { %8456 = vpow2.f32 %v4963_v31  ;;  %v4067_v61 = vmul.f32 %v8441_v45, %v11383_v39  ;;  %v4989_v6 = vmul.f32 1.442695, %v4939_v17  ;;  %v4991_v24 = vmul.f32 1.442695, %v4940_v48 }
 0x878   : > { %v11505_v33 = vpop.eup %8442  ;;  %v4965_v59 = vmul.f32 1.442695, %v4927_v11  ;;  %v4967_v19 = vmul.f32 1.442695, %v4928_v57  ;;  %4300 = vmatmul.mubr.f32.gmra.mrb[124].mxu1 %v4064_v5  ;;  %v4979_v28 = vmul.f32 1.442695, %v4934_v35  ;;  %v4941_v11 = vsub.f32 %v12340_v62, %v11502_v52 }
 0x879   : > { %v11510_v56 = vpop.eup %8444  ;;  %v4887_v12 = vpop.xlane.xlu0 %4886  ;;  %4304 = vmatprep.mubr.f32.mxu1 %v4068_v58  ;;  %v4942_v5 = vsub.f32 %v12341_v37, %v11502_v52 }
 0x87a   : > { %8458 = vpow2.f32 %v4965_v59  ;;  %v4929_v16 = vsub.f32 %v11233_v23, %v4887_v12  ;;  %v4930_v46 = vsub.f32 %v11235_v42, %v4887_v12  ;;  %v11516_v20 = vpop.xlane.xlu1 %4910  ;;  %v5017_v1 = vadd.f32 %v11510_v56, %v11505_v33 }
 0x87b   : > { %8460 = vpow2.f32 %v4967_v19  ;;  %v4945_v49 = vsub.f32 %v12335_v40, %v11516_v20  ;;  %v4946_v54 = vsub.f32 %v12336_v53, %v11516_v20  ;;  %v4977_v23 = vmul.f32 1.442695, %v4933_v10 }
 0x87c   : > { %v11525_v63 = vpop.eup %8446  ;;  %v4935_v42 = vsub.f32 %v11257_v7, %v11482_v51  ;;  %v4969_v43 = vmul.f32 1.442695, %v4929_v16  ;;  %v4971_v60 = vmul.f32 1.442695, %v4930_v46  ;;  %5018 = vadd.xlane.f32.xlu1 %v5017_v1  ;;  %4305 = vmatmul.mubr.f32.gmra.mrb[126].mxu1 %v4067_v61  ;;  %v12337_v51 = vld [vmem:[#allocation90_spill] sm:$0xff] }
 0x87d   : > { %v11529_v55 = vpop.eup %8448  ;;  %v11533_v27 = vpop.xlane.xlu0 %4907  ;;  %v4938_v30 = vsub.f32 %v12337_v51, %v11490_v38  ;;  %v4993_v61 = vmul.f32 1.442695, %v4941_v11  ;;  %v4995_v52 = vmul.f32 1.442695, %v4942_v5 }
 0x87e   : > { %v11535_v47 = vpop.eup %8450  ;;  %8462 = vpow2.f32 %v4969_v43  ;;  %v11537_v39 = vpop.xlane.xlu1 %4916  ;;  %v5020_v7 = vadd.f32 %v11529_v55, %v11525_v63  ;;  %v4981_v50 = vmul.f32 1.442695, %v4935_v42 }
 0x87f   : > { %v11541_v41 = vpop.eup %8452  ;;  %8464 = vpow2.f32 %v4971_v60  ;;  %v4987_v9 = vmul.f32 1.442695, %v4938_v30 }
 0x880   : > { %v11545_v21 = vpop.eup %8454  ;;  %8466 = vpow2.f32 %v4977_v23  ;;  %5021 = vadd.xlane.f32.xlu0 %v5020_v7  ;;  %v5032_v13 = vadd.f32 %v11541_v41, %v11535_v47 }
 0x881   : > { %v11549_v14 = vpop.eup %8456  ;;  %8468 = vpow2.f32 %v4979_v28  ;;  %v11551_v22 = vpop.xlane.xlu0 %4913 }
 0x882   : > { %v8076_v32 = vpop.permute.xlu1 %8075  ;;  %v5023_v3 = vadd.f32 %v11549_v14, %v11545_v21  ;;  %8470 = vpow2.f32 %v4981_v50 }
 0x883   : > { %v8078_v44 = vunpack.i.h.bf16 %v8076_v32  ;;  %v8077_v38 = vunpack.i.l.bf16 %v8076_v32  ;;  %8472 = vpow2.f32 %v4983_v26 }
 0x884   : > { %v11559_v25 = vpop.eup %8458  ;;  %5024 = vadd.xlane.f32.xlu1 %v5023_v3  ;;  %5033 = vadd.xlane.f32.xlu0 %v5032_v13  ;;  %8474 = vpow2.f32 %v4985_v29 }
 0x885   : > { %v11561_v34 = vpop.eup %8460  ;;  %v7392_v4 = vpack.c.bf16 %v8078_v44, %v8077_v38  ;;  %v11565_v2 = vpop.xlane.xlu0 %4919  ;;  %8476 = vpow2.f32 %v4987_v9 }
 0x886   : > { %v8086_v36 = vpop.permute.xlu1 %8085  ;;  %v5026_v31 = vadd.f32 %v11561_v34, %v11559_v25  ;;  %8478 = vpow2.f32 %v4989_v6 }
 0x887   : > { %7393 = vmatprep.subr.bf16.mxu0 %v7392_v4  ;;  %7424 = vmatprep.subr.bf16.mxu1 %v7392_v4  ;;  %v8088_v10 = vunpack.i.h.bf16 %v8086_v36  ;;  %v8087_v59 = vunpack.i.l.bf16 %v8086_v36  ;;  %8480 = vpow2.f32 %v4991_v24 }
 0x888   : > { %v11569_v45 = vpop.eup %8462  ;;  %5027 = vadd.xlane.f32.xlu1 %v5026_v31  ;;  %8482 = vpow2.f32 %v4993_v61  ;;  %v12342_v61 = vld [vmem:[#allocation34_spill] sm:$0xff] }
 0x889   : > { %v11573_v57 = vpop.eup %8464  ;;  %v8081_v19 = vpop.permute.xlu0 %8080  ;;  %v11585_v60 = vpack.c.bf16 %v8088_v10, %v8087_v59  ;;  %8484 = vpow2.f32 %v4995_v52 }
 0x88a   : > { %v11577_v58 = vpop.eup %8466  ;;  %v8091_v35 = vpop.permute.xlu1 %8090  ;;  %v8083_v12 = vunpack.i.h.bf16 %v8081_v19  ;;  %v8082_v16 = vunpack.i.l.bf16 %v8081_v19  ;;  %v5029_v46 = vadd.f32 %v11573_v57, %v11569_v45 }
 0x88b   : > { %v11581_v1 = vpop.eup %8468  ;;  %v8093_v23 = vunpack.i.h.bf16 %v8091_v35  ;;  %v8092_v42 = vunpack.i.l.bf16 %v8091_v35 }
 0x88c   : > { %v11583_v43 = vpack.c.bf16 %v8083_v12, %v8082_v16  ;;  %5030 = vadd.xlane.f32.xlu1 %v5029_v46  ;;  %v11587_v8 = vpop.eup %8470  ;;  %v5035_v18 = vadd.f32 %v11581_v1, %v11577_v58 }
 0x88d   : > { %v8101_v28 = vpop.permute.xlu0 %8100  ;;  %v11592_v50 = vpop.eup %8472  ;;  %v11595_v26 = vpack.c.bf16 %v8093_v23, %v8092_v42 }
 0x88e   : > { %v8096_v7 = vpop.permute.xlu1 %8095  ;;  %7395 = vmatpush3.bf16.msra.mxu0 %v11583_v43  ;;  %v8103_v32 = vunpack.i.h.bf16 %v8101_v28  ;;  %v8102_v3 = vunpack.i.l.bf16 %v8101_v28  ;;  %v11597_v13 = vpop.eup %8474  ;;  %v5038_v38 = vadd.f32 %v11592_v50, %v11587_v8 }
 0x88f   : > { %v8098_v51 = vunpack.i.h.bf16 %v8096_v7  ;;  %v8097_v30 = vunpack.i.l.bf16 %v8096_v7  ;;  %7397 = vmatprep.subr.bf16.mxu0 %v11585_v60  ;;  %v11601_v17 = vpop.eup %8476 }
 0x890   : > { %5036 = vadd.xlane.f32.xlu1 %v5035_v18  ;;  %v11607_v48 = vpack.c.bf16 %v8103_v32, %v8102_v3  ;;  %v11609_v4 = vpop.eup %8478  ;;  %v5041_v24 = vadd.f32 %v11601_v17, %v11597_v13 }
 0x891   : > { %v11599_v29 = vpack.c.bf16 %v8098_v51, %v8097_v30  ;;  %v8116_v15 = vpop.permute.xlu0 %8115  ;;  %v11616_v37 = vpop.eup %8480 }
 0x892   : > { %v8106_v44 = vpop.permute.xlu1 %8105  ;;  %7399 = vmatpush3.bf16.msra.mxu0 %v11595_v26  ;;  %v8118_v6 = vunpack.i.h.bf16 %v8116_v15  ;;  %v8117_v62 = vunpack.i.l.bf16 %v8116_v15  ;;  %v11621_v16 = vpop.eup %8482  ;;  %v5044_v52 = vadd.f32 %v11616_v37, %v11609_v4 }
 0x893   : > { %v8108_v9 = vunpack.i.h.bf16 %v8106_v44  ;;  %v8107_v0 = vunpack.i.l.bf16 %v8106_v44  ;;  %7401 = vmatprep.subr.bf16.mxu0 %v11599_v29  ;;  %v11629_v28 = vpop.eup %8484  ;;  %v12343_v44 = vld [vmem:[#allocation68_spill] sm:$0xff] }
 0x894   : > { %5039 = vadd.xlane.f32.xlu1 %v5038_v38  ;;  %v11623_v46 = vpack.c.bf16 %v8118_v6, %v8117_v62  ;;  %v5047_v3 = vadd.f32 %v11629_v28, %v11621_v16  ;;  %v4943_v38 = vsub.f32 %v12343_v44, %v11533_v27 }
 0x895   : > { %v11611_v36 = vpack.c.bf16 %v8108_v9, %v8107_v0  ;;  %v8121_v31 = vpop.permute.xlu0 %8120  ;;  %v12344_v0 = vld [vmem:[#allocation96_spill] sm:$0xff] }
 0x896   : > { %v8111_v11 = vpop.permute.xlu1 %8110  ;;  %7403 = vmatpush3.bf16.msra.mxu0 %v11607_v48  ;;  %v8123_v19 = vunpack.i.h.bf16 %v8121_v31  ;;  %v8122_v35 = vunpack.i.l.bf16 %v8121_v31  ;;  %v4944_v31 = vsub.f32 %v12344_v0, %v11533_v27 }
 0x897   : > { %v8113_v5 = vunpack.i.h.bf16 %v8111_v11  ;;  %v8112_v10 = vunpack.i.l.bf16 %v8111_v11  ;;  %7405 = vmatprep.subr.bf16.mxu0 %v11611_v36 }
 0x898   : > { %5042 = vadd.xlane.f32.xlu1 %v5041_v24  ;;  %v11635_v18 = vpack.c.bf16 %v8123_v19, %v8122_v35  ;;  %v4997_v24 = vmul.f32 1.442695, %v4943_v38  ;;  %v4999_v35 = vmul.f32 1.442695, %v4944_v31  ;;  %v12350_v31 = vld [vmem:[#allocation76_spill] sm:$0xff] }
 0x899   : > { %v11619_v59 = vpack.c.bf16 %v8113_v5, %v8112_v10  ;;  %v8126_v12 = vpop.permute.xlu0 %8125  ;;  %v12345_v5 = vld [vmem:[#allocation91_spill] sm:$0xff] }
 0x89a   : > { %8145 = vrot.lane.b32.xlu0 %v12342_v61, %s8644_s26  ;;  %v8128_v23 = vunpack.i.h.bf16 %v8126_v12  ;;  %v8127_v42 = vunpack.i.l.bf16 %v8126_v12  ;;  %v4947_v10 = vsub.f32 %v12345_v5, %v11551_v22  ;;  %v12346_v12 = vld [vmem:[#allocation73_spill] sm:$0xff]  ;;  %8486 = vpow2.f32 %v4997_v24  ;;  %v12351_v24 = vld [vmem:[#allocation16_spill] sm:$0xff] }
 0x89b   : > { %7407 = vmatpush3.bf16.msra.mxu0 %v11619_v59  ;;  %v4948_v61 = vsub.f32 %v12346_v12, %v11551_v22  ;;  %8488 = vpow2.f32 %v4999_v35  ;;  %v12349_v22 = vld [vmem:[#allocation92_spill] sm:$0xff] }
 0x89c   : > { %v11632_v7 = vpack.c.bf16 %v8128_v23, %v8127_v42  ;;  %5045 = vadd.xlane.f32.xlu1 %v5044_v52  ;;  %7409 = vmatprep.subr.bf16.mxu0 %v11623_v46  ;;  %v12347_v52 = vld [vmem:[#allocation85_spill] sm:$0xff] }
 0x89d   : > { %v8131_v51 = vpop.permute.xlu0 %8130  ;;  %v5007_v44 = vmul.f32 1.442695, %v4948_v61 }
 0x89e   : > { %v8133_v30 = vunpack.i.h.bf16 %v8131_v51  ;;  %v8132_v32 = vunpack.i.l.bf16 %v8131_v51  ;;  %v4949_v51 = vsub.f32 %v12347_v52, %v11537_v39 }
 0x89f   : > { %7411 = vmatpush3.bf16.msra.mxu0 %v11635_v18 }
 0x8a0   : > { %v11640_v15 = vpack.c.bf16 %v8133_v30, %v8132_v32  ;;  %5048 = vadd.xlane.f32.xlu1 %v5047_v3  ;;  %7413 = vmatprep.subr.bf16.mxu0 %v11632_v7  ;;  %v5005_v30 = vmul.f32 1.442695, %v4947_v10  ;;  %v12348_v32 = vld [vmem:[#allocation86_spill] sm:$0xff]  ;;  %v5009_v38 = vmul.f32 1.442695, %v4949_v51 }
 0x8a1   : > { %v8136_v9 = vpop.permute.xlu0 %8135  ;;  %v4950_v3 = vsub.f32 %v12348_v32, %v11537_v39  ;;  %v5003_v32 = vmul.f32 1.442695, %v4946_v54 }
 0x8a2   : > { %v8138_v6 = vunpack.i.h.bf16 %v8136_v9  ;;  %v8137_v62 = vunpack.i.l.bf16 %v8136_v9  ;;  %8490 = vpow2.f32 %v5005_v30  ;;  %v4951_v9 = vsub.f32 %v12349_v22, %v11565_v2 }
 0x8a3   : > { %7415 = vmatpush3.bf16.msra.mxu0 %v11640_v15  ;;  %v5011_v0 = vmul.f32 1.442695, %v4950_v3  ;;  %8492 = vpow2.f32 %v5007_v44  ;;  %v5001_v30 = vmul.f32 1.442695, %v4945_v49 }
 0x8a4   : > { %v11648_v11 = vpack.c.bf16 %v8138_v6, %v8137_v62  ;;  %v4952_v6 = vsub.f32 %v12350_v31, %v11565_v2  ;;  %8494 = vpow2.f32 %v5009_v38  ;;  %v5013_v62 = vmul.f32 1.442695, %v4951_v9  ;;  %v11668_v5 = vpop.eup %8486 }
 0x8a5   : > { %v8141_v19 = vpop.permute.xlu0 %8140  ;;  %8496 = vpow2.f32 %v5011_v0  ;;  %v11670_v10 = vpop.eup %8488 }
 0x8a6   : > { %v8143_v23 = vunpack.i.h.bf16 %v8141_v19  ;;  %v8142_v42 = vunpack.i.l.bf16 %v8141_v19  ;;  %7417 = vmatprep.subr.bf16.mxu0 %v11648_v11  ;;  %v5015_v39 = vmul.f32 1.442695, %v4952_v6  ;;  %8498 = vpow2.f32 %v5013_v62 }
 0x8a7   : > { %v5050_v35 = vadd.f32 %v11670_v10, %v11668_v5 }
 0x8a8   : > { %v11655_v27 = vpack.c.bf16 %v8143_v23, %v8142_v42  ;;  %8500 = vpow2.f32 %v5015_v39 }
 0x8a9   : > { %8502 = vpow2.f32 %v5001_v30 }
 0x8aa   : > { %7419 = vmatpush3.bf16.msra.mxu0 %v11655_v27  ;;  %8504 = vpow2.f32 %v5003_v32 }
 0x8ac   : > { %v11672_v19 = vpop.eup %8490 }
 0x8ad   : > { %v11676_v12 = vpop.eup %8492 }
 0x8ae   : > { %v11678_v2 = vpop.eup %8494  ;;  %v5056_v61 = vadd.f32 %v11676_v12, %v11672_v19 }
 0x8af   : > { %v11682_v23 = vpop.eup %8496 }
 0x8b0   : > { %v11684_v42 = vpop.eup %8498  ;;  %v5059_v52 = vadd.f32 %v11682_v23, %v11678_v2 }
 0x8b1   : > { %8150 = vrot.lane.b32.xlu1 %v12351_v24, %s8644_s26  ;;  %s8570_s26 = sshll.u32 %s8645_s24, 4  ;;  %s8571_s26 = int_to_ptr.vmem [resolvable:$false] %s8570_s26 }
 0x8b2   : > { %v11688_v51 = vpop.eup %8500  ;;  %s8572_s12 = scalar_lea.vmem %s8571_s26, 4096  ;;  %p8573_p2 = scmp.lt.s32.totalorder %s11828_s20, %s8571_s26 }
 0x8b3   : > { %v5062_v3 = vadd.f32 %v11688_v51, %v11684_v42  ;;  %v11698_v44 = vpop.eup %8502  ;;  %p8574_p3 = scmp.lt.s32.totalorder %s8572_s12, %s8566_s9 }
 0x8b4   : > { %v11700_v38 = vpop.eup %8504 }
 0x8b5   : > { %v5053_v22 = vadd.f32 %v11700_v38, %v11698_v44  ;;  %p8575_p4 = por %p8574_p3, %p8573_p2 }
 0x8b7   : > { %p8576_p7 = pnand %p8575_p4, %p8569_p12 }
 0x8b9   : > { %5051 = vadd.xlane.f32.xlu0 %v5050_v35 }
 0x8bd   : > { %5057 = vadd.xlane.f32.xlu0 %v5056_v61 }
 0x8c1   : > { %5060 = vadd.xlane.f32.xlu0 %v5059_v52 }
 0x8c5   : > { %5063 = vadd.xlane.f32.xlu0 %v5062_v3 }
 0x8d5   : > { %5054 = vadd.xlane.f32.xlu1 %v5053_v22 }
 0x8f3   : > { %v6598_v40 = vpop.f32.mrb[96].mxu1 }
 0x8f4   : > { %v6599_v49 = vpop.f32.mrb[97].mxu1 }
 0x8f5   : > { %v6600_v9 = vadd.f32 %v6599_v49, %v6598_v40 }
 0x8f7   : > { %v6601_v0 = vpop.f32.mrb[98].mxu1  ;;  %6998 = vmatprep.mubr.msk.f32.mxu1 %vm1435_vm1, %v6600_v9 }
 0x8f8   : > { %v6602_v20 = vpop.f32.mrb[99].mxu1 }
 0x8f9   : > { %v6603_v53 = vadd.f32 %v6602_v20, %v6601_v0 }
 0x8fb   : > { %v6604_v54 = vpop.f32.mrb[100].mxu1  ;;  %6999 = vmatmul.mubr.msk.f32.vlgmr.msra.gmra.mrb[0].mxu1 %vm1435_vm1, %v6603_v53 }
 0x8fc   : > { %7432 = vmatpush3.bf16.msra.mxu1 %v11583_v43  ;;  %v6605_v31 = vpop.f32.mrb[101].mxu1 }
 0x8fd   : > { %v6606_v6 = vadd.f32 %v6605_v31, %v6604_v54  ;;  %7425 = vmatprep.subr.bf16.mxu1 %v11585_v60 }
 0x8ff   : > { %v6607_v62 = vpop.f32.mrb[102].mxu1  ;;  %7001 = vmatprep.mubr.msk.f32.mxu1 %vm1435_vm1, %v6606_v6 }
 0x900   : > { %7433 = vmatpush3.bf16.msra.mxu1 %v11595_v26  ;;  %v6608_v24 = vpop.f32.mrb[103].mxu1 }
 0x901   : > { %v6609_v39 = vadd.f32 %v6608_v24, %v6607_v62  ;;  %7426 = vmatprep.subr.bf16.mxu1 %v11599_v29 }
 0x903   : > { %v6610_v35 = vpop.f32.mrb[104].mxu1  ;;  %7002 = vmatmul.mubr.msk.f32.gmra.mrb[2].mxu1 %vm1435_vm1, %v6609_v39 }
 0x904   : > { %7434 = vmatpush3.bf16.msra.mxu1 %v11607_v48  ;;  %v6611_v61 = vpop.f32.mrb[105].mxu1 }
 0x905   : > { %v6612_v43 = vadd.f32 %v6611_v61, %v6610_v35  ;;  %7427 = vmatprep.subr.bf16.mxu1 %v11611_v36 }
 0x907   : > { %7004 = vmatprep.mubr.msk.f32.mxu1 %vm1435_vm1, %v6612_v43 }
 0x908   : > { %7435 = vmatpush3.bf16.msra.mxu1 %v11619_v59 }
 0x909   : > { %v5019_v60 = vpop.xlane.xlu1 %5018  ;;  %7428 = vmatprep.subr.bf16.mxu1 %v11623_v46 }
 0x90a   : > { %8506 = vrcp.f32 %v5019_v60 }
 0x90c   : > { %7436 = vmatpush3.bf16.msra.mxu1 %v11635_v18 }
 0x90d   : > { %v5022_v26 = vpop.xlane.xlu0 %5021  ;;  %7429 = vmatprep.subr.bf16.mxu1 %v11632_v7 }
 0x90e   : > { %8508 = vrcp.f32 %v5022_v26 }
 0x910   : > { %7437 = vmatpush3.bf16.msra.mxu1 %v11640_v15 }
 0x911   : > { %v5025_v29 = vpop.xlane.xlu1 %5024  ;;  %v11720_v48 = vpop.xlane.xlu0 %5033  ;;  %7430 = vmatprep.subr.bf16.mxu1 %v11648_v11 }
 0x912   : > { %8510 = vrcp.f32 %v5025_v29 }
 0x914   : > { %v8507_v36 = vpop.eup %8506  ;;  %7438 = vmatpush3.bf16.msra.mxu1 %v11655_v27 }
 0x915   : > { %v5028_v59 = vpop.xlane.xlu1 %5027  ;;  %v8146_v52 = vpop.permute.xlu0 %8145  ;;  %v5067_v30 = vmul.f32 %v8507_v36, %v11510_v56  ;;  %v5066_v26 = vmul.f32 %v8507_v36, %v11505_v33 }
 0x916   : > { %v8148_v46 = vunpack.i.h.bf16 %v8146_v52  ;;  %v8147_v32 = vunpack.i.l.bf16 %v8146_v52  ;;  %8512 = vrcp.f32 %v5028_v59 }
 0x917   : > { %5273 = vmatprep.mubr.f32.mxu0 %v5067_v30 }
 0x918   : > { %v7420_v18 = vpack.c.bf16 %v8148_v46, %v8147_v32  ;;  %v8509_v61 = vpop.eup %8508 }
 0x919   : > { %v5031_v3 = vpop.xlane.xlu1 %5030  ;;  %v5070_v52 = vmul.f32 %v8509_v61, %v11529_v55  ;;  %v5069_v32 = vmul.f32 %v8509_v61, %v11525_v63 }
 0x91a   : > { %7421 = vmatprep.subr.bf16.mxu0 %v7420_v18  ;;  %7431 = vmatprep.subr.bf16.mxu1 %v7420_v18  ;;  %8514 = vrcp.f32 %v5031_v3 }
 0x91b   : > { %8516 = vrcp.f32 %v11720_v48 }
 0x91c   : > { %v8511_v30 = vpop.eup %8510 }
 0x91d   : > { %v11725_v7 = vpop.xlane.xlu1 %5036  ;;  %v5072_v3 = vmul.f32 %v8511_v30, %v11545_v21 }
 0x91e   : > { %8518 = vrcp.f32 %v11725_v7 }
 0x921   : > { %v11727_v15 = vpop.xlane.xlu1 %5039 }
 0x922   : > { %8520 = vrcp.f32 %v11727_v15 }
 0x923   : > { %v6613_v22 = vpop.f32.mrb[106].mxu1 }
 0x924   : > { %v6614_v11 = vpop.f32.mrb[107].mxu1 }
 0x925   : > { %v11729_v40 = vpop.xlane.xlu1 %5042  ;;  %v6615_v27 = vadd.f32 %v6614_v11, %v6613_v22  ;;  %v5073_v22 = vmul.f32 %v8511_v30, %v11549_v14  ;;  %v8513_v11 = vpop.eup %8512 }
 0x926   : > { %8522 = vrcp.f32 %v11729_v40 }
 0x927   : > { %7005 = vmatmul.mubr.msk.f32.gmra.mrb[4].mxu1 %vm1435_vm1, %v6615_v27  ;;  %v5076_v27 = vmul.f32 %v8513_v11, %v11561_v34 }
 0x929   : > { %v11732_v49 = vpop.xlane.xlu1 %5045 }
 0x92a   : > { %8524 = vrcp.f32 %v11732_v49 }
 0x92b   : > { %v6616_v56 = vpop.f32.mrb[108].mxu1 }
 0x92c   : > { %v6617_v0 = vpop.f32.mrb[109].mxu1 }
 0x92d   : > { %v11734_v9 = vpop.xlane.xlu1 %5048  ;;  %v6618_v20 = vadd.f32 %v6617_v0, %v6616_v56  ;;  %v8515_v56 = vpop.eup %8514 }
 0x92e   : > { %v5078_v34 = vmul.f32 %v8515_v56, %v11569_v45  ;;  %v8517_v48 = vpop.eup %8516  ;;  %8526 = vrcp.f32 %v11734_v9 }
 0x92f   : > { %v6619_v53 = vpop.f32.mrb[110].mxu1  ;;  %7007 = vmatprep.mubr.msk.f32.mxu1 %vm1435_vm1, %v6618_v20  ;;  %v5075_v20 = vmul.f32 %v8513_v11, %v11559_v25  ;;  %v5082_v61 = vmul.f32 %v8517_v48, %v11541_v41  ;;  %v5081_v7 = vmul.f32 %v8517_v48, %v11535_v47 }
 0x930   : > { %v6620_v31 = vpop.f32.mrb[111].mxu1 }
 0x931   : > { %v8151_v54 = vpop.permute.xlu1 %8150  ;;  %v6621_v24 = vadd.f32 %v6620_v31, %v6619_v53  ;;  %v5079_v53 = vmul.f32 %v8515_v56, %v11573_v57 }
 0x932   : > { %v8153_v6 = vunpack.i.h.bf16 %v8151_v54  ;;  %v8152_v62 = vunpack.i.l.bf16 %v8151_v54 }
 0x933   : > { %v6622_v35 = vpop.f32.mrb[112].mxu1  ;;  %7008 = vmatmul.mubr.msk.f32.gmra.mrb[6].mxu1 %vm1435_vm1, %v6621_v24 }
 0x934   : > { %v7422_v39 = vpack.c.bf16 %v8153_v6, %v8152_v62  ;;  %v6623_v43 = vpop.f32.mrb[113].mxu1 }
 0x935   : > { %v6624_v60 = vadd.f32 %v6623_v43, %v6622_v35  ;;  %v8519_v43 = vpop.eup %8518 }
 0x936   : > { %7423 = vmatpush3.bf16.msra.mxu0 %v7422_v39  ;;  %7439 = vmatpush3.bf16.msra.mxu1 %v7422_v39  ;;  %v5085_v15 = vmul.f32 %v8519_v43, %v11581_v1  ;;  %v5084_v40 = vmul.f32 %v8519_v43, %v11577_v58 }
 0x937   : > { %v6625_v29 = vpop.f32.mrb[114].mxu1  ;;  %7010 = vmatprep.mubr.msk.f32.mxu1 %vm1435_vm1, %v6624_v60  ;;  %v8521_v60 = vpop.eup %8520 }
 0x938   : > { %v6626_v46 = vpop.f32.mrb[115].mxu1  ;;  %v5088_v41 = vmul.f32 %v8521_v60, %v11592_v50  ;;  %v5087_v47 = vmul.f32 %v8521_v60, %v11587_v8 }
 0x939   : > { %5274 = vmatmul.mubr.f32.vlgmr.msra.gmra.mrb[192].mxu0 %v5066_v26  ;;  %v6627_v59 = vadd.f32 %v6626_v46, %v6625_v29  ;;  %v8523_v29 = vpop.eup %8522 }
 0x93a   : > { %5278 = vmatprep.mubr.f32.mxu0 %v5070_v52  ;;  %v5091_v49 = vmul.f32 %v8523_v29, %v11601_v17  ;;  %v8525_v1 = vpop.eup %8524  ;;  %v5090_v46 = vmul.f32 %v8523_v29, %v11597_v13 }
 0x93b   : > { %v6628_v18 = vpop.f32.mrb[116].mxu1  ;;  %7011 = vmatmul.mubr.msk.f32.gmra.mrb[8].mxu1 %vm1435_vm1, %v6627_v59  ;;  %v5094_v58 = vmul.f32 %v8525_v1, %v11616_v37  ;;  %v8527_v9 = vpop.eup %8526  ;;  %v5093_v59 = vmul.f32 %v8525_v1, %v11609_v4 }
 0x93c   : > { %v6629_v33 = vpop.f32.mrb[117].mxu1  ;;  %v5097_v8 = vmul.f32 %v8527_v9, %v11629_v28  ;;  %v5096_v17 = vmul.f32 %v8527_v9, %v11621_v16 }
 0x93d   : > { %5279 = vmatmul.mubr.f32.gmra.mrb[194].mxu0 %v5069_v32  ;;  %v6630_v36 = vadd.f32 %v6629_v33, %v6628_v18 }
 0x93e   : > { %5283 = vmatprep.mubr.f32.mxu0 %v5073_v22 }
 0x93f   : > { %v6631_v55 = vpop.f32.mrb[118].mxu1  ;;  %7013 = vmatprep.mubr.msk.f32.mxu1 %vm1435_vm1, %v6630_v36 }
 0x940   : > { %v6632_v0 = vpop.f32.mrb[119].mxu1 }
 0x941   : > { %5284 = vmatmul.mubr.f32.gmra.mrb[196].mxu0 %v5072_v3  ;;  %v6633_v63 = vadd.f32 %v6632_v0, %v6631_v55 }
 0x942   : > { %5288 = vmatprep.mubr.f32.mxu0 %v5076_v27 }
 0x943   : > { %v6634_v14 = vpop.f32.mrb[120].mxu1  ;;  %7014 = vmatmul.mubr.msk.f32.gmra.mrb[10].mxu1 %vm1435_vm1, %v6633_v63 }
 0x944   : > { %v6635_v54 = vpop.f32.mrb[121].mxu1 }
 0x945   : > { %5289 = vmatmul.mubr.f32.gmra.mrb[198].mxu0 %v5075_v20  ;;  %v6636_v21 = vadd.f32 %v6635_v54, %v6634_v14 }
 0x946   : > { %5293 = vmatprep.mubr.f32.mxu0 %v5079_v53  ;;  %v5052_v26 = vpop.xlane.xlu0 %5051 }
 0x947   : > { %v6637_v31 = vpop.f32.mrb[122].mxu1  ;;  %7016 = vmatprep.mubr.msk.f32.mxu1 %vm1435_vm1, %v6636_v21  ;;  %8528 = vrcp.f32 %v5052_v26 }
 0x948   : > { %v6638_v6 = vpop.f32.mrb[123].mxu1 }
 0x949   : > { %5294 = vmatmul.mubr.f32.gmra.mrb[200].mxu0 %v5078_v34  ;;  %v6639_v25 = vadd.f32 %v6638_v6, %v6637_v31 }
 0x94a   : > { %v5058_v52 = vpop.xlane.xlu0 %5057 }
 0x94b   : > { %v6640_v62 = vpop.f32.mrb[124].mxu1  ;;  %7017 = vmatmul.mubr.msk.f32.gmra.mrb[12].mxu1 %vm1435_vm1, %v6639_v25 }
 0x94c   : > { %v6641_v57 = vpop.f32.mrb[125].mxu1 }
 0x94d   : > { %v6642_v24 = vadd.f32 %v6641_v57, %v6640_v62 }
 0x94e   : > { %v5061_v50 = vpop.xlane.xlu0 %5060 }
 0x94f   : > { %v6643_v39 = vpop.f32.mrb[126].mxu1  ;;  %7019 = vmatprep.mubr.msk.f32.mxu1 %vm1435_vm1, %v6642_v24 }
 0x950   : > { %v6644_v45 = vpop.f32.mrb[127].mxu1 }
 0x951   : > { %v6645_v35 = vadd.f32 %v6644_v45, %v6643_v39  ;;  %v8529_v32 = vpop.eup %8528 }
 0x952   : > { %v5064_v18 = vpop.xlane.xlu0 %5063  ;;  %v5100_v13 = vmul.f32 %v8529_v32, %v11670_v10  ;;  %v5099_v22 = vmul.f32 %v8529_v32, %v11668_v5 }
 0x953   : > { %7020 = vmatmul.mubr.msk.f32.gmra.mrb[14].mxu1 %vm1435_vm1, %v6645_v35 }
 0x954   : > { %5298 = vmatprep.mubr.f32.mxu1 %v5082_v61 }
 0x957   : > { %5299 = vmatmul.mubr.f32.vlgmr.msra.gmra.mrb[128].mxu1 %v5081_v7 }
 0x958   : > { %5303 = vmatprep.mubr.f32.mxu1 %v5085_v15 }
 0x95b   : > { %5304 = vmatmul.mubr.f32.gmra.mrb[130].mxu1 %v5084_v40 }
 0x95c   : > { %5308 = vmatprep.mubr.f32.mxu1 %v5088_v41 }
 0x95f   : > { %5309 = vmatmul.mubr.f32.gmra.mrb[132].mxu1 %v5087_v47 }
 0x960   : > { %5313 = vmatprep.mubr.f32.mxu1 %v5091_v49 }
 0x962   : > { %v5055_v30 = vpop.xlane.xlu1 %5054 }
 0x963   : > { %8530 = vrcp.f32 %v5055_v30  ;;  %5314 = vmatmul.mubr.f32.gmra.mrb[134].mxu1 %v5090_v46 }
 0x964   : > { %5318 = vmatprep.mubr.f32.mxu1 %v5094_v58  ;;  %8532 = vrcp.f32 %v5058_v52 }
 0x965   : > { %8534 = vrcp.f32 %v5061_v50 }
 0x966   : > { %8536 = vrcp.f32 %v5064_v18  ;;  %v5695_v18 = vld [vmem:[%s11882_s7] ss:$0 sm:$0xff] }
 0x967   : > { %5319 = vmatmul.mubr.f32.gmra.mrb[136].mxu1 %v5093_v59 }
 0x968   : > { %5323 = vmatprep.mubr.f32.mxu1 %v5097_v8 }
 0x96b   : > { %5324 = vmatmul.mubr.f32.gmra.mrb[138].mxu1 %v5096_v17 }
 0x96c   : > { %5328 = vmatprep.mubr.f32.mxu1 %v5100_v13 }
 0x96d   : > { %v8531_v37 = vpop.eup %8530 }
 0x96e   : > { %v5103_v11 = vmul.f32 %v8531_v37, %v11700_v38  ;;  %v8533_v4 = vpop.eup %8532  ;;  %v5102_v28 = vmul.f32 %v8531_v37, %v11698_v44 }
 0x96f   : > { %5329 = vmatmul.mubr.f32.gmra.mrb[140].mxu1 %v5099_v22  ;;  %v5106_v33 = vmul.f32 %v8533_v4, %v11676_v12  ;;  %v8535_v36 = vpop.eup %8534  ;;  %v5105_v16 = vmul.f32 %v8533_v4, %v11672_v19  ;;  %v5354_v12 = vld [vmem:[#allocation2 + $0x18] sm:$0xff] }
 0x970   : > { %5333 = vmatprep.mubr.f32.mxu1 %v5103_v11  ;;  %v5109_v10 = vmul.f32 %v8535_v36, %v11682_v23  ;;  %v8537_v3 = vpop.eup %8536  ;;  %v5108_v5 = vmul.f32 %v8535_v36, %v11678_v2  ;;  %7022 = vmatprep.subr.mxu1 %v5354_v12 }
 0x971   : > { %v5112_v38 = vmul.f32 %v8537_v3, %v11688_v51  ;;  %v5111_v44 = vmul.f32 %v8537_v3, %v11684_v42  ;;  %7023 = vmatpush3.msra.mxu1 %v5354_v12 }
 0x973   : > { %5334 = vmatmul.mubr.f32.gmra.mrb[142].mxu1 %v5102_v28 }
 0x974   : > { %5338 = vmatprep.mubr.f32.mxu1 %v5106_v33 }
 0x977   : > { %5339 = vmatmul.mubr.f32.gmra.mrb[144].mxu1 %v5105_v16 }
 0x978   : > { %5343 = vmatprep.mubr.f32.mxu1 %v5109_v10 }
 0x97b   : > { %5344 = vmatmul.mubr.f32.gmra.mrb[146].mxu1 %v5108_v5 }
 0x97c   : > { %5348 = vmatprep.mubr.f32.mxu1 %v5112_v38 }
 0x97f   : > { %5349 = vmatmul.mubr.f32.gmra.mrb[148].mxu1 %v5111_v44 }
 0xa0c   : > { %v6759_v55 = vpop.f32.mrb[192].mxu0 }
 0xa0d   : > { %v6760_v27 = vpop.f32.mrb[193].mxu0 }
 0xa0e   : > { %v6761_v19 = vadd.f32 %v6760_v27, %v6759_v55 }
 0xa10   : > { %v6762_v56 = vpop.f32.mrb[194].mxu0  ;;  %7024 = vmatprep.mubr.msk.f32.mxu1 %vm1435_vm1, %v6761_v19 }
 0xa11   : > { %v6763_v23 = vpop.f32.mrb[195].mxu0 }
 0xa12   : > { %v6764_v0 = vadd.f32 %v6763_v23, %v6762_v56 }
 0xa14   : > { %v6765_v63 = vpop.f32.mrb[196].mxu0  ;;  %7025 = vmatmul.mubr.msk.f32.vlgmr.msra.gmra.mrb[0].mxu1 %vm1435_vm1, %v6764_v0 }
 0xa15   : > { %v6766_v2 = vpop.f32.mrb[197].mxu0 }
 0xa16   : > { %v6767_v51 = vadd.f32 %v6766_v2, %v6765_v63 }
 0xa18   : > { %v6768_v20 = vpop.f32.mrb[198].mxu0  ;;  %7027 = vmatprep.mubr.msk.f32.mxu1 %vm1435_vm1, %v6767_v51 }
 0xa19   : > { %v6769_v42 = vpop.f32.mrb[199].mxu0 }
 0xa1a   : > { %v6770_v14 = vadd.f32 %v6769_v42, %v6768_v20 }
 0xa1c   : > { %v6771_v53 = vpop.f32.mrb[200].mxu0  ;;  %7028 = vmatmul.mubr.msk.f32.gmra.mrb[2].mxu1 %vm1435_vm1, %v6770_v14 }
 0xa1d   : > { %v6772_v54 = vpop.f32.mrb[201].mxu0 }
 0xa1e   : > { %v6773_v21 = vadd.f32 %v6772_v54, %v6771_v53 }
 0xa20   : > { %7030 = vmatprep.mubr.msk.f32.mxu1 %vm1435_vm1, %v6773_v21 }
 0xa2a   : > { %v6774_v34 = vpop.f32.mrb[128].mxu1 }
 0xa2b   : > { %v6775_v31 = vpop.f32.mrb[129].mxu1 }
 0xa2c   : > { %v6776_v6 = vadd.f32 %v6775_v31, %v6774_v34 }
 0xa2e   : > { %v6777_v25 = vpop.f32.mrb[130].mxu1  ;;  %7031 = vmatmul.mubr.msk.f32.gmra.mrb[4].mxu1 %vm1435_vm1, %v6776_v6 }
 0xa2f   : > { %v6778_v62 = vpop.f32.mrb[131].mxu1 }
 0xa30   : > { %v6779_v57 = vadd.f32 %v6778_v62, %v6777_v25 }
 0xa32   : > { %v6780_v24 = vpop.f32.mrb[132].mxu1  ;;  %7033 = vmatprep.mubr.msk.f32.mxu1 %vm1435_vm1, %v6779_v57 }
 0xa33   : > { %v6781_v48 = vpop.f32.mrb[133].mxu1 }
 0xa34   : > { %v6782_v39 = vadd.f32 %v6781_v48, %v6780_v24 }
 0xa36   : > { %v6783_v45 = vpop.f32.mrb[134].mxu1  ;;  %7034 = vmatmul.mubr.msk.f32.gmra.mrb[6].mxu1 %vm1435_vm1, %v6782_v39 }
 0xa37   : > { %v6784_v35 = vpop.f32.mrb[135].mxu1 }
 0xa38   : > { %v6785_v61 = vadd.f32 %v6784_v35, %v6783_v45 }
 0xa3a   : > { %v6786_v43 = vpop.f32.mrb[136].mxu1  ;;  %7036 = vmatprep.mubr.msk.f32.mxu1 %vm1435_vm1, %v6785_v61 }
 0xa3b   : > { %v6787_v7 = vpop.f32.mrb[137].mxu1 }
 0xa3c   : > { %v6788_v15 = vadd.f32 %v6787_v7, %v6786_v43 }
 0xa3e   : > { %v6789_v60 = vpop.f32.mrb[138].mxu1  ;;  %7037 = vmatmul.mubr.msk.f32.gmra.mrb[8].mxu1 %vm1435_vm1, %v6788_v15 }
 0xa3f   : > { %v6790_v26 = vpop.f32.mrb[139].mxu1 }
 0xa40   : > { %v6791_v40 = vadd.f32 %v6790_v26, %v6789_v60 }
 0xa42   : > { %v6792_v41 = vpop.f32.mrb[140].mxu1  ;;  %7039 = vmatprep.mubr.msk.f32.mxu1 %vm1435_vm1, %v6791_v40 }
 0xa43   : > { %v6793_v29 = vpop.f32.mrb[141].mxu1 }
 0xa44   : > { %v6794_v47 = vadd.f32 %v6793_v29, %v6792_v41 }
 0xa46   : > { %v6795_v52 = vpop.f32.mrb[142].mxu1  ;;  %7040 = vmatmul.mubr.msk.f32.gmra.mrb[10].mxu1 %vm1435_vm1, %v6794_v47 }
 0xa47   : > { %v6796_v49 = vpop.f32.mrb[143].mxu1 }
 0xa48   : > { %v6797_v1 = vadd.f32 %v6796_v49, %v6795_v52 }
 0xa4a   : > { %v6798_v30 = vpop.f32.mrb[144].mxu1  ;;  %7042 = vmatprep.mubr.msk.f32.mxu1 %vm1435_vm1, %v6797_v1 }
 0xa4b   : > { %v6799_v46 = vpop.f32.mrb[145].mxu1 }
 0xa4c   : > { %v6800_v58 = vadd.f32 %v6799_v46, %v6798_v30 }
 0xa4e   : > { %v6801_v9 = vpop.f32.mrb[146].mxu1  ;;  %7043 = vmatmul.mubr.msk.f32.gmra.mrb[12].mxu1 %vm1435_vm1, %v6800_v58 }
 0xa4f   : > { %v6802_v50 = vpop.f32.mrb[147].mxu1 }
 0xa50   : > { %v6803_v59 = vadd.f32 %v6802_v50, %v6801_v9 }
 0xa52   : > { %v6804_v8 = vpop.f32.mrb[148].mxu1  ;;  %7045 = vmatprep.mubr.msk.f32.mxu1 %vm1435_vm1, %v6803_v59 }
 0xa53   : > { %v6805_v32 = vpop.f32.mrb[149].mxu1 }
 0xa54   : > { %v6806_v17 = vadd.f32 %v6805_v32, %v6804_v8 }
 0xa56   : > { %7046 = vmatmul.mubr.msk.f32.gmra.mrb[14].mxu1 %vm1435_vm1, %v6806_v17 }
 0xae7   : > { %v7026_v13 = vpop.f32.mrb[0].mxu1 }
 0xae8   : > { %v7440_v37 = vadd.f32 %v7026_v13, %v5695_v18  ;;  %v5469_v22 = vpop.f32.mrb[1].mxu1 }
 0xae9   : > { %v7441_v11 = vadd.f32 %v5695_v18, %v5469_v22 }
 0xaea   : > { %5565 = vst [vmem:[%s11805_s21 + $0x8] sm:$0xff] %v7440_v37 }
 0xaeb   : > { %5564 = vst [vmem:[%s11805_s21] sm:$0xff] %v7441_v11 }
 0xaef   : > { %v7029_v4 = vpop.f32.mrb[2].mxu1 }
 0xaf0   : > { %v7442_v28 = vadd.f32 %v7029_v4, %v5695_v18  ;;  %v5479_v33 = vpop.f32.mrb[3].mxu1 }
 0xaf1   : > { %v7443_v36 = vadd.f32 %v5695_v18, %v5479_v33 }
 0xaf2   : > { %5567 = vst [vmem:[%s11805_s21 + $0x18] sm:$0xff] %v7442_v28 }
 0xaf3   : > { %5566 = vst [vmem:[%s11805_s21 + $0x10] sm:$0xff] %v7443_v36 }
 0xb01   : > { %v7032_v16 = vpop.f32.mrb[4].mxu1 }
 0xb02   : > { %v7444_v10 = vadd.f32 %v7032_v16, %v5695_v18  ;;  %v5489_v3 = vpop.f32.mrb[5].mxu1 }
 0xb03   : > { %v7445_v5 = vadd.f32 %v5695_v18, %v5489_v3 }
 0xb04   : > { %5569 = vst [vmem:[%s11805_s21 + $0x28] sm:$0xff] %v7444_v10 }
 0xb05   : > { %5568 = vst [vmem:[%s11805_s21 + $0x20] sm:$0xff] %v7445_v5 }
 0xb09   : > { %v7035_v38 = vpop.f32.mrb[6].mxu1 }
 0xb0a   : > { %v7446_v44 = vadd.f32 %v7035_v38, %v5695_v18  ;;  %v5499_v12 = vpop.f32.mrb[7].mxu1 }
 0xb0b   : > { %v7447_v55 = vadd.f32 %v5695_v18, %v5499_v12 }
 0xb0c   : > { %5571 = vst [vmem:[%s11805_s21 + $0x38] sm:$0xff] %v7446_v44 }
 0xb0d   : > { %5570 = vst [vmem:[%s11805_s21 + $0x30] sm:$0xff] %v7447_v55 }
 0xb11   : > { %v7038_v27 = vpop.f32.mrb[8].mxu1 }
 0xb12   : > { %v7448_v19 = vadd.f32 %v7038_v27, %v5695_v18  ;;  %v5509_v56 = vpop.f32.mrb[9].mxu1 }
 0xb13   : > { %v7449_v23 = vadd.f32 %v5695_v18, %v5509_v56 }
 0xb14   : > { %5573 = vst [vmem:[%s11805_s21 + $0x48] sm:$0xff] %v7448_v19 }
 0xb15   : > { %5572 = vst [vmem:[%s11805_s21 + $0x40] sm:$0xff] %v7449_v23 }
 0xb19   : > { %v7041_v0 = vpop.f32.mrb[10].mxu1 }
 0xb1a   : > { %v7450_v63 = vadd.f32 %v7041_v0, %v5695_v18  ;;  %v5519_v2 = vpop.f32.mrb[11].mxu1 }
 0xb1b   : > { %v7451_v51 = vadd.f32 %v5695_v18, %v5519_v2 }
 0xb1c   : > { %5575 = vst [vmem:[%s11805_s21 + $0x58] sm:$0xff] %v7450_v63 }
 0xb1d   : > { %5574 = vst [vmem:[%s11805_s21 + $0x50] sm:$0xff] %v7451_v51 }
 0xb21   : > { %v7044_v20 = vpop.f32.mrb[12].mxu1 }
 0xb22   : > { %v7452_v42 = vadd.f32 %v7044_v20, %v5695_v18  ;;  %v5529_v14 = vpop.f32.mrb[13].mxu1 }
 0xb23   : > { %v7453_v53 = vadd.f32 %v5695_v18, %v5529_v14 }
 0xb24   : > { %5577 = vst [vmem:[%s11805_s21 + $0x68] sm:$0xff] %v7452_v42 }
 0xb25   : > { %5576 = vst [vmem:[%s11805_s21 + $0x60] sm:$0xff] %v7453_v53 }
 0xb29   : > { %v7047_v54 = vpop.f32.mrb[14].mxu1 }
 0xb2a   : > { %v7454_v21 = vadd.f32 %v7047_v54, %v5695_v18  ;;  %v5539_v34 = vpop.f32.mrb[15].mxu1 }
 0xb2b   : > { %v7455_v31 = vadd.f32 %v5695_v18, %v5539_v34 }
 0xb2c   : > { %5579 = vst [vmem:[%s11805_s21 + $0x78] sm:$0xff] %v7454_v21 }
 0xb2d   : > { %5578 = vst [vmem:[%s11805_s21 + $0x70] sm:$0xff] %v7455_v31 }
 0xb2e   : > { %8579 = shalt.err (!%p8576_p7)
}
 0xb2f   : > { %s8580_s10 = scalar_lea.hbm %s11826_s25, 2048  ;;  %s8584_s21 = scalar_lea.hbm %s11883_s8, 4096 }
 0xb30   : > { %p8581_p8 = scmp.ne.s32.totalorder %s11826_s25, %s8580_s10  ;;  %p8585_p1 = scmp.lt.u32.totalorder %s11826_s25, %s11883_s8 }
 0xb31   : > { %p8586_p0 = scmp.lt.u32.totalorder %s8584_s21, %s8580_s10  ;;  %p8588_p6 = scmp.lt.u32.totalorder %s8580_s10, %s11826_s25 }
 0xb32   : > { %p8582_p11 = pnand %p8581_p8, %p12352_p9 }
 0xb33   : > { %p8587_p5 = por %p8586_p0, %p8585_p1 }
 0xb34   : > { %p8583_p13 = pneg %p8582_p11 }
 0xb35   : > { %p8589_p10 = por %p8588_p6, %p8587_p5 }
 0xb37   : > { %p8590_p12 = pnand %p8589_p10, %p8583_p13 }
 0xb39   : > { %8593 = shalt.err (!%p8590_p12)
}
 0xb3a   : > { %s8646_s17 = smov 128   ;;  %s8647_s9 = smov 8  }
 0xb3b   : > { %7524 = dma.vmem_to_hbm [thread:$0]  (%p12352_p9), %s11828_s20, 2048, %s11826_s25, %s11834_s13, %s8646_s17, %s8646_s17, %s8647_s9  }
 0xb3c PF: > { %p7536_p2 = scmp.ge.s32.totalorder %s8632_s30, 2  ;;  %s5609_s24 = sand.u32 1, %s8620_s27  }
 0xb3d   : > { %p12353_p3 = scmp.ne.s32.totalorder %s12050_s16, 0  ;;  %s5610_s26 = scalar_lea.sflag [#allocation4], %s5609_s24 }
 0xb3f   : > { %p7531_p4 = pnand %p7536_p2, %p12353_p3 }
 0xb41   : > { %8615 = dma.done.wait (!%p7531_p4), %s5610_s26, 2048  }
 0xb42   : > { %8617 = vsyncadd (!%p7531_p4), %s5610_s26, 4294965248  ;;  %p19_p7 = scmp.ge.s32.totalorder %s8718_s11, 4   ;;  %s12354_s27 = smov %s8624_s28 }
 0xb43   : > { %s12355_s28 = smov %s8628_s29  ;;  %s12356_s29 = smov %s8729_s14 }
 0xb44   : > { %s12357_s30 = smov %s8718_s11  ;;  %21 = sbr.rel (!%p19_p7) target bundleno = 4 (0x4), region = 96 }
 0xb4b   :  { %5615 = vsyncpa [#allocation3], 1 }
 0xb4c   :  { %5617 = vsyncpa [#allocation3 + $0x1], 1 }
 0xb4d   :  { %5618 = vsyncpa [#allocation4], 1 }
 0xb4e   :  { %5620 = vsyncpa [#allocation4 + $0x1], 1 }

</bundles_post_ra>
